<compile_context>
chip_gen: v6e
topology: v6e:2x2x1
jax: 0.10.0
libtpu: 0.0.40
codegen_flags: <defaults>
</compile_context>

<pallas_src>
import jax
import jax.numpy as jnp
from jax import lax
from jax.experimental import pallas as pl
from jax.experimental.pallas import tpu as pltpu

EPS = 1e-5  # nn.InstanceNorm2d default eps


def _reflect_pad_into(pad_ref, src, H, W):
    """Write src (H, W, C) into pad_ref (H+2, W+2, C) with PyTorch 'reflect' pad=1."""
    pad_ref[1:H + 1, 1:W + 1, :] = src
    pad_ref[0:1, 1:W + 1, :] = src[1:2, :, :]                   # top    = original row 1
    pad_ref[H + 1:H + 2, 1:W + 1, :] = src[H - 2:H - 1, :, :]   # bottom = original row H-2
    pad_ref[:, 0:1, :] = pad_ref[:, 2:3, :]                     # left  (+corners)
    pad_ref[:, W + 1:W + 2, :] = pad_ref[:, W - 1:W, :]         # right (+corners)


def _conv3x3(pad_ref, col_ref, w_ref, H, W, C):
    """3x3 'VALID' conv on a reflect-padded (H+2, W+2, C) ref.

    Strip-wise in-VMEM im2col: the 9 shifted taps are written (static slices) into the
    (H, W, 9C) col scratch, then a single (HW, 9C) x (9C, C) MXU matmul produces the
    f32 conv output. Operands stay in the scratch dtype (bf16 in production).
    """
    for dy in range(3):
        for dx in range(3):
            k = dy * 3 + dx
            col_ref[:, :, k * C:(k + 1) * C] = pad_ref[dy:dy + H, dx:dx + W, :]
    return jnp.dot(col_ref[...].reshape(H * W, 9 * C), w_ref[...],
                   preferred_element_type=jnp.float32)          # (HW, C) f32


def _instance_norm(y, hw):
    """y: (HW, C) f32. One-pass per-channel biased mean/var (sum + sum-of-squares)."""
    s = jnp.sum(y, axis=0, keepdims=True)
    s2 = jnp.sum(y * y, axis=0, keepdims=True)
    mean = s * (1.0 / hw)
    var = jnp.maximum(s2 * (1.0 / hw) - mean * mean, 0.0)       # guard tiny cancellation
    return (y - mean) * lax.rsqrt(var + EPS)


def _residual_block_kernel(x_ref, w1_ref, w2_ref, out_ref, xpad_ref, y1pad_ref, col_ref):
    H, W, C = out_ref.shape
    HW = H * W

    x = x_ref[...]                                              # (H, W, C), input dtype

    # ---- in-kernel reflect pad of x; cast to the MXU dtype exactly once ----
    _reflect_pad_into(xpad_ref, x.astype(xpad_ref.dtype), H, W)

    # ---- ConvBlock 1: conv + InstanceNorm + ReLU (bias cancels under IN) ----
    y1 = _instance_norm(_conv3x3(xpad_ref, col_ref, w1_ref, H, W, C), HW)
    y1 = jnp.maximum(y1, 0.0)

    # ---- rebuild the reflect-padded y1 in VMEM (y1 never touches HBM) ----
    _reflect_pad_into(y1pad_ref, y1.reshape(H, W, C).astype(y1pad_ref.dtype), H, W)

    # ---- ConvBlock 2: conv + InstanceNorm (no activation) ----
    y2 = _instance_norm(_conv3x3(y1pad_ref, col_ref, w2_ref, H, W, C), HW)

    # ---- residual skip at store time, reusing the resident x block (no re-slice) ----
    out_ref[...] = (x.astype(jnp.float32) + y2.reshape(H, W, C)).astype(out_ref.dtype)


def _tile_padded_bytes(shape, itemsize):
    """VMEM footprint after (8, 128) tile padding of the last two dims."""
    *lead, s, l = shape
    n = itemsize
    for d in lead:
        n *= d
    return n * (-(-s // 8) * 8) * (-(-l // 128) * 128)


def residual_block(x, w1, w2, *, mxu_dtype=jnp.bfloat16):
    """ResidualBlock.forward for NHWC x: (B, H, W, C); w1, w2: (3, 3, C, C) HWIO.

    Conv biases are intentionally not taken: they cancel exactly under
    InstanceNorm2d(affine=False), so passing them would be dead DMA + dead VPU work.

    Notes:
      * Feed bf16 activations from the caller to also halve streamed HBM bytes; the
        kernel casts to `mxu_dtype` once on entry either way (demo keeps f32 for the
        tight correctness check).
      * Production CycleGAN residual layers have C = 256 (a multiple of 128), which keeps
        the (HW, C)/(HW, 9C) operands lane-dense; the tiny demo C runs at low occupancy.
    """
    B, H, W, C = x.shape
    assert w1.shape == (3, 3, C, C) and w2.shape == (3, 3, C, C)
    assert H >= 2 and W >= 2, "reflect pad=1 needs H, W >= 2"

    # Flatten each weight to a single (9C, C) matmul operand (K = 9C), cast once on host.
    w1m = w1.reshape(9 * C, C).astype(mxu_dtype)
    w2m = w2.reshape(9 * C, C).astype(mxu_dtype)

    # ---- tile-padded VMEM need: in/out double-buffered, weights, scratches, live temps ----
    itm_x = x.dtype.itemsize
    itm_m = jnp.dtype(mxu_dtype).itemsize
    need = (
        2 * _tile_padded_bytes((H, W, C), itm_x)                # x blocks (double-buffered)
        + 2 * _tile_padded_bytes((H, W, C), itm_x)              # out blocks (double-buffered)
        + 2 * 2 * _tile_padded_bytes((9 * C, C), itm_m)         # w1, w2 (double-buffered)
        + 2 * _tile_padded_bytes((H + 2, W + 2, C), itm_m)      # xpad, y1pad scratch
        + _tile_padded_bytes((H, W, 9 * C), itm_m)              # im2col scratch
        + 6 * _tile_padded_bytes((H * W, C), 4)                 # live f32 temps (acc/y1/y2/...)
    )
    try:
        vmem_cap = pltpu.get_tpu_info().vmem_capacity_bytes     # 64 MiB v7x, 128 MiB v5e/v6e
    except Exception:                                           # pragma: no cover
        vmem_cap = 64 << 20                                     # conservative fallback
    vmem_limit = int(min(max(int(need * 1.25), 32 << 20), int(vmem_cap * 0.85)))
    # TODO(synk): if `need` exceeds ~85% of v7x's 64 MiB (e.g. H=W=64, C=256 with f32
    # activations), tile H into strips with a two-pass InstanceNorm (partial sum /
    # sum-of-squares, then normalize) instead of one block per batch element.

    out = pl.pallas_call(
        _residual_block_kernel,
        out_shape=jax.ShapeDtypeStruct((B, H, W, C), x.dtype),
        grid_spec=pltpu.PrefetchScalarGridSpec(
            num_scalar_prefetch=0,
            grid=(B,),
            in_specs=[
                pl.BlockSpec((pl.Squeezed(), H, W, C), lambda b: (b, 0, 0, 0)),
                # Weights are grid-invariant (index map constant), so the pipeline reuses
                # the same block every step. Single-buffering them (pipeline_mode=
                # pl.Buffered(1)) would save ~2.4 MB at C=256; kept at the default
                # double-buffering here for maximum compile portability.
                pl.BlockSpec((9 * C, C), lambda b: (0, 0)),
                pl.BlockSpec((9 * C, C), lambda b: (0, 0)),
            ],
            out_specs=pl.BlockSpec((pl.Squeezed(), H, W, C), lambda b: (b, 0, 0, 0)),
            scratch_shapes=[
                pltpu.VMEM((H + 2, W + 2, C), mxu_dtype),       # reflect-padded x
                pltpu.VMEM((H + 2, W + 2, C), mxu_dtype),       # reflect-padded y1
                pltpu.VMEM((H, W, 9 * C), mxu_dtype),           # im2col operand (K = 9C)
            ],
        ),
        compiler_params=pltpu.CompilerParams(
            dimension_semantics=("parallel",),   # batch across TCs (megacore / v7x)
            vmem_limit_bytes=vmem_limit,
        ),
        # TODO(synk): for v7x (2 TCs) with B == 1, add a second "parallel" grid axis that
        # splits H in half with a partial-stats InstanceNorm combine so both TCs get work.
    )(x, w1m, w2m)
    return out


# ---------------- pure-JAX reference (PyTorch semantics, incl. biases) ----------------
def _ref_conv_block(x, w, b, use_act):
    xp = jnp.pad(x, ((0, 0), (1, 1), (1, 1), (0, 0)), mode="reflect")
    y = lax.conv_general_dilated(xp, w, (1, 1), "VALID",
                                 dimension_numbers=("NHWC", "HWIO", "NHWC"),
                                 precision=lax.Precision.HIGHEST)
    y = y + b[None, None, None, :]
    mean = jnp.mean(y, axis=(1, 2), keepdims=True)
    var = jnp.mean((y - mean) ** 2, axis=(1, 2), keepdims=True)
    y = (y - mean) * lax.rsqrt(var + EPS)
    return jnp.maximum(y, 0.0) if use_act else y


def _ref_residual_block(x, w1, b1, w2, b2):
    return x + _ref_conv_block(_ref_conv_block(x, w1, b1, True), w2, b2, False)


if __name__ == "__main__":
    key = jax.random.PRNGKey(0)
    kx, kw1, kb1, kw2, kb2 = jax.random.split(key, 5)

    B, C, H, W = 2, 4, 16, 16
    # PyTorch-convention NCHW input; the kernel works in NHWC.
    x_nchw = jax.random.normal(kx, (B, C, H, W), jnp.float32)
    x = jnp.transpose(x_nchw, (0, 2, 3, 1))

    # ConvBlock params: Conv2d(C, C, 3, stride=1, padding=1, padding_mode='reflect') + bias.
    w1 = 0.1 * jax.random.normal(kw1, (3, 3, C, C), jnp.float32)   # HWIO
    b1 = 0.1 * jax.random.normal(kb1, (C,), jnp.float32)
    w2 = 0.1 * jax.random.normal(kw2, (3, 3, C, C), jnp.float32)   # HWIO
    b2 = 0.1 * jax.random.normal(kb2, (C,), jnp.float32)

    # Reference INCLUDES the biases; the kernel omits them (they cancel under IN).
    ref = _ref_residual_block(x, w1, b1, w2, b2)

    # f32-MXU path: tight check (proves bias cancellation + in-kernel reflect pad + im2col).
    out_f32 = jax.block_until_ready(residual_block(x, w1, w2, mxu_dtype=jnp.float32))
    assert out_f32.shape == (B, H, W, C), out_f32.shape
    err32 = float(jnp.max(jnp.abs(out_f32 - ref)))
    assert jnp.allclose(out_f32, ref, atol=2e-3, rtol=2e-3), f"f32 max abs err {err32}"

    # Default bf16-MXU path (production setting): per-channel relative-error check,
    # since InstanceNorm divides by the per-channel std (normalize the error likewise).
    out_bf16 = jax.block_until_ready(residual_block(x, w1, w2))
    ch_err = jnp.max(jnp.abs(out_bf16 - ref), axis=(0, 1, 2))
    ch_scale = jnp.std(ref, axis=(0, 1, 2)) + 1e-6
    rel = float(jnp.max(ch_err / ch_scale))
    assert rel < 0.15, f"bf16 per-channel relative err {rel}"

    print("KERNEL_OK")
</pallas_src>

<mosaic_0001>
module attributes {stable_mosaic.version = 11 : i64} {
  func.func @_residual_block_kernel(%arg0: i32, %arg1: memref<1x16x16x4xf32, #tpu.memory_space<vmem>>, %arg2: memref<36x4xf32, #tpu.memory_space<vmem>>, %arg3: memref<36x4xf32, #tpu.memory_space<vmem>>, %arg4: memref<1x16x16x4xf32, #tpu.memory_space<vmem>>, %arg5: memref<18x18x4xf32, #tpu.memory_space<vmem>>, %arg6: memref<18x18x4xf32, #tpu.memory_space<vmem>>, %arg7: memref<16x16x36xf32, #tpu.memory_space<vmem>>) attributes {dimension_semantics = [#tpu.dimension_semantics<parallel>], iteration_bounds = array<i64: 2>, scalar_prefetch = 0 : i64, scratch_operands = 3 : i64, tpu.core_type = #tpu.core_type<tc>, window_params = [{transform_indices = @transform_0, window_bounds = array<i64: 1, 16, 16, 4>}, {pipeline_mode = #tpu.pipeline_mode<synchronous>, transform_indices = @transform_1, window_bounds = array<i64: 36, 4>}, {pipeline_mode = #tpu.pipeline_mode<synchronous>, transform_indices = @transform_2, window_bounds = array<i64: 36, 4>}, {transform_indices = @transform_3, window_bounds = array<i64: 1, 16, 16, 4>}]} {
    %c0 = arith.constant 0 : index
    %c0_0 = arith.constant 0 : index
    %c0_1 = arith.constant 0 : index
    %c0_2 = arith.constant 0 : index
    %0 = vector.load %arg1[%c0, %c0_0, %c0_1, %c0_2] : memref<1x16x16x4xf32, #tpu.memory_space<vmem>>, vector<1x16x16x4xf32>
    %1 = vector.shape_cast %0 : vector<1x16x16x4xf32> to vector<16x16x4xf32>
    %c1 = arith.constant 1 : index
    %c1_3 = arith.constant 1 : index
    %c0_4 = arith.constant 0 : index
    %2 = vector.load %arg5[%c1, %c1_3, %c0_4] : memref<18x18x4xf32, #tpu.memory_space<vmem>>, vector<16x16x4xf32>
    tpu.vector_store %arg5[%c1, %c1_3, %c0_4], %1 {strides = array<i32>} : memref<18x18x4xf32, #tpu.memory_space<vmem>>, vector<16x16x4xf32>,
    %3 = vector.extract_strided_slice %1 {offsets = [1, 0, 0], sizes = [1, 16, 4], strides = [1, 1, 1]} : vector<16x16x4xf32> to vector<1x16x4xf32>
    %c0_5 = arith.constant 0 : index
    %c1_6 = arith.constant 1 : index
    %c0_7 = arith.constant 0 : index
    %4 = vector.load %arg5[%c0_5, %c1_6, %c0_7] : memref<18x18x4xf32, #tpu.memory_space<vmem>>, vector<1x16x4xf32>
    tpu.vector_store %arg5[%c0_5, %c1_6, %c0_7], %3 {strides = array<i32>} : memref<18x18x4xf32, #tpu.memory_space<vmem>>, vector<1x16x4xf32>,
    %5 = vector.extract_strided_slice %1 {offsets = [14, 0, 0], sizes = [1, 16, 4], strides = [1, 1, 1]} : vector<16x16x4xf32> to vector<1x16x4xf32>
    %c17 = arith.constant 17 : index
    %c1_8 = arith.constant 1 : index
    %c0_9 = arith.constant 0 : index
    %6 = vector.load %arg5[%c17, %c1_8, %c0_9] : memref<18x18x4xf32, #tpu.memory_space<vmem>>, vector<1x16x4xf32>
    tpu.vector_store %arg5[%c17, %c1_8, %c0_9], %5 {strides = array<i32>} : memref<18x18x4xf32, #tpu.memory_space<vmem>>, vector<1x16x4xf32>,
    %c0_10 = arith.constant 0 : index
    %c2 = arith.constant 2 : index
    %c0_11 = arith.constant 0 : index
    %7 = vector.load %arg5[%c0_10, %c2, %c0_11] : memref<18x18x4xf32, #tpu.memory_space<vmem>>, vector<18x1x4xf32>
    %c0_12 = arith.constant 0 : index
    %c0_13 = arith.constant 0 : index
    %c0_14 = arith.constant 0 : index
    %8 = vector.load %arg5[%c0_12, %c0_13, %c0_14] : memref<18x18x4xf32, #tpu.memory_space<vmem>>, vector<18x1x4xf32>
    tpu.vector_store %arg5[%c0_12, %c0_13, %c0_14], %7 {strides = array<i32>} : memref<18x18x4xf32, #tpu.memory_space<vmem>>, vector<18x1x4xf32>,
    %c0_15 = arith.constant 0 : index
    %c15 = arith.constant 15 : index
    %c0_16 = arith.constant 0 : index
    %9 = vector.load %arg5[%c0_15, %c15, %c0_16] : memref<18x18x4xf32, #tpu.memory_space<vmem>>, vector<18x1x4xf32>
    %c0_17 = arith.constant 0 : index
    %c17_18 = arith.constant 17 : index
    %c0_19 = arith.constant 0 : index
    %10 = vector.load %arg5[%c0_17, %c17_18, %c0_19] : memref<18x18x4xf32, #tpu.memory_space<vmem>>, vector<18x1x4xf32>
    tpu.vector_store %arg5[%c0_17, %c17_18, %c0_19], %9 {strides = array<i32>} : memref<18x18x4xf32, #tpu.memory_space<vmem>>, vector<18x1x4xf32>,
    %c0_20 = arith.constant 0 : index
    %c0_21 = arith.constant 0 : index
    %c0_22 = arith.constant 0 : index
    %11 = vector.load %arg5[%c0_20, %c0_21, %c0_22] : memref<18x18x4xf32, #tpu.memory_space<vmem>>, vector<16x16x4xf32>
    %c0_23 = arith.constant 0 : index
    %c0_24 = arith.constant 0 : index
    %c0_25 = arith.constant 0 : index
    %12 = vector.load %arg7[%c0_23, %c0_24, %c0_25] : memref<16x16x36xf32, #tpu.memory_space<vmem>>, vector<16x16x4xf32>
    tpu.vector_store %arg7[%c0_23, %c0_24, %c0_25], %11 {strides = array<i32>} : memref<16x16x36xf32, #tpu.memory_space<vmem>>, vector<16x16x4xf32>,
    %c0_26 = arith.constant 0 : index
    %c1_27 = arith.constant 1 : index
    %c0_28 = arith.constant 0 : index
    %13 = vector.load %arg5[%c0_26, %c1_27, %c0_28] : memref<18x18x4xf32, #tpu.memory_space<vmem>>, vector<16x16x4xf32>
    %c0_29 = arith.constant 0 : index
    %c0_30 = arith.constant 0 : index
    %c4 = arith.constant 4 : index
    %14 = vector.load %arg7[%c0_29, %c0_30, %c4] : memref<16x16x36xf32, #tpu.memory_space<vmem>>, vector<16x16x4xf32>
    tpu.vector_store %arg7[%c0_29, %c0_30, %c4], %13 {strides = array<i32>} : memref<16x16x36xf32, #tpu.memory_space<vmem>>, vector<16x16x4xf32>,
    %c0_31 = arith.constant 0 : index
    %c2_32 = arith.constant 2 : index
    %c0_33 = arith.constant 0 : index
    %15 = vector.load %arg5[%c0_31, %c2_32, %c0_33] : memref<18x18x4xf32, #tpu.memory_space<vmem>>, vector<16x16x4xf32>
    %c0_34 = arith.constant 0 : index
    %c0_35 = arith.constant 0 : index
    %c8 = arith.constant 8 : index
    %16 = vector.load %arg7[%c0_34, %c0_35, %c8] : memref<16x16x36xf32, #tpu.memory_space<vmem>>, vector<16x16x4xf32>
    tpu.vector_store %arg7[%c0_34, %c0_35, %c8], %15 {strides = array<i32>} : memref<16x16x36xf32, #tpu.memory_space<vmem>>, vector<16x16x4xf32>,
    %c1_36 = arith.constant 1 : index
    %c0_37 = arith.constant 0 : index
    %c0_38 = arith.constant 0 : index
    %17 = vector.load %arg5[%c1_36, %c0_37, %c0_38] : memref<18x18x4xf32, #tpu.memory_space<vmem>>, vector<16x16x4xf32>
    %c0_39 = arith.constant 0 : index
    %c0_40 = arith.constant 0 : index
    %c12 = arith.constant 12 : index
    %18 = vector.load %arg7[%c0_39, %c0_40, %c12] : memref<16x16x36xf32, #tpu.memory_space<vmem>>, vector<16x16x4xf32>
    tpu.vector_store %arg7[%c0_39, %c0_40, %c12], %17 {strides = array<i32>} : memref<16x16x36xf32, #tpu.memory_space<vmem>>, vector<16x16x4xf32>,
    %c1_41 = arith.constant 1 : index
    %c1_42 = arith.constant 1 : index
    %c0_43 = arith.constant 0 : index
    %19 = vector.load %arg5[%c1_41, %c1_42, %c0_43] : memref<18x18x4xf32, #tpu.memory_space<vmem>>, vector<16x16x4xf32>
    %c0_44 = arith.constant 0 : index
    %c0_45 = arith.constant 0 : index
    %c16 = arith.constant 16 : index
    %20 = vector.load %arg7[%c0_44, %c0_45, %c16] : memref<16x16x36xf32, #tpu.memory_space<vmem>>, vector<16x16x4xf32>
    tpu.vector_store %arg7[%c0_44, %c0_45, %c16], %19 {strides = array<i32>} : memref<16x16x36xf32, #tpu.memory_space<vmem>>, vector<16x16x4xf32>,
    %c1_46 = arith.constant 1 : index
    %c2_47 = arith.constant 2 : index
    %c0_48 = arith.constant 0 : index
    %21 = vector.load %arg5[%c1_46, %c2_47, %c0_48] : memref<18x18x4xf32, #tpu.memory_space<vmem>>, vector<16x16x4xf32>
    %c0_49 = arith.constant 0 : index
    %c0_50 = arith.constant 0 : index
    %c20 = arith.constant 20 : index
    %22 = vector.load %arg7[%c0_49, %c0_50, %c20] : memref<16x16x36xf32, #tpu.memory_space<vmem>>, vector<16x16x4xf32>
    tpu.vector_store %arg7[%c0_49, %c0_50, %c20], %21 {strides = array<i32>} : memref<16x16x36xf32, #tpu.memory_space<vmem>>, vector<16x16x4xf32>,
    %c2_51 = arith.constant 2 : index
    %c0_52 = arith.constant 0 : index
    %c0_53 = arith.constant 0 : index
    %23 = vector.load %arg5[%c2_51, %c0_52, %c0_53] : memref<18x18x4xf32, #tpu.memory_space<vmem>>, vector<16x16x4xf32>
    %c0_54 = arith.constant 0 : index
    %c0_55 = arith.constant 0 : index
    %c24 = arith.constant 24 : index
    %24 = vector.load %arg7[%c0_54, %c0_55, %c24] : memref<16x16x36xf32, #tpu.memory_space<vmem>>, vector<16x16x4xf32>
    tpu.vector_store %arg7[%c0_54, %c0_55, %c24], %23 {strides = array<i32>} : memref<16x16x36xf32, #tpu.memory_space<vmem>>, vector<16x16x4xf32>,
    %c2_56 = arith.constant 2 : index
    %c1_57 = arith.constant 1 : index
    %c0_58 = arith.constant 0 : index
    %25 = vector.load %arg5[%c2_56, %c1_57, %c0_58] : memref<18x18x4xf32, #tpu.memory_space<vmem>>, vector<16x16x4xf32>
    %c0_59 = arith.constant 0 : index
    %c0_60 = arith.constant 0 : index
    %c28 = arith.constant 28 : index
    %26 = vector.load %arg7[%c0_59, %c0_60, %c28] : memref<16x16x36xf32, #tpu.memory_space<vmem>>, vector<16x16x4xf32>
    tpu.vector_store %arg7[%c0_59, %c0_60, %c28], %25 {strides = array<i32>} : memref<16x16x36xf32, #tpu.memory_space<vmem>>, vector<16x16x4xf32>,
    %c2_61 = arith.constant 2 : index
    %c2_62 = arith.constant 2 : index
    %c0_63 = arith.constant 0 : index
    %27 = vector.load %arg5[%c2_61, %c2_62, %c0_63] : memref<18x18x4xf32, #tpu.memory_space<vmem>>, vector<16x16x4xf32>
    %c0_64 = arith.constant 0 : index
    %c0_65 = arith.constant 0 : index
    %c32 = arith.constant 32 : index
    %28 = vector.load %arg7[%c0_64, %c0_65, %c32] : memref<16x16x36xf32, #tpu.memory_space<vmem>>, vector<16x16x4xf32>
    tpu.vector_store %arg7[%c0_64, %c0_65, %c32], %27 {strides = array<i32>} : memref<16x16x36xf32, #tpu.memory_space<vmem>>, vector<16x16x4xf32>,
    %c0_66 = arith.constant 0 : index
    %c0_67 = arith.constant 0 : index
    %c0_68 = arith.constant 0 : index
    %29 = vector.load %arg7[%c0_66, %c0_67, %c0_68] : memref<16x16x36xf32, #tpu.memory_space<vmem>>, vector<16x16x36xf32>
    %30 = vector.shape_cast %29 : vector<16x16x36xf32> to vector<256x36xf32>
    %c0_69 = arith.constant 0 : index
    %c0_70 = arith.constant 0 : index
    %31 = vector.load %arg2[%c0_69, %c0_70] : memref<36x4xf32, #tpu.memory_space<vmem>>, vector<36x4xf32>
    %cst = arith.constant dense<0.000000e+00> : vector<256x4xf32>
    %32 = tpu.matmul %30, %31, %cst {dimension_numbers = #tpu.dot_dimension_numbers<[1], [0], [0], [1], [0, 0, 1, 1], [], []>} : vector<256x36xf32>, vector<36x4xf32>, vector<256x4xf32> -> vector<256x4xf32>
    %cst_71 = arith.constant dense<0.000000e+00> : vector<4xf32>
    %33 = vector.multi_reduction <add>, %32, %cst_71 [0] : vector<256x4xf32> to vector<4xf32>
    %34 = vector.shape_cast %33 : vector<4xf32> to vector<1x4xf32>
    %35 = arith.mulf %32, %32 : vector<256x4xf32>
    %cst_72 = arith.constant dense<0.000000e+00> : vector<4xf32>
    %36 = vector.multi_reduction <add>, %35, %cst_72 [0] : vector<256x4xf32> to vector<4xf32>
    %37 = vector.shape_cast %36 : vector<4xf32> to vector<1x4xf32>
    %cst_73 = arith.constant 3.906250e-03 : f32
    %38 = vector.broadcast %cst_73 : f32 to vector<1x4xf32>
    %39 = arith.mulf %34, %38 : vector<1x4xf32>
    %cst_74 = arith.constant 3.906250e-03 : f32
    %40 = vector.broadcast %cst_74 : f32 to vector<1x4xf32>
    %41 = arith.mulf %37, %40 : vector<1x4xf32>
    %42 = arith.mulf %39, %39 : vector<1x4xf32>
    %43 = arith.subf %41, %42 : vector<1x4xf32>
    %cst_75 = arith.constant 0.000000e+00 : f32
    %44 = vector.broadcast %cst_75 : f32 to vector<1x4xf32>
    %45 = arith.maximumf %43, %44 : vector<1x4xf32>
    %46 = vector.broadcast %39 : vector<1x4xf32> to vector<256x4xf32>
    %47 = arith.subf %32, %46 : vector<256x4xf32>
    %cst_76 = arith.constant 9.99999974E-6 : f32
    %48 = vector.broadcast %cst_76 : f32 to vector<1x4xf32>
    %49 = arith.addf %45, %48 : vector<1x4xf32>
    %50 = math.rsqrt %49 : vector<1x4xf32>
    %51 = vector.broadcast %50 : vector<1x4xf32> to vector<256x4xf32>
    %52 = arith.mulf %47, %51 : vector<256x4xf32>
    %cst_77 = arith.constant 0.000000e+00 : f32
    %53 = vector.broadcast %cst_77 : f32 to vector<256x4xf32>
    %54 = arith.maximumf %52, %53 : vector<256x4xf32>
    %55 = vector.shape_cast %54 : vector<256x4xf32> to vector<16x16x4xf32>
    %c1_78 = arith.constant 1 : index
    %c1_79 = arith.constant 1 : index
    %c0_80 = arith.constant 0 : index
    %56 = vector.load %arg6[%c1_78, %c1_79, %c0_80] : memref<18x18x4xf32, #tpu.memory_space<vmem>>, vector<16x16x4xf32>
    tpu.vector_store %arg6[%c1_78, %c1_79, %c0_80], %55 {strides = array<i32>} : memref<18x18x4xf32, #tpu.memory_space<vmem>>, vector<16x16x4xf32>,
    %57 = vector.extract_strided_slice %55 {offsets = [1, 0, 0], sizes = [1, 16, 4], strides = [1, 1, 1]} : vector<16x16x4xf32> to vector<1x16x4xf32>
    %c0_81 = arith.constant 0 : index
    %c1_82 = arith.constant 1 : index
    %c0_83 = arith.constant 0 : index
    %58 = vector.load %arg6[%c0_81, %c1_82, %c0_83] : memref<18x18x4xf32, #tpu.memory_space<vmem>>, vector<1x16x4xf32>
    tpu.vector_store %arg6[%c0_81, %c1_82, %c0_83], %57 {strides = array<i32>} : memref<18x18x4xf32, #tpu.memory_space<vmem>>, vector<1x16x4xf32>,
    %59 = vector.extract_strided_slice %55 {offsets = [14, 0, 0], sizes = [1, 16, 4], strides = [1, 1, 1]} : vector<16x16x4xf32> to vector<1x16x4xf32>
    %c17_84 = arith.constant 17 : index
    %c1_85 = arith.constant 1 : index
    %c0_86 = arith.constant 0 : index
    %60 = vector.load %arg6[%c17_84, %c1_85, %c0_86] : memref<18x18x4xf32, #tpu.memory_space<vmem>>, vector<1x16x4xf32>
    tpu.vector_store %arg6[%c17_84, %c1_85, %c0_86], %59 {strides = array<i32>} : memref<18x18x4xf32, #tpu.memory_space<vmem>>, vector<1x16x4xf32>,
    %c0_87 = arith.constant 0 : index
    %c2_88 = arith.constant 2 : index
    %c0_89 = arith.constant 0 : index
    %61 = vector.load %arg6[%c0_87, %c2_88, %c0_89] : memref<18x18x4xf32, #tpu.memory_space<vmem>>, vector<18x1x4xf32>
    %c0_90 = arith.constant 0 : index
    %c0_91 = arith.constant 0 : index
    %c0_92 = arith.constant 0 : index
    %62 = vector.load %arg6[%c0_90, %c0_91, %c0_92] : memref<18x18x4xf32, #tpu.memory_space<vmem>>, vector<18x1x4xf32>
    tpu.vector_store %arg6[%c0_90, %c0_91, %c0_92], %61 {strides = array<i32>} : memref<18x18x4xf32, #tpu.memory_space<vmem>>, vector<18x1x4xf32>,
    %c0_93 = arith.constant 0 : index
    %c15_94 = arith.constant 15 : index
    %c0_95 = arith.constant 0 : index
    %63 = vector.load %arg6[%c0_93, %c15_94, %c0_95] : memref<18x18x4xf32, #tpu.memory_space<vmem>>, vector<18x1x4xf32>
    %c0_96 = arith.constant 0 : index
    %c17_97 = arith.constant 17 : index
    %c0_98 = arith.constant 0 : index
    %64 = vector.load %arg6[%c0_96, %c17_97, %c0_98] : memref<18x18x4xf32, #tpu.memory_space<vmem>>, vector<18x1x4xf32>
    tpu.vector_store %arg6[%c0_96, %c17_97, %c0_98], %63 {strides = array<i32>} : memref<18x18x4xf32, #tpu.memory_space<vmem>>, vector<18x1x4xf32>,
    %c0_99 = arith.constant 0 : index
    %c0_100 = arith.constant 0 : index
    %c0_101 = arith.constant 0 : index
    %65 = vector.load %arg6[%c0_99, %c0_100, %c0_101] : memref<18x18x4xf32, #tpu.memory_space<vmem>>, vector<16x16x4xf32>
    %c0_102 = arith.constant 0 : index
    %c0_103 = arith.constant 0 : index
    %c0_104 = arith.constant 0 : index
    %66 = vector.load %arg7[%c0_102, %c0_103, %c0_104] : memref<16x16x36xf32, #tpu.memory_space<vmem>>, vector<16x16x4xf32>
    tpu.vector_store %arg7[%c0_102, %c0_103, %c0_104], %65 {strides = array<i32>} : memref<16x16x36xf32, #tpu.memory_space<vmem>>, vector<16x16x4xf32>,
    %c0_105 = arith.constant 0 : index
    %c1_106 = arith.constant 1 : index
    %c0_107 = arith.constant 0 : index
    %67 = vector.load %arg6[%c0_105, %c1_106, %c0_107] : memref<18x18x4xf32, #tpu.memory_space<vmem>>, vector<16x16x4xf32>
    %c0_108 = arith.constant 0 : index
    %c0_109 = arith.constant 0 : index
    %c4_110 = arith.constant 4 : index
    %68 = vector.load %arg7[%c0_108, %c0_109, %c4_110] : memref<16x16x36xf32, #tpu.memory_space<vmem>>, vector<16x16x4xf32>
    tpu.vector_store %arg7[%c0_108, %c0_109, %c4_110], %67 {strides = array<i32>} : memref<16x16x36xf32, #tpu.memory_space<vmem>>, vector<16x16x4xf32>,
    %c0_111 = arith.constant 0 : index
    %c2_112 = arith.constant 2 : index
    %c0_113 = arith.constant 0 : index
    %69 = vector.load %arg6[%c0_111, %c2_112, %c0_113] : memref<18x18x4xf32, #tpu.memory_space<vmem>>, vector<16x16x4xf32>
    %c0_114 = arith.constant 0 : index
    %c0_115 = arith.constant 0 : index
    %c8_116 = arith.constant 8 : index
    %70 = vector.load %arg7[%c0_114, %c0_115, %c8_116] : memref<16x16x36xf32, #tpu.memory_space<vmem>>, vector<16x16x4xf32>
    tpu.vector_store %arg7[%c0_114, %c0_115, %c8_116], %69 {strides = array<i32>} : memref<16x16x36xf32, #tpu.memory_space<vmem>>, vector<16x16x4xf32>,
    %c1_117 = arith.constant 1 : index
    %c0_118 = arith.constant 0 : index
    %c0_119 = arith.constant 0 : index
    %71 = vector.load %arg6[%c1_117, %c0_118, %c0_119] : memref<18x18x4xf32, #tpu.memory_space<vmem>>, vector<16x16x4xf32>
    %c0_120 = arith.constant 0 : index
    %c0_121 = arith.constant 0 : index
    %c12_122 = arith.constant 12 : index
    %72 = vector.load %arg7[%c0_120, %c0_121, %c12_122] : memref<16x16x36xf32, #tpu.memory_space<vmem>>, vector<16x16x4xf32>
    tpu.vector_store %arg7[%c0_120, %c0_121, %c12_122], %71 {strides = array<i32>} : memref<16x16x36xf32, #tpu.memory_space<vmem>>, vector<16x16x4xf32>,
    %c1_123 = arith.constant 1 : index
    %c1_124 = arith.constant 1 : index
    %c0_125 = arith.constant 0 : index
    %73 = vector.load %arg6[%c1_123, %c1_124, %c0_125] : memref<18x18x4xf32, #tpu.memory_space<vmem>>, vector<16x16x4xf32>
    %c0_126 = arith.constant 0 : index
    %c0_127 = arith.constant 0 : index
    %c16_128 = arith.constant 16 : index
    %74 = vector.load %arg7[%c0_126, %c0_127, %c16_128] : memref<16x16x36xf32, #tpu.memory_space<vmem>>, vector<16x16x4xf32>
    tpu.vector_store %arg7[%c0_126, %c0_127, %c16_128], %73 {strides = array<i32>} : memref<16x16x36xf32, #tpu.memory_space<vmem>>, vector<16x16x4xf32>,
    %c1_129 = arith.constant 1 : index
    %c2_130 = arith.constant 2 : index
    %c0_131 = arith.constant 0 : index
    %75 = vector.load %arg6[%c1_129, %c2_130, %c0_131] : memref<18x18x4xf32, #tpu.memory_space<vmem>>, vector<16x16x4xf32>
    %c0_132 = arith.constant 0 : index
    %c0_133 = arith.constant 0 : index
    %c20_134 = arith.constant 20 : index
    %76 = vector.load %arg7[%c0_132, %c0_133, %c20_134] : memref<16x16x36xf32, #tpu.memory_space<vmem>>, vector<16x16x4xf32>
    tpu.vector_store %arg7[%c0_132, %c0_133, %c20_134], %75 {strides = array<i32>} : memref<16x16x36xf32, #tpu.memory_space<vmem>>, vector<16x16x4xf32>,
    %c2_135 = arith.constant 2 : index
    %c0_136 = arith.constant 0 : index
    %c0_137 = arith.constant 0 : index
    %77 = vector.load %arg6[%c2_135, %c0_136, %c0_137] : memref<18x18x4xf32, #tpu.memory_space<vmem>>, vector<16x16x4xf32>
    %c0_138 = arith.constant 0 : index
    %c0_139 = arith.constant 0 : index
    %c24_140 = arith.constant 24 : index
    %78 = vector.load %arg7[%c0_138, %c0_139, %c24_140] : memref<16x16x36xf32, #tpu.memory_space<vmem>>, vector<16x16x4xf32>
    tpu.vector_store %arg7[%c0_138, %c0_139, %c24_140], %77 {strides = array<i32>} : memref<16x16x36xf32, #tpu.memory_space<vmem>>, vector<16x16x4xf32>,
    %c2_141 = arith.constant 2 : index
    %c1_142 = arith.constant 1 : index
    %c0_143 = arith.constant 0 : index
    %79 = vector.load %arg6[%c2_141, %c1_142, %c0_143] : memref<18x18x4xf32, #tpu.memory_space<vmem>>, vector<16x16x4xf32>
    %c0_144 = arith.constant 0 : index
    %c0_145 = arith.constant 0 : index
    %c28_146 = arith.constant 28 : index
    %80 = vector.load %arg7[%c0_144, %c0_145, %c28_146] : memref<16x16x36xf32, #tpu.memory_space<vmem>>, vector<16x16x4xf32>
    tpu.vector_store %arg7[%c0_144, %c0_145, %c28_146], %79 {strides = array<i32>} : memref<16x16x36xf32, #tpu.memory_space<vmem>>, vector<16x16x4xf32>,
    %c2_147 = arith.constant 2 : index
    %c2_148 = arith.constant 2 : index
    %c0_149 = arith.constant 0 : index
    %81 = vector.load %arg6[%c2_147, %c2_148, %c0_149] : memref<18x18x4xf32, #tpu.memory_space<vmem>>, vector<16x16x4xf32>
    %c0_150 = arith.constant 0 : index
    %c0_151 = arith.constant 0 : index
    %c32_152 = arith.constant 32 : index
    %82 = vector.load %arg7[%c0_150, %c0_151, %c32_152] : memref<16x16x36xf32, #tpu.memory_space<vmem>>, vector<16x16x4xf32>
    tpu.vector_store %arg7[%c0_150, %c0_151, %c32_152], %81 {strides = array<i32>} : memref<16x16x36xf32, #tpu.memory_space<vmem>>, vector<16x16x4xf32>,
    %c0_153 = arith.constant 0 : index
    %c0_154 = arith.constant 0 : index
    %c0_155 = arith.constant 0 : index
    %83 = vector.load %arg7[%c0_153, %c0_154, %c0_155] : memref<16x16x36xf32, #tpu.memory_space<vmem>>, vector<16x16x36xf32>
    %84 = vector.shape_cast %83 : vector<16x16x36xf32> to vector<256x36xf32>
    %c0_156 = arith.constant 0 : index
    %c0_157 = arith.constant 0 : index
    %85 = vector.load %arg3[%c0_156, %c0_157] : memref<36x4xf32, #tpu.memory_space<vmem>>, vector<36x4xf32>
    %cst_158 = arith.constant dense<0.000000e+00> : vector<256x4xf32>
    %86 = tpu.matmul %84, %85, %cst_158 {dimension_numbers = #tpu.dot_dimension_numbers<[1], [0], [0], [1], [0, 0, 1, 1], [], []>} : vector<256x36xf32>, vector<36x4xf32>, vector<256x4xf32> -> vector<256x4xf32>
    %cst_159 = arith.constant dense<0.000000e+00> : vector<4xf32>
    %87 = vector.multi_reduction <add>, %86, %cst_159 [0] : vector<256x4xf32> to vector<4xf32>
    %88 = vector.shape_cast %87 : vector<4xf32> to vector<1x4xf32>
    %89 = arith.mulf %86, %86 : vector<256x4xf32>
    %cst_160 = arith.constant dense<0.000000e+00> : vector<4xf32>
    %90 = vector.multi_reduction <add>, %89, %cst_160 [0] : vector<256x4xf32> to vector<4xf32>
    %91 = vector.shape_cast %90 : vector<4xf32> to vector<1x4xf32>
    %cst_161 = arith.constant 3.906250e-03 : f32
    %92 = vector.broadcast %cst_161 : f32 to vector<1x4xf32>
    %93 = arith.mulf %88, %92 : vector<1x4xf32>
    %cst_162 = arith.constant 3.906250e-03 : f32
    %94 = vector.broadcast %cst_162 : f32 to vector<1x4xf32>
    %95 = arith.mulf %91, %94 : vector<1x4xf32>
    %96 = arith.mulf %93, %93 : vector<1x4xf32>
    %97 = arith.subf %95, %96 : vector<1x4xf32>
    %cst_163 = arith.constant 0.000000e+00 : f32
    %98 = vector.broadcast %cst_163 : f32 to vector<1x4xf32>
    %99 = arith.maximumf %97, %98 : vector<1x4xf32>
    %100 = vector.broadcast %93 : vector<1x4xf32> to vector<256x4xf32>
    %101 = arith.subf %86, %100 : vector<256x4xf32>
    %cst_164 = arith.constant 9.99999974E-6 : f32
    %102 = vector.broadcast %cst_164 : f32 to vector<1x4xf32>
    %103 = arith.addf %99, %102 : vector<1x4xf32>
    %104 = math.rsqrt %103 : vector<1x4xf32>
    %105 = vector.broadcast %104 : vector<1x4xf32> to vector<256x4xf32>
    %106 = arith.mulf %101, %105 : vector<256x4xf32>
    %107 = vector.shape_cast %106 : vector<256x4xf32> to vector<16x16x4xf32>
    %108 = arith.addf %1, %107 : vector<16x16x4xf32>
    %c0_165 = arith.constant 0 : index
    %c0_166 = arith.constant 0 : index
    %c0_167 = arith.constant 0 : index
    %c0_168 = arith.constant 0 : index
    %109 = vector.load %arg4[%c0_165, %c0_166, %c0_167, %c0_168] : memref<1x16x16x4xf32, #tpu.memory_space<vmem>>, vector<1x16x16x4xf32>
    %110 = vector.shape_cast %109 : vector<1x16x16x4xf32> to vector<16x16x4xf32>
    %111 = vector.shape_cast %108 : vector<16x16x4xf32> to vector<1x16x16x4xf32>
    tpu.vector_store %arg4[%c0_165, %c0_166, %c0_167, %c0_168], %111 {strides = array<i32>} : memref<1x16x16x4xf32, #tpu.memory_space<vmem>>, vector<1x16x16x4xf32>,
    return
  }
  func.func @transform_0(%arg0: i32) -> (i32, i32, i32, i32) {
    %c0_i32 = arith.constant 0 : i32
    %c0_i32_0 = arith.constant 0 : i32
    %c0_i32_1 = arith.constant 0 : i32
    %c0_i32_2 = arith.constant 0 : i32
    return %arg0, %c0_i32, %c0_i32_0, %c0_i32_1 : i32, i32, i32, i32
  }
  func.func @transform_1(%arg0: i32) -> (i32, i32) {
    %c0_i32 = arith.constant 0 : i32
    %c0_i32_0 = arith.constant 0 : i32
    %c0_i32_1 = arith.constant 0 : i32
    return %c0_i32, %c0_i32_0 : i32, i32
  }
  func.func @transform_2(%arg0: i32) -> (i32, i32) {
    %c0_i32 = arith.constant 0 : i32
    %c0_i32_0 = arith.constant 0 : i32
    %c0_i32_1 = arith.constant 0 : i32
    return %c0_i32, %c0_i32_0 : i32, i32
  }
  func.func @transform_3(%arg0: i32) -> (i32, i32, i32, i32) {
    %c0_i32 = arith.constant 0 : i32
    %c0_i32_0 = arith.constant 0 : i32
    %c0_i32_1 = arith.constant 0 : i32
    %c0_i32_2 = arith.constant 0 : i32
    return %arg0, %c0_i32, %c0_i32_0, %c0_i32_1 : i32, i32, i32, i32
  }
}

</mosaic_0001>

<bundles_post_ra>
// kernel: tpu_custom_call.1
= control target key start
LH: loop header
LB: loop body
LE: loop exit
PB: predicated region body
PF: predicated region fallthrough
CT: control target
= control target key end

     0   :  { %s5317_s12 = smov 0   ;;  %s8081_s0 = inlined_call_operand.vmem [shape: f32[2,16,16,4], index: 0, kind: input, shape index: {}]   ;;  %s8082_s1 = inlined_call_operand.vmem [shape: f32[36,4], index: 1, kind: input, shape index: {}]   ;;  %s8083_s2 = inlined_call_operand.vmem [shape: f32[36,4], index: 2, kind: input, shape index: {}]   ;;  %s8084_s3 = inlined_call_operand.vmem [shape: f32[2,16,16,4], index: 3, kind: output, shape index: {}]  }
   0x1 LB: > { %s4992_s13 = sadd.s32 4294967295, %s5287_s12   ;;  %p4996_p0 = scmp.ge.s32.totalorder %s5287_s12, 1  ;;  %s5287_s12 = sphi %s5317_s12, %s13_s12  }
   0x2   : > { %p137_p1 = scmp.lt.s32.totalorder %s5287_s12, 3 }
   0x4   : > { %p138_p2 = pnand %p4996_p0, %p137_p1 }
   0x6   : > { %141 = sbr.rel (%p138_p2) target bundleno = 1814 (0x716), region = 32 }
   0xb   : > { %p161_p3 = scmp.lt.s32.totalorder %s4992_s13, 1  ;;  %vm204_vm0 = vcmask 31744   ;;  %s5289_s18 = smov 4   ;;  %vm260_vm1 = vcmask 24576   ;;  %vm539_vm2 = vcmask 64544   ;;  %vm732_vm3 = vcmask 97344  }
   0xc   : > { %s5290_s19 = smov 8   ;;  %s5291_s20 = smov 12   ;;  %vm925_vm4 = vcmask 130144   ;;  %vm2058_vm5 = vcmask 1043456   ;;  %vm1118_vm6 = vcmask 162944   ;;  %vm1311_vm7 = vcmask 195744  }
   0xd   : > { %s8220_s13 = smov (!%p161_p3, %s4992_s13), 1  ;;  %s5292_s21 = smov 16   ;;  %vm1505_vm8 = vcmask 228544   ;;  %vm1698_vm9 = vcmask 261344   ;;  %vm1891_vm10 = vcmask 294144   ;;  %vm1961_vm11 = vcmask 293888  }
   0xe   : > { %s5069_s14 = sshll.u32 %s8220_s13, 8  ;;  %s5293_s22 = smov 20  }
   0xf   : > { %s5333_s17 = scalar_lea.vmem %s8081_s0, %s5069_s14  ;;  %s5294_s4 = smov 24  }
  0x10   : > { %v5336_v0 = vld [vmem:[%s5333_s17 + $0x10] sm:$0xff]  ;;  %v5339_v1 = vld [vmem:[%s5333_s17] sm:$0xff]  ;;  %v5342_v2 = vld [vmem:[%s5333_s17 + $0x18] sm:$0xff]  ;;  %s5295_s7 = smov 28   ;;  %s5296_s8 = smov 32  }
  0x11   : > { %8131 = vst [vmem:[#allocation5_spill] sm:$0xff] %v5336_v0  ;;  %8132 = vst [vmem:[#allocation6_spill] sm:$0xff] %v5339_v1  ;;  %v5355_v3 = vld [vmem:[%s5333_s17 + $0x8] sm:$0xff]  ;;  %v5358_v4 = vld [vmem:[%s5333_s17 + $0x20] sm:$0xff] }
  0x12   : > { %8133 = vst [vmem:[#allocation7_spill] sm:$0xff] %v5342_v2  ;;  %237 = vst.msk [vmem:[#allocation2 + $0x1] sm:$0xff] %vm204_vm0, %v5336_v0  ;;  %v5361_v5 = vld [vmem:[%s5333_s17 + $0x28] sm:$0xff]  ;;  %v5370_v6 = vld [vmem:[%s5333_s17 + $0x30] sm:$0xff] }
  0x13   : > { %207 = vst.msk [vmem:[#allocation2 + $0x31] sm:$0xff] %vm204_vm0, %v5336_v0  ;;  %205 = vst.msk [vmem:[#allocation2 + $0x19] sm:$0xff] %vm204_vm0, %v5339_v1  ;;  %v5373_v7 = vld [vmem:[%s5333_s17 + $0x38] sm:$0xff]  ;;  %v5376_v8 = vld [vmem:[%s5333_s17 + $0x40] sm:$0xff] }
  0x14   : > { %238 = vst.msk [vmem:[#allocation2 + $0x9] sm:$0xff] %vm204_vm0, %v5342_v2  ;;  %208 = vst.msk [vmem:[#allocation2 + $0x39] sm:$0xff] %vm204_vm0, %v5342_v2  ;;  %v5385_v9 = vld [vmem:[%s5333_s17 + $0x48] sm:$0xff]  ;;  %v5388_v10 = vld [vmem:[%s5333_s17 + $0x50] sm:$0xff] }
  0x15   : > { %8134 = vst [vmem:[#allocation8_spill] sm:$0xff] %v5355_v3  ;;  %8135 = vst [vmem:[#allocation9_spill] sm:$0xff] %v5358_v4  ;;  %v5391_v11 = vld [vmem:[%s5333_s17 + $0x58] sm:$0xff]  ;;  %v5400_v12 = vld [vmem:[%s5333_s17 + $0x60] sm:$0xff] }
  0x16   : > { %8136 = vst [vmem:[#allocation10_spill] sm:$0xff] %v5361_v5  ;;  %206 = vst.msk [vmem:[#allocation2 + $0x21] sm:$0xff] %vm204_vm0, %v5355_v3  ;;  %v5403_v13 = vld [vmem:[%s5333_s17 + $0x68] sm:$0xff]  ;;  %v5406_v14 = vld [vmem:[%s5333_s17 + $0x70] sm:$0xff] }
  0x17   : > { %209 = vst.msk [vmem:[#allocation2 + $0x49] sm:$0xff] %vm204_vm0, %v5358_v4  ;;  %210 = vst.msk [vmem:[#allocation2 + $0x51] sm:$0xff] %vm204_vm0, %v5361_v5  ;;  %v5415_v15 = vld [vmem:[%s5333_s17 + $0x78] sm:$0xff]  ;;  %v5418_v16 = vld [vmem:[%s5333_s17 + $0x80] sm:$0xff] }
  0x18   : > { %8137 = vst [vmem:[#allocation11_spill] sm:$0xff] %v5370_v6  ;;  %8138 = vst [vmem:[#allocation12_spill] sm:$0xff] %v5373_v7  ;;  %v5421_v17 = vld [vmem:[%s5333_s17 + $0x88] sm:$0xff]  ;;  %v5430_v18 = vld [vmem:[%s5333_s17 + $0x90] sm:$0xff] }
  0x19   : > { %8139 = vst [vmem:[#allocation13_spill] sm:$0xff] %v5376_v8  ;;  %211 = vst.msk [vmem:[#allocation2 + $0x61] sm:$0xff] %vm204_vm0, %v5370_v6  ;;  %v5433_v19 = vld [vmem:[%s5333_s17 + $0x98] sm:$0xff]  ;;  %v5436_v20 = vld [vmem:[%s5333_s17 + $0xa0] sm:$0xff] }
  0x1a   : > { %212 = vst.msk [vmem:[#allocation2 + $0x69] sm:$0xff] %vm204_vm0, %v5373_v7  ;;  %213 = vst.msk [vmem:[#allocation2 + $0x79] sm:$0xff] %vm204_vm0, %v5376_v8  ;;  %v5445_v21 = vld [vmem:[%s5333_s17 + $0xa8] sm:$0xff]  ;;  %v5448_v22 = vld [vmem:[%s5333_s17 + $0xb0] sm:$0xff] }
  0x1b   : > { %8140 = vst [vmem:[#allocation14_spill] sm:$0xff] %v5385_v9  ;;  %8141 = vst [vmem:[#allocation15_spill] sm:$0xff] %v5388_v10  ;;  %v5451_v23 = vld [vmem:[%s5333_s17 + $0xb8] sm:$0xff]  ;;  %v379_v24 = vld [vmem:[#allocation2 + $0x1] sm:$0xff] }
  0x1c   : > { %8142 = vst [vmem:[#allocation16_spill] sm:$0xff] %v5391_v11  ;;  %214 = vst.msk [vmem:[#allocation2 + $0x81] sm:$0xff] %vm204_vm0, %v5385_v9  ;;  %v5453_v25 = vld [vmem:[#allocation2 + $0x19] sm:$0xff]  ;;  %443 = vrot.lane.b32.xlu0 %v379_v24, %s5289_s18  ;;  %v380_v26 = vld [vmem:[#allocation2 + $0x9] sm:$0xff] }
  0x1d   : > { %215 = vst.msk [vmem:[#allocation2 + $0x91] sm:$0xff] %vm204_vm0, %v5388_v10  ;;  %216 = vst.msk [vmem:[#allocation2 + $0x99] sm:$0xff] %vm204_vm0, %v5391_v11  ;;  %447 = vrot.lane.b32.xlu1 %v5453_v25, %s5289_s18  ;;  %v5464_v27 = vld [vmem:[#allocation2 + $0x21] sm:$0xff]  ;;  %v5469_v28 = vld [vmem:[#allocation2 + $0x31] sm:$0xff] }
  0x1e   : > { %8143 = vst [vmem:[#allocation17_spill] sm:$0xff] %v5400_v12  ;;  %8144 = vst [vmem:[#allocation18_spill] sm:$0xff] %v5403_v13  ;;  %v5471_v29 = vld [vmem:[#allocation2 + $0x39] sm:$0xff]  ;;  %v5473_v30 = vld [vmem:[#allocation2 + $0x49] sm:$0xff] }
  0x1f   : > { %8145 = vst [vmem:[#allocation19_spill] sm:$0xff] %v5406_v14  ;;  %217 = vst.msk [vmem:[#allocation2 + $0xa9] sm:$0xff] %vm204_vm0, %v5400_v12  ;;  %v5476_v31 = vld [vmem:[%s5333_s17 + $0xc0] sm:$0xff]  ;;  %v5482_v32 = vld [vmem:[#allocation2 + $0x51] sm:$0xff] }
  0x20   : > { %218 = vst.msk [vmem:[#allocation2 + $0xb1] sm:$0xff] %vm204_vm0, %v5403_v13  ;;  %219 = vst.msk [vmem:[#allocation2 + $0xc1] sm:$0xff] %vm204_vm0, %v5406_v14  ;;  %445 = vrot.lane.b32.xlu0 %v380_v26, %s5289_s18  ;;  %v5487_v33 = vld [vmem:[%s5333_s17 + $0xc8] sm:$0xff]  ;;  %v5490_v34 = vld [vmem:[%s5333_s17 + $0xd0] sm:$0xff] }
  0x21   : > { %8146 = vst [vmem:[#allocation20_spill] sm:$0xff] %v5415_v15  ;;  %8147 = vst [vmem:[#allocation21_spill] sm:$0xff] %v5418_v16  ;;  %449 = vrot.lane.b32.xlu1 %v5464_v27, %s5289_s18  ;;  %v5497_v35 = vld [vmem:[%s5333_s17 + $0xd8] sm:$0xff]  ;;  %v5500_v36 = vld [vmem:[%s5333_s17 + $0xe0] sm:$0xff] }
  0x22   : > { %8148 = vst [vmem:[#allocation22_spill] sm:$0xff] %v5421_v17  ;;  %220 = vst.msk [vmem:[#allocation2 + $0xc9] sm:$0xff] %vm204_vm0, %v5415_v15  ;;  %v5503_v37 = vld [vmem:[%s5333_s17 + $0xe8] sm:$0xff]  ;;  %v280_v39 = vld [vmem:[#allocation2 + $0x27] sm:$0x1] }
  0x23   : > { %221 = vst.msk [vmem:[#allocation2 + $0xd9] sm:$0xff] %vm204_vm0, %v5418_v16  ;;  %222 = vst.msk [vmem:[#allocation2 + $0xe1] sm:$0xff] %vm204_vm0, %v5421_v17  ;;  %v279_v38 = vld [vmem:[#allocation2 + $0xf] sm:$0x1]  ;;  %v281_v40 = vld [vmem:[#allocation2 + $0x3f] sm:$0x1] }
  0x24   : > { %8149 = vst [vmem:[#allocation23_spill] sm:$0xff] %v5430_v18  ;;  %8150 = vst [vmem:[#allocation24_spill] sm:$0xff] %v5433_v19  ;;  %451 = vrot.lane.b32.xlu0 %v5469_v28, %s5289_s18  ;;  %v282_v41 = vld [vmem:[#allocation2 + $0x57] sm:$0x1]  ;;  %v283_v42 = vld [vmem:[#allocation2 + $0x6f] sm:$0x1] }
  0x25   : > { %8151 = vst [vmem:[#allocation25_spill] sm:$0xff] %v5436_v20  ;;  %223 = vst.msk [vmem:[#allocation2 + $0xf1] sm:$0xff] %vm204_vm0, %v5430_v18  ;;  %453 = vrot.lane.b32.xlu1 %v5471_v29, %s5289_s18  ;;  %v5522_v43 = vld [vmem:[#allocation2 + $0x61] sm:$0xff]  ;;  %v5524_v44 = vld [vmem:[#allocation2 + $0x69] sm:$0xff] }
  0x26   : > { %224 = vst.msk [vmem:[#allocation2 + $0xf9] sm:$0xff] %vm204_vm0, %v5433_v19  ;;  %225 = vst.msk [vmem:[#allocation2 + $0x109] sm:$0xff] %vm204_vm0, %v5436_v20  ;;  %v284_v45 = vld [vmem:[#allocation2 + $0x87] sm:$0x1]  ;;  %v285_v46 = vld [vmem:[#allocation2 + $0x9f] sm:$0x1] }
  0x27   : > { %8152 = vst [vmem:[#allocation26_spill] sm:$0xff] %v5445_v21  ;;  %8153 = vst [vmem:[#allocation27_spill] sm:$0xff] %v5448_v22  ;;  %v286_v47 = vld [vmem:[#allocation2 + $0xb7] sm:$0x1]  ;;  %v5536_v49 = vld [vmem:[#allocation2 + $0x79] sm:$0xff] }
  0x28   : > { %8154 = vst [vmem:[#allocation28_spill] sm:$0xff] %v5451_v23  ;;  %226 = vst.msk [vmem:[#allocation2 + $0x111] sm:$0xff] %vm204_vm0, %v5445_v21  ;;  %455 = vrot.lane.b32.xlu0 %v5473_v30, %s5289_s18  ;;  %v5538_v50 = vld [vmem:[#allocation2 + $0x81] sm:$0xff]  ;;  %v5546_v53 = vld [vmem:[#allocation2 + $0x91] sm:$0xff] }
  0x29   : > { %227 = vst.msk [vmem:[#allocation2 + $0x121] sm:$0xff] %vm204_vm0, %v5448_v22  ;;  %228 = vst.msk [vmem:[#allocation2 + $0x129] sm:$0xff] %vm204_vm0, %v5451_v23  ;;  %457 = vrot.lane.b32.xlu1 %v5482_v32, %s5289_s18  ;;  %v287_v48 = vld [vmem:[#allocation2 + $0xcf] sm:$0x1]  ;;  %v5548_v54 = vld [vmem:[#allocation2 + $0x99] sm:$0xff] }
  0x2a   : > { %8155 = vst [vmem:[#allocation29_spill] sm:$0xff] %v5476_v31  ;;  %229 = vst.msk [vmem:[#allocation2 + $0x139] sm:$0xff] %vm204_vm0, %v5476_v31  ;;  %v288_v51 = vld [vmem:[#allocation2 + $0xe7] sm:$0x1]  ;;  %v242_v57 = vld [vmem:[#allocation2 + $0x2] sm:$0x1] }
  0x2b   : > { %8156 = vst [vmem:[#allocation30_spill] sm:$0xff] %v5487_v33  ;;  %8157 = vst [vmem:[#allocation31_spill] sm:$0xff] %v5490_v34  ;;  %v243_v58 = vld [vmem:[#allocation2 + $0x1a] sm:$0x1]  ;;  %v5556_v59 = vld [vmem:[#allocation2 + $0xa9] sm:$0xff] }
  0x2c   : > { %230 = vst.msk [vmem:[#allocation2 + $0x141] sm:$0xff] %vm204_vm0, %v5487_v33  ;;  %231 = vst.msk [vmem:[#allocation2 + $0x151] sm:$0xff] %vm204_vm0, %v5490_v34  ;;  %459 = vrot.lane.b32.xlu0 %v5522_v43, %s5289_s18  ;;  %v316_v61 = vld [vmem:[#allocation2 + $0x8] sm:$0xff]  ;;  %v5560_v62 = vld [vmem:[#allocation2 + $0xb1] sm:$0xff] }
  0x2d   : > { %8158 = vst [vmem:[#allocation32_spill] sm:$0xff] %v5497_v35  ;;  %8159 = vst [vmem:[#allocation33_spill] sm:$0xff] %v5500_v36  ;;  %461 = vrot.lane.b32.xlu1 %v5524_v44, %s5289_s18  ;;  %v289_v52 = vld [vmem:[#allocation2 + $0xff] sm:$0x1]  ;;  %v5564_v63 = vld [vmem:[#allocation2 + $0x20] sm:$0xff] }
  0x2e   : > { %8160 = vst [vmem:[#allocation34_spill] sm:$0xff] %v5503_v37  ;;  %232 = vst.msk [vmem:[#allocation2 + $0x159] sm:$0xff] %vm204_vm0, %v5497_v35  ;;  %v244_v26 = vld [vmem:[#allocation2 + $0x32] sm:$0x1]  ;;  %v5760_v6 = vld [vmem:[%s5333_s17 + $0xf8] sm:$0xff] }
  0x2f   : > { %233 = vst.msk [vmem:[#allocation2 + $0x169] sm:$0xff] %vm204_vm0, %v5500_v36  ;;  %240 = vst.msk [vmem:[#allocation2 + $0x199] sm:$0xff] %vm204_vm0, %v5500_v36  ;;  %v290_v55 = vld [vmem:[#allocation2 + $0x117] sm:$0x1] }
  0x30   : > { %234 = vst.msk [vmem:[#allocation2 + $0x171] sm:$0xff] %vm204_vm0, %v5503_v37  ;;  %241 = vst.msk [vmem:[#allocation2 + $0x1a1] sm:$0xff] %vm204_vm0, %v5503_v37  ;;  %463 = vrot.lane.b32.xlu0 %v5536_v49, %s5289_s18  ;;  %v291_v56 = vld [vmem:[#allocation2 + $0x12f] sm:$0x1]  ;;  %v5659_v34 = vld [vmem:[#allocation2 + $0x110] sm:$0xff] }
  0x31   : > { %297 = vst.msk [vmem:[#allocation2 + $0x11] sm:$0x1] %vm260_vm1, %v279_v38  ;;  %298 = vst.msk [vmem:[#allocation2 + $0x29] sm:$0x1] %vm260_vm1, %v280_v39  ;;  %465 = vrot.lane.b32.xlu1 %v5538_v50, %s5289_s18  ;;  %v5569_v38 = vld [vmem:[#allocation2 + $0x38] sm:$0xff]  ;;  %v5571_v39 = vld [vmem:[#allocation2 + $0xc1] sm:$0xff] }
  0x32   : > { %299 = vst.msk [vmem:[#allocation2 + $0x41] sm:$0x1] %vm260_vm1, %v281_v40  ;;  %300 = vst.msk [vmem:[#allocation2 + $0x59] sm:$0x1] %vm260_vm1, %v282_v41  ;;  %v245_v41 = vld [vmem:[#allocation2 + $0x4a] sm:$0x1] }
  0x33   : > { %301 = vst.msk [vmem:[#allocation2 + $0x71] sm:$0x1] %vm260_vm1, %v283_v42  ;;  %302 = vst.msk [vmem:[#allocation2 + $0x89] sm:$0x1] %vm260_vm1, %v284_v45  ;;  %v292_v60 = vld [vmem:[#allocation2 + $0x147] sm:$0x1] }
  0x34   : > { %303 = vst.msk [vmem:[#allocation2 + $0xa1] sm:$0x1] %vm260_vm1, %v285_v46  ;;  %304 = vst.msk [vmem:[#allocation2 + $0xb9] sm:$0x1] %vm260_vm1, %v286_v47  ;;  %467 = vrot.lane.b32.xlu0 %v5546_v53, %s5289_s18  ;;  %v5581_v42 = vld [vmem:[#allocation2 + $0x50] sm:$0xff]  ;;  %v5589_v47 = vld [vmem:[#allocation2 + $0x68] sm:$0xff] }
  0x35   : > { %305 = vst.msk [vmem:[#allocation2 + $0xd1] sm:$0x1] %vm260_vm1, %v287_v48  ;;  %306 = vst.msk [vmem:[#allocation2 + $0xe9] sm:$0x1] %vm260_vm1, %v288_v51  ;;  %469 = vrot.lane.b32.xlu1 %v5548_v54, %s5289_s18  ;;  %v293_v24 = vld [vmem:[#allocation2 + $0x15f] sm:$0x1] }
  0x36   : > { %307 = vst.msk [vmem:[#allocation2 + $0x101] sm:$0x1] %vm260_vm1, %v289_v52  ;;  %308 = vst.msk [vmem:[#allocation2 + $0x119] sm:$0x1] %vm260_vm1, %v290_v55  ;;  %v246_v45 = vld [vmem:[#allocation2 + $0x62] sm:$0x1] }
  0x37   : > { %309 = vst.msk [vmem:[#allocation2 + $0x131] sm:$0x1] %vm260_vm1, %v291_v56  ;;  %261 = vst.msk [vmem:[#allocation2] sm:$0x1] %vm260_vm1, %v242_v57  ;;  %v294_v40 = vld [vmem:[#allocation2 + $0x177] sm:$0x1] }
  0x38   : > { %262 = vst.msk [vmem:[#allocation2 + $0x18] sm:$0x1] %vm260_vm1, %v243_v58  ;;  %310 = vst.msk [vmem:[#allocation2 + $0x149] sm:$0x1] %vm260_vm1, %v292_v60  ;;  %471 = vrot.lane.b32.xlu0 %v5556_v59, %s5289_s18  ;;  %v5583_v46 = vld [vmem:[#allocation2 + $0xc9] sm:$0xff]  ;;  %v5594_v51 = vld [vmem:[#allocation2 + $0x80] sm:$0xff] }
  0x39   : > { %348 = vst.msk [vmem:[#allocation4 + $0x8] sm:$0xff] %vm204_vm0, %v316_v61  ;;  %350 = vst.msk [vmem:[#allocation4 + $0x18] sm:$0xff] %vm204_vm0, %v5564_v63  ;;  %473 = vrot.lane.b32.xlu1 %v5560_v62, %s5289_s18  ;;  %v247_v48 = vld [vmem:[#allocation2 + $0x7a] sm:$0x1]  ;;  %v248_v52 = vld [vmem:[#allocation2 + $0x92] sm:$0x1] }
  0x3a   : > { %311 = vst.msk [vmem:[#allocation2 + $0x161] sm:$0x1] %vm260_vm1, %v293_v24  ;;  %263 = vst.msk [vmem:[#allocation2 + $0x30] sm:$0x1] %vm260_vm1, %v244_v26  ;;  %v5601_v57 = vld [vmem:[#allocation2 + $0x98] sm:$0xff]  ;;  %v5614_v61 = vld [vmem:[#allocation2 + $0xb0] sm:$0xff] }
  0x3b   : > { %352 = vst.msk [vmem:[#allocation4 + $0x28] sm:$0xff] %vm204_vm0, %v5569_v38  ;;  %354 = vst.msk [vmem:[#allocation4 + $0x38] sm:$0xff] %vm204_vm0, %v5581_v42  ;;  %v5607_v58 = vld [vmem:[#allocation2 + $0xd9] sm:$0xff]  ;;  %v249_v60 = vld [vmem:[#allocation2 + $0xaa] sm:$0x1] }
  0x3c   : > { %312 = vst.msk [vmem:[#allocation2 + $0x179] sm:$0x1] %vm260_vm1, %v294_v40  ;;  %264 = vst.msk [vmem:[#allocation2 + $0x48] sm:$0x1] %vm260_vm1, %v245_v41  ;;  %475 = vrot.lane.b32.xlu0 %v5571_v39, %s5289_s18  ;;  %v5616_v24 = vld [vmem:[#allocation2 + $0xe1] sm:$0xff]  ;;  %v5689_v20 = vld [vmem:[#allocation2 + $0x111] sm:$0xff] }
  0x3d   : > { %265 = vst.msk [vmem:[#allocation2 + $0x60] sm:$0x1] %vm260_vm1, %v246_v45  ;;  %266 = vst.msk [vmem:[#allocation2 + $0x78] sm:$0x1] %vm260_vm1, %v247_v48  ;;  %477 = vrot.lane.b32.xlu1 %v5583_v46, %s5289_s18  ;;  %v250_v26 = vld [vmem:[#allocation2 + $0xc2] sm:$0x1] }
  0x3e   : > { %356 = vst.msk [vmem:[#allocation4 + $0x48] sm:$0xff] %vm204_vm0, %v5589_v47  ;;  %v315_v55 = vld [vmem:[#allocation2] sm:$0xff]  ;;  %358 = vst.msk [vmem:[#allocation4 + $0x58] sm:$0xff] %vm204_vm0, %v5594_v51  ;;  %v5621_v40 = vld [vmem:[#allocation2 + $0xc8] sm:$0xff] }
  0x3f   : > { %v5596_v56 = vld [vmem:[#allocation2 + $0x18] sm:$0xff]  ;;  %267 = vst.msk [vmem:[#allocation2 + $0x90] sm:$0x1] %vm260_vm1, %v248_v52  ;;  %268 = vst.msk [vmem:[#allocation2 + $0xa8] sm:$0x1] %vm260_vm1, %v249_v60  ;;  %v5628_v48 = vld [vmem:[#allocation2 + $0xe0] sm:$0xff] }
  0x40   : > { %347 = vst.msk [vmem:[#allocation4] sm:$0xff] %vm204_vm0, %v315_v55  ;;  %349 = vst.msk [vmem:[#allocation4 + $0x10] sm:$0xff] %vm204_vm0, %v5596_v56  ;;  %v251_v45 = vld [vmem:[#allocation2 + $0xda] sm:$0x1]  ;;  %v5630_v52 = vld [vmem:[#allocation2 + $0xf1] sm:$0xff]  ;;  %479 = vrot.lane.b32.xlu0 %v5607_v58, %s5289_s18 }
  0x41   : > { %360 = vst.msk [vmem:[#allocation4 + $0x68] sm:$0xff] %vm204_vm0, %v5601_v57  ;;  %362 = vst.msk [vmem:[#allocation4 + $0x78] sm:$0xff] %vm204_vm0, %v5614_v61  ;;  %v5623_v41 = vld [vmem:[#allocation2 + $0x30] sm:$0xff]  ;;  %v5632_v55 = vld [vmem:[#allocation2 + $0xf9] sm:$0xff]  ;;  %481 = vrot.lane.b32.xlu1 %v5616_v24, %s5289_s18 }
  0x42   : > { %269 = vst.msk [vmem:[#allocation2 + $0xc0] sm:$0x1] %vm260_vm1, %v250_v26  ;;  %270 = vst.msk [vmem:[#allocation2 + $0xd8] sm:$0x1] %vm260_vm1, %v251_v45  ;;  %v252_v60 = vld [vmem:[#allocation2 + $0xf2] sm:$0x1] }
  0x43   : > { %364 = vst.msk [vmem:[#allocation4 + $0x88] sm:$0xff] %vm204_vm0, %v5621_v40  ;;  %351 = vst.msk [vmem:[#allocation4 + $0x20] sm:$0xff] %vm204_vm0, %v5623_v41  ;;  %v5639_v26 = vld [vmem:[#allocation2 + $0xf8] sm:$0xff]  ;;  %v5645_v37 = vld [vmem:[#allocation2 + $0x48] sm:$0xff] }
  0x44   : > { %366 = vst.msk [vmem:[#allocation4 + $0x98] sm:$0xff] %vm204_vm0, %v5628_v48  ;;  %v5647_v36 = vld [vmem:[#allocation2 + $0x60] sm:$0xff]  ;;  %368 = vst.msk [vmem:[#allocation4 + $0xa8] sm:$0xff] %vm204_vm0, %v5639_v26  ;;  %v253_v45 = vld [vmem:[#allocation2 + $0x10a] sm:$0x1]  ;;  %483 = vrot.lane.b32.xlu0 %v5630_v52, %s5289_s18 }
  0x45   : > { %271 = vst.msk [vmem:[#allocation2 + $0xf0] sm:$0x1] %vm260_vm1, %v252_v60  ;;  %v5656_v35 = vld [vmem:[#allocation2 + $0x78] sm:$0xff]  ;;  %272 = vst.msk [vmem:[#allocation2 + $0x108] sm:$0x1] %vm260_vm1, %v253_v45  ;;  %v5668_v31 = vld [vmem:[#allocation2 + $0x128] sm:$0xff]  ;;  %485 = vrot.lane.b32.xlu1 %v5632_v55, %s5289_s18 }
  0x46   : > { %353 = vst.msk [vmem:[#allocation4 + $0x30] sm:$0xff] %vm204_vm0, %v5645_v37  ;;  %355 = vst.msk [vmem:[#allocation4 + $0x40] sm:$0xff] %vm204_vm0, %v5647_v36  ;;  %v254_v33 = vld [vmem:[#allocation2 + $0x122] sm:$0x1]  ;;  %v5663_v60 = vld [vmem:[#allocation2 + $0x90] sm:$0xff] }
  0x47   : > { %357 = vst.msk [vmem:[#allocation4 + $0x50] sm:$0xff] %vm204_vm0, %v5656_v35  ;;  %370 = vst.msk [vmem:[#allocation4 + $0xb8] sm:$0xff] %vm204_vm0, %v5659_v34  ;;  %v255_v23 = vld [vmem:[#allocation2 + $0x13a] sm:$0x1]  ;;  %v5675_v45 = vld [vmem:[#allocation2 + $0x140] sm:$0xff] }
  0x48   : > { %273 = vst.msk [vmem:[#allocation2 + $0x120] sm:$0x1] %vm260_vm1, %v254_v33  ;;  %274 = vst.msk [vmem:[#allocation2 + $0x138] sm:$0x1] %vm260_vm1, %v255_v23  ;;  %v256_v22 = vld [vmem:[#allocation2 + $0x152] sm:$0x1] }
  0x49   : > { %359 = vst.msk [vmem:[#allocation4 + $0x60] sm:$0xff] %vm204_vm0, %v5663_v60  ;;  %372 = vst.msk [vmem:[#allocation4 + $0xc8] sm:$0xff] %vm204_vm0, %v5668_v31  ;;  %v257_v21 = vld [vmem:[#allocation2 + $0x16a] sm:$0x1]  ;;  %v5693_v19 = vld [vmem:[#allocation2 + $0xc0] sm:$0xff]  ;;  %489 = vrot.lane.b32.xlu1 %v5689_v20, %s5289_s18 }
  0x4a   : > { %v5681_v33 = vld [vmem:[#allocation2 + $0xa8] sm:$0xff]  ;;  %374 = vst.msk [vmem:[#allocation4 + $0xd8] sm:$0xff] %vm204_vm0, %v5675_v45  ;;  %363 = vst.msk [vmem:[#allocation4 + $0x80] sm:$0xff] %vm204_vm0, %v5693_v19  ;;  %v5697_v18 = vld [vmem:[#allocation2 + $0xd8] sm:$0xff] }
  0x4b   : > { %275 = vst.msk [vmem:[#allocation2 + $0x150] sm:$0x1] %vm260_vm1, %v256_v22  ;;  %276 = vst.msk [vmem:[#allocation2 + $0x168] sm:$0x1] %vm260_vm1, %v257_v21  ;;  %v5687_v23 = vld [vmem:[#allocation2 + $0x109] sm:$0xff]  ;;  %v5699_v17 = vld [vmem:[#allocation2 + $0x158] sm:$0xff] }
  0x4c   : > { %361 = vst.msk [vmem:[#allocation4 + $0x70] sm:$0xff] %vm204_vm0, %v5681_v33  ;;  %365 = vst.msk [vmem:[#allocation4 + $0x90] sm:$0xff] %vm204_vm0, %v5697_v18  ;;  %v5703_v21 = vld [vmem:[#allocation2 + $0xf0] sm:$0xff]  ;;  %487 = vrot.lane.b32.xlu0 %v5687_v23, %s5289_s18  ;;  %v5716_v16 = vld [vmem:[#allocation2 + $0x108] sm:$0xff] }
  0x4d   : > { %376 = vst.msk [vmem:[#allocation4 + $0xe8] sm:$0xff] %vm204_vm0, %v5699_v17  ;;  %v5708_v22 = vld [vmem:[%s5333_s17 + $0xf0] sm:$0xff]  ;;  %367 = vst.msk [vmem:[#allocation4 + $0xa0] sm:$0xff] %vm204_vm0, %v5703_v21  ;;  %v5720_v15 = vld [vmem:[#allocation2 + $0x121] sm:$0xff] }
  0x4e   : > { %8161 = vst [vmem:[#allocation35_spill] sm:$0xff] %v5708_v22  ;;  %235 = vst.msk [vmem:[#allocation2 + $0x181] sm:$0xff] %vm204_vm0, %v5708_v22  ;;  %v5722_v14 = vld [vmem:[#allocation2 + $0x129] sm:$0xff]  ;;  %v5750_v9 = vld [vmem:[#allocation2 + $0x139] sm:$0xff] }
  0x4f   : > { %369 = vst.msk [vmem:[#allocation4 + $0xb0] sm:$0xff] %vm204_vm0, %v5716_v16  ;;  %v5726_v13 = vld [vmem:[#allocation2 + $0x120] sm:$0xff]  ;;  %v5730_v12 = vld [vmem:[#allocation2 + $0x138] sm:$0xff]  ;;  %v5732_v11 = vld [vmem:[#allocation2 + $0x170] sm:$0xff]  ;;  %493 = vrot.lane.b32.xlu1 %v5722_v14, %s5289_s18 }
  0x50   : > { %371 = vst.msk [vmem:[#allocation4 + $0xc0] sm:$0xff] %vm204_vm0, %v5726_v13  ;;  %373 = vst.msk [vmem:[#allocation4 + $0xd0] sm:$0xff] %vm204_vm0, %v5730_v12  ;;  %491 = vrot.lane.b32.xlu0 %v5720_v15, %s5289_s18  ;;  %v5752_v8 = vld [vmem:[#allocation2 + $0x141] sm:$0xff]  ;;  %v5762_v5 = vld [vmem:[#allocation2 + $0x151] sm:$0xff] }
  0x51   : > { %378 = vst.msk [vmem:[#allocation4 + $0xf8] sm:$0xff] %vm204_vm0, %v5732_v11  ;;  %8162 = vst [vmem:[#allocation36_spill] sm:$0xff] %v5750_v9  ;;  %v5764_v4 = vld [vmem:[#allocation2 + $0x159] sm:$0xff]  ;;  %v5772_v2 = vld [vmem:[#allocation2 + $0x169] sm:$0xff] }
  0x52   : > { %v5736_v22 = vld [vmem:[#allocation2 + $0x150] sm:$0xff]  ;;  %v5738_v10 = vld [vmem:[#allocation2 + $0x168] sm:$0xff]  ;;  %8163 = vst [vmem:[#allocation37_spill] sm:$0xff] %v5752_v8  ;;  %8164 = vst [vmem:[#allocation38_spill] sm:$0xff] %v5760_v6 }
  0x53   : > { %375 = vst.msk [vmem:[#allocation4 + $0xe0] sm:$0xff] %vm204_vm0, %v5736_v22  ;;  %377 = vst.msk [vmem:[#allocation4 + $0xf0] sm:$0xff] %vm204_vm0, %v5738_v10  ;;  %497 = vrot.lane.b32.xlu1 %v5752_v8, %s5289_s18  ;;  %v5774_v0 = vld [vmem:[#allocation2 + $0x171] sm:$0xff]  ;;  %v5784_v1 = vld [vmem:[#allocation2 + $0x22] sm:$0xff] }
  0x54   : > { %495 = vrot.lane.b32.xlu0 %v5750_v9, %s5289_s18  ;;  %8165 = vst [vmem:[#allocation39_spill] sm:$0xff] %v5762_v5  ;;  %8166 = vst [vmem:[#allocation40_spill] sm:$0xff] %v5764_v4  ;;  %v573_v3 = vld [vmem:[#allocation2 + $0xa] sm:$0xff] }
  0x55   : > { %v258_v7 = vld [vmem:[#allocation2 + $0x182] sm:$0x1]  ;;  %236 = vst.msk [vmem:[#allocation2 + $0x189] sm:$0xff] %vm204_vm0, %v5760_v6  ;;  %8167 = vst [vmem:[#allocation41_spill] sm:$0xff] %v5772_v2  ;;  %v5782_v6 = vld [vmem:[#allocation2 + $0x1a] sm:$0xff] }
  0x56   : > { %277 = vst.msk [vmem:[#allocation2 + $0x180] sm:$0x1] %vm260_vm1, %v258_v7  ;;  %8168 = vst [vmem:[#allocation42_spill] sm:$0xff] %v5774_v0  ;;  %v572_v7 = vld [vmem:[#allocation2 + $0x2] sm:$0xff] }
  0x57   : > { %501 = vrot.lane.b32.xlu1 %v5764_v4, %s5289_s18  ;;  %8169 = vst [vmem:[#allocation43_spill] sm:$0xff] %v5782_v6  ;;  %8170 = vst [vmem:[#allocation44_spill] sm:$0xff] %v5784_v1  ;;  %v583_v4 = vld [vmem:[#allocation2 + $0x82] sm:$0xff] }
  0x58   : > { %499 = vrot.lane.b32.xlu0 %v5762_v5, %s5289_s18  ;;  %v585_v5 = vld [vmem:[#allocation2 + $0x9a] sm:$0xff] }
  0x5b   : > { %505 = vrot.lane.b32.xlu1 %v5774_v0, %s5289_s18  ;;  %v5792_v0 = vld [vmem:[#allocation2 + $0x3a] sm:$0xff] }
  0x5c   : > { %503 = vrot.lane.b32.xlu0 %v5772_v2, %s5289_s18  ;;  %v5790_v2 = vld [vmem:[#allocation2 + $0x32] sm:$0xff]  ;;  %8172 = vst [vmem:[#allocation46_spill] sm:$0xff] %v5792_v0 }
  0x5d   : > { %8171 = vst [vmem:[#allocation45_spill] sm:$0xff] %v5790_v2 }
  0x5f   : > { %638 = vrot.lane.b32.xlu1 %v573_v3, %s5290_s19  ;;  %v5798_v3 = vld [vmem:[#allocation2 + $0x4a] sm:$0xff] }
  0x60   : > { %636 = vrot.lane.b32.xlu0 %v572_v7, %s5290_s19  ;;  %8173 = vst [vmem:[#allocation47_spill] sm:$0xff] %v5798_v3  ;;  %v5800_v7 = vld [vmem:[#allocation2 + $0x52] sm:$0xff] }
  0x61   : > { %8174 = vst [vmem:[#allocation48_spill] sm:$0xff] %v5800_v7 }
  0x63   : > { %642 = vrot.lane.b32.xlu1 %v5784_v1, %s5290_s19  ;;  %v580_v1 = vld [vmem:[#allocation2 + $0x62] sm:$0xff] }
  0x64   : > { %640 = vrot.lane.b32.xlu0 %v5782_v6, %s5290_s19  ;;  %v581_v6 = vld [vmem:[#allocation2 + $0x6a] sm:$0xff] }
  0x67   : > { %646 = vrot.lane.b32.xlu1 %v5792_v0, %s5290_s19  ;;  %v584_v0 = vld [vmem:[#allocation2 + $0x92] sm:$0xff] }
  0x68   : > { %644 = vrot.lane.b32.xlu0 %v5790_v2, %s5290_s19  ;;  %v582_v2 = vld [vmem:[#allocation2 + $0x7a] sm:$0xff] }
  0x6b   : > { %650 = vrot.lane.b32.xlu1 %v5800_v7, %s5290_s19  ;;  %v587_v7 = vld [vmem:[#allocation2 + $0xb2] sm:$0xff] }
  0x6c   : > { %648 = vrot.lane.b32.xlu0 %v5798_v3, %s5290_s19  ;;  %v586_v3 = vld [vmem:[#allocation2 + $0xaa] sm:$0xff] }
  0x6f   : > { %654 = vrot.lane.b32.xlu1 %v581_v6, %s5290_s19  ;;  %v589_v6 = vld [vmem:[#allocation2 + $0xca] sm:$0xff] }
  0x70   : > { %652 = vrot.lane.b32.xlu0 %v580_v1, %s5290_s19  ;;  %v588_v1 = vld [vmem:[#allocation2 + $0xc2] sm:$0xff] }
  0x73   : > { %658 = vrot.lane.b32.xlu1 %v583_v4, %s5290_s19  ;;  %v591_v4 = vld [vmem:[#allocation2 + $0xe2] sm:$0xff] }
  0x74   : > { %656 = vrot.lane.b32.xlu0 %v582_v2, %s5290_s19  ;;  %v590_v2 = vld [vmem:[#allocation2 + $0xda] sm:$0xff] }
  0x77   : > { %662 = vrot.lane.b32.xlu1 %v585_v5, %s5290_s19  ;;  %v593_v5 = vld [vmem:[#allocation2 + $0xfa] sm:$0xff] }
  0x78   : > { %660 = vrot.lane.b32.xlu0 %v584_v0, %s5290_s19  ;;  %v592_v0 = vld [vmem:[#allocation2 + $0xf2] sm:$0xff] }
  0x7b   : > { %666 = vrot.lane.b32.xlu1 %v587_v7, %s5290_s19  ;;  %v595_v7 = vld [vmem:[#allocation2 + $0x112] sm:$0xff] }
  0x7c   : > { %664 = vrot.lane.b32.xlu0 %v586_v3, %s5290_s19  ;;  %v594_v3 = vld [vmem:[#allocation2 + $0x10a] sm:$0xff] }
  0x7f   : > { %670 = vrot.lane.b32.xlu1 %v589_v6, %s5290_s19  ;;  %v597_v6 = vld [vmem:[#allocation2 + $0x12a] sm:$0xff] }
  0x80   : > { %668 = vrot.lane.b32.xlu0 %v588_v1, %s5290_s19  ;;  %v596_v1 = vld [vmem:[#allocation2 + $0x122] sm:$0xff] }
  0x83   : > { %674 = vrot.lane.b32.xlu1 %v591_v4, %s5290_s19  ;;  %v599_v4 = vld [vmem:[#allocation2 + $0x142] sm:$0xff] }
  0x84   : > { %672 = vrot.lane.b32.xlu0 %v590_v2, %s5290_s19  ;;  %v598_v2 = vld [vmem:[#allocation2 + $0x13a] sm:$0xff] }
  0x87   : > { %678 = vrot.lane.b32.xlu1 %v593_v5, %s5290_s19  ;;  %v601_v5 = vld [vmem:[#allocation2 + $0x15a] sm:$0xff] }
  0x88   : > { %676 = vrot.lane.b32.xlu0 %v592_v0, %s5290_s19  ;;  %v600_v0 = vld [vmem:[#allocation2 + $0x152] sm:$0xff] }
  0x8b   : > { %682 = vrot.lane.b32.xlu1 %v595_v7, %s5290_s19 }
  0x8c   : > { %680 = vrot.lane.b32.xlu0 %v594_v3, %s5290_s19 }
  0x8e   : > { %v444_v8 = vpop.permute.xlu0 %443 }
  0x8f   : > { %686 = vrot.lane.b32.xlu1 %v597_v6, %s5290_s19  ;;  %v448_v9 = vpop.permute.xlu1 %447  ;;  %540 = vst.msk [vmem:[#allocation4] sm:$0xff] %vm539_vm2, %v444_v8  ;;  %v603_v8 = vld [vmem:[#allocation2 + $0x172] sm:$0xff] }
  0x90   : > { %684 = vrot.lane.b32.xlu0 %v596_v1, %s5290_s19  ;;  %542 = vst.msk [vmem:[#allocation4 + $0x10] sm:$0xff] %vm539_vm2, %v448_v9  ;;  %v602_v1 = vld [vmem:[#allocation2 + $0x16a] sm:$0xff] }
  0x92   : > { %v446_v3 = vpop.permute.xlu0 %445 }
  0x93   : > { %690 = vrot.lane.b32.xlu1 %v599_v4, %s5290_s19  ;;  %v450_v7 = vpop.permute.xlu1 %449  ;;  %541 = vst.msk [vmem:[#allocation4 + $0x8] sm:$0xff] %vm539_vm2, %v446_v3 }
  0x94   : > { %688 = vrot.lane.b32.xlu0 %v598_v2, %s5290_s19  ;;  %543 = vst.msk [vmem:[#allocation4 + $0x18] sm:$0xff] %vm539_vm2, %v450_v7 }
  0x96   : > { %v452_v6 = vpop.permute.xlu0 %451 }
  0x97   : > { %694 = vrot.lane.b32.xlu1 %v601_v5, %s5290_s19  ;;  %v454_v9 = vpop.permute.xlu1 %453  ;;  %544 = vst.msk [vmem:[#allocation4 + $0x20] sm:$0xff] %vm539_vm2, %v452_v6 }
  0x98   : > { %692 = vrot.lane.b32.xlu0 %v600_v0, %s5290_s19  ;;  %545 = vst.msk [vmem:[#allocation4 + $0x28] sm:$0xff] %vm539_vm2, %v454_v9 }
  0x9a   : > { %v456_v2 = vpop.permute.xlu0 %455 }
  0x9b   : > { %698 = vrot.lane.b32.xlu1 %v603_v8, %s5290_s19  ;;  %v458_v4 = vpop.permute.xlu1 %457  ;;  %546 = vst.msk [vmem:[#allocation4 + $0x30] sm:$0xff] %vm539_vm2, %v456_v2 }
  0x9c   : > { %696 = vrot.lane.b32.xlu0 %v602_v1, %s5290_s19  ;;  %547 = vst.msk [vmem:[#allocation4 + $0x38] sm:$0xff] %vm539_vm2, %v458_v4 }
  0x9e   : > { %v460_v0 = vpop.permute.xlu0 %459 }
  0x9f   : > { %831 = vrot.lane.b32.xlu1 %v5564_v63, %s5291_s20  ;;  %v462_v5 = vpop.permute.xlu1 %461  ;;  %548 = vst.msk [vmem:[#allocation4 + $0x40] sm:$0xff] %vm539_vm2, %v460_v0 }
  0xa0   : > { %829 = vrot.lane.b32.xlu0 %v5596_v56, %s5291_s20  ;;  %549 = vst.msk [vmem:[#allocation4 + $0x48] sm:$0xff] %vm539_vm2, %v462_v5 }
  0xa2   : > { %v464_v3 = vpop.permute.xlu0 %463 }
  0xa3   : > { %835 = vrot.lane.b32.xlu1 %v5569_v38, %s5291_s20  ;;  %v466_v7 = vpop.permute.xlu1 %465  ;;  %550 = vst.msk [vmem:[#allocation4 + $0x50] sm:$0xff] %vm539_vm2, %v464_v3 }
  0xa4   : > { %833 = vrot.lane.b32.xlu0 %v5623_v41, %s5291_s20  ;;  %551 = vst.msk [vmem:[#allocation4 + $0x58] sm:$0xff] %vm539_vm2, %v466_v7 }
  0xa6   : > { %v468_v63 = vpop.permute.xlu0 %467 }
  0xa7   : > { %839 = vrot.lane.b32.xlu1 %v5581_v42, %s5291_s20  ;;  %v470_v56 = vpop.permute.xlu1 %469  ;;  %552 = vst.msk [vmem:[#allocation4 + $0x60] sm:$0xff] %vm539_vm2, %v468_v63 }
  0xa8   : > { %837 = vrot.lane.b32.xlu0 %v5645_v37, %s5291_s20  ;;  %553 = vst.msk [vmem:[#allocation4 + $0x68] sm:$0xff] %vm539_vm2, %v470_v56 }
  0xaa   : > { %v472_v1 = vpop.permute.xlu0 %471 }
  0xab   : > { %843 = vrot.lane.b32.xlu1 %v5589_v47, %s5291_s20  ;;  %v474_v8 = vpop.permute.xlu1 %473  ;;  %554 = vst.msk [vmem:[#allocation4 + $0x70] sm:$0xff] %vm539_vm2, %v472_v1 }
  0xac   : > { %841 = vrot.lane.b32.xlu0 %v5647_v36, %s5291_s20  ;;  %555 = vst.msk [vmem:[#allocation4 + $0x78] sm:$0xff] %vm539_vm2, %v474_v8 }
  0xae   : > { %v476_v6 = vpop.permute.xlu0 %475 }
  0xaf   : > { %847 = vrot.lane.b32.xlu1 %v5594_v51, %s5291_s20  ;;  %v478_v9 = vpop.permute.xlu1 %477  ;;  %556 = vst.msk [vmem:[#allocation4 + $0x80] sm:$0xff] %vm539_vm2, %v476_v6 }
  0xb0   : > { %845 = vrot.lane.b32.xlu0 %v5656_v35, %s5291_s20  ;;  %557 = vst.msk [vmem:[#allocation4 + $0x88] sm:$0xff] %vm539_vm2, %v478_v9 }
  0xb2   : > { %v480_v2 = vpop.permute.xlu0 %479 }
  0xb3   : > { %851 = vrot.lane.b32.xlu1 %v5601_v57, %s5291_s20  ;;  %v482_v4 = vpop.permute.xlu1 %481  ;;  %558 = vst.msk [vmem:[#allocation4 + $0x90] sm:$0xff] %vm539_vm2, %v480_v2 }
  0xb4   : > { %849 = vrot.lane.b32.xlu0 %v5663_v60, %s5291_s20  ;;  %559 = vst.msk [vmem:[#allocation4 + $0x98] sm:$0xff] %vm539_vm2, %v482_v4 }
  0xb6   : > { %v484_v0 = vpop.permute.xlu0 %483 }
  0xb7   : > { %855 = vrot.lane.b32.xlu1 %v5614_v61, %s5291_s20  ;;  %v486_v5 = vpop.permute.xlu1 %485  ;;  %560 = vst.msk [vmem:[#allocation4 + $0xa0] sm:$0xff] %vm539_vm2, %v484_v0 }
  0xb8   : > { %853 = vrot.lane.b32.xlu0 %v5681_v33, %s5291_s20  ;;  %561 = vst.msk [vmem:[#allocation4 + $0xa8] sm:$0xff] %vm539_vm2, %v486_v5 }
  0xbb   : > { %859 = vrot.lane.b32.xlu1 %v5621_v40, %s5291_s20  ;;  %v490_v7 = vpop.permute.xlu1 %489 }
  0xbc   : > { %857 = vrot.lane.b32.xlu0 %v5693_v19, %s5291_s20  ;;  %563 = vst.msk [vmem:[#allocation4 + $0xb8] sm:$0xff] %vm539_vm2, %v490_v7 }
  0xbe   : > { %v488_v3 = vpop.permute.xlu0 %487 }
  0xbf   : > { %562 = vst.msk [vmem:[#allocation4 + $0xb0] sm:$0xff] %vm539_vm2, %v488_v3  ;;  %863 = vrot.lane.b32.xlu1 %v5628_v48, %s5291_s20 }
  0xc0   : > { %861 = vrot.lane.b32.xlu0 %v5697_v18, %s5291_s20 }
  0xc1   : > { %v494_v56 = vpop.permute.xlu1 %493 }
  0xc2   : > { %v492_v63 = vpop.permute.xlu0 %491  ;;  %565 = vst.msk [vmem:[#allocation4 + $0xc8] sm:$0xff] %vm539_vm2, %v494_v56 }
  0xc3   : > { %564 = vst.msk [vmem:[#allocation4 + $0xc0] sm:$0xff] %vm539_vm2, %v492_v63  ;;  %867 = vrot.lane.b32.xlu1 %v5639_v26, %s5291_s20 }
  0xc4   : > { %865 = vrot.lane.b32.xlu0 %v5703_v21, %s5291_s20 }
  0xc5   : > { %v498_v8 = vpop.permute.xlu1 %497 }
  0xc6   : > { %v496_v1 = vpop.permute.xlu0 %495  ;;  %567 = vst.msk [vmem:[#allocation4 + $0xd8] sm:$0xff] %vm539_vm2, %v498_v8  ;;  %v8180_v8 = vld [vmem:[#allocation42_spill] sm:$0xff] }
  0xc7   : > { %566 = vst.msk [vmem:[#allocation4 + $0xd0] sm:$0xff] %vm539_vm2, %v496_v1  ;;  %871 = vrot.lane.b32.xlu1 %v5659_v34, %s5291_s20  ;;  %v8179_v1 = vld [vmem:[#allocation41_spill] sm:$0xff] }
  0xc8   : > { %869 = vrot.lane.b32.xlu0 %v5716_v16, %s5291_s20 }
  0xc9   : > { %v502_v9 = vpop.permute.xlu1 %501 }
  0xca   : > { %v500_v6 = vpop.permute.xlu0 %499  ;;  %569 = vst.msk [vmem:[#allocation4 + $0xe8] sm:$0xff] %vm539_vm2, %v502_v9  ;;  %v989_v9 = vld [vmem:[#allocation2 + $0x189] sm:$0xff] }
  0xcb   : > { %568 = vst.msk [vmem:[#allocation4 + $0xe0] sm:$0xff] %vm539_vm2, %v500_v6  ;;  %875 = vrot.lane.b32.xlu1 %v5668_v31, %s5291_s20  ;;  %v988_v6 = vld [vmem:[#allocation2 + $0x181] sm:$0xff] }
  0xcc   : > { %873 = vrot.lane.b32.xlu0 %v5726_v13, %s5291_s20 }
  0xcd   : > { %v506_v21 = vpop.permute.xlu1 %505 }
  0xce   : > { %v504_v26 = vpop.permute.xlu0 %503  ;;  %571 = vst.msk [vmem:[#allocation4 + $0xf8] sm:$0xff] %vm539_vm2, %v506_v21 }
  0xcf   : > { %570 = vst.msk [vmem:[#allocation4 + $0xf0] sm:$0xff] %vm539_vm2, %v504_v26  ;;  %879 = vrot.lane.b32.xlu1 %v5675_v45, %s5291_s20  ;;  %v796_v45 = vld [vmem:[#allocation2 + $0x188] sm:$0xff] }
  0xd0   : > { %877 = vrot.lane.b32.xlu0 %v5730_v12, %s5291_s20  ;;  %v795_v12 = vld [vmem:[#allocation2 + $0x180] sm:$0xff] }
  0xd1   : > { %v639_v34 = vpop.permute.xlu1 %638 }
  0xd2   : > { %v637_v16 = vpop.permute.xlu0 %636  ;;  %734 = vst.msk [vmem:[#allocation4 + $0x8] sm:$0xff] %vm732_vm3, %v639_v34 }
  0xd3   : > { %733 = vst.msk [vmem:[#allocation4] sm:$0xff] %vm732_vm3, %v637_v16  ;;  %883 = vrot.lane.b32.xlu1 %v5699_v17, %s5291_s20 }
  0xd4   : > { %881 = vrot.lane.b32.xlu0 %v5736_v22, %s5291_s20 }
  0xd5   : > { %v643_v31 = vpop.permute.xlu1 %642 }
  0xd6   : > { %v641_v13 = vpop.permute.xlu0 %640  ;;  %736 = vst.msk [vmem:[#allocation4 + $0x18] sm:$0xff] %vm732_vm3, %v643_v31  ;;  %v8182_v31 = vld [vmem:[#allocation44_spill] sm:$0xff] }
  0xd7   : > { %735 = vst.msk [vmem:[#allocation4 + $0x10] sm:$0xff] %vm732_vm3, %v641_v13  ;;  %887 = vrot.lane.b32.xlu1 %v5732_v11, %s5291_s20  ;;  %v8181_v13 = vld [vmem:[#allocation43_spill] sm:$0xff] }
  0xd8   : > { %885 = vrot.lane.b32.xlu0 %v5738_v10, %s5291_s20 }
  0xd9   : > { %v647_v4 = vpop.permute.xlu1 %646 }
  0xda   : > { %v645_v2 = vpop.permute.xlu0 %644  ;;  %738 = vst.msk [vmem:[#allocation4 + $0x28] sm:$0xff] %vm732_vm3, %v647_v4  ;;  %v8184_v4 = vld [vmem:[#allocation46_spill] sm:$0xff] }
  0xdb   : > { %737 = vst.msk [vmem:[#allocation4 + $0x20] sm:$0xff] %vm732_vm3, %v645_v2  ;;  %891 = vrot.lane.b32.xlu1 %v796_v45, %s5291_s20  ;;  %v8183_v2 = vld [vmem:[#allocation45_spill] sm:$0xff] }
  0xdc   : > { %889 = vrot.lane.b32.xlu0 %v795_v12, %s5291_s20 }
  0xdd   : > { %v651_v22 = vpop.permute.xlu1 %650 }
  0xde   : > { %v649_v17 = vpop.permute.xlu0 %648  ;;  %740 = vst.msk [vmem:[#allocation4 + $0x38] sm:$0xff] %vm732_vm3, %v651_v22 }
  0xdf   : > { %739 = vst.msk [vmem:[#allocation4 + $0x30] sm:$0xff] %vm732_vm3, %v649_v17  ;;  %1024 = vrot.lane.b32.xlu1 %v5464_v27, %s5292_s21  ;;  %v1960_v17 = vld [vmem:[%s8082_s1 + $0x20] sm:$0xf] }
  0xe0   : > { %1022 = vrot.lane.b32.xlu0 %v5453_v25, %s5292_s21  ;;  %5145 = vmatprep.subr.msk.mxu0 %vm2058_vm5, %v1960_v17 }
  0xe1   : > { %v655_v11 = vpop.permute.xlu1 %654  ;;  %5146 = vmatpush3.msk.msra.mxu0 %vm2058_vm5, %v1960_v17 }
  0xe2   : > { %v653_v10 = vpop.permute.xlu0 %652  ;;  %742 = vst.msk [vmem:[#allocation4 + $0x48] sm:$0xff] %vm732_vm3, %v655_v11  ;;  %v1959_v11 = vld [vmem:[%s8082_s1 + $0x18] sm:$0xff] }
  0xe3   : > { %741 = vst.msk [vmem:[#allocation4 + $0x40] sm:$0xff] %vm732_vm3, %v653_v10  ;;  %1028 = vrot.lane.b32.xlu1 %v5471_v29, %s5292_s21  ;;  %5147 = vmatprep.subr.mxu0 %v1959_v11 }
  0xe4   : > { %1026 = vrot.lane.b32.xlu0 %v5469_v28, %s5292_s21  ;;  %5148 = vmatpush3.msra.mxu0 %v1959_v11 }
  0xe5   : > { %v659_v5 = vpop.permute.xlu1 %658 }
  0xe6   : > { %v657_v0 = vpop.permute.xlu0 %656  ;;  %744 = vst.msk [vmem:[#allocation4 + $0x58] sm:$0xff] %vm732_vm3, %v659_v5  ;;  %v8186_v5 = vld [vmem:[#allocation48_spill] sm:$0xff] }
  0xe7   : > { %743 = vst.msk [vmem:[#allocation4 + $0x50] sm:$0xff] %vm732_vm3, %v657_v0  ;;  %1032 = vrot.lane.b32.xlu1 %v5482_v32, %s5292_s21  ;;  %v8185_v0 = vld [vmem:[#allocation47_spill] sm:$0xff] }
  0xe8   : > { %1030 = vrot.lane.b32.xlu0 %v5473_v30, %s5292_s21 }
  0xe9   : > { %v663_v27 = vpop.permute.xlu1 %662 }
  0xea   : > { %v661_v25 = vpop.permute.xlu0 %660  ;;  %746 = vst.msk [vmem:[#allocation4 + $0x68] sm:$0xff] %vm732_vm3, %v663_v27 }
  0xeb   : > { %745 = vst.msk [vmem:[#allocation4 + $0x60] sm:$0xff] %vm732_vm3, %v661_v25  ;;  %1036 = vrot.lane.b32.xlu1 %v5524_v44, %s5292_s21  ;;  %v1958_v25 = vld [vmem:[%s8082_s1 + $0x10] sm:$0xff] }
  0xec   : > { %1034 = vrot.lane.b32.xlu0 %v5522_v43, %s5292_s21  ;;  %5149 = vmatprep.subr.mxu0 %v1958_v25 }
  0xed   : > { %v667_v29 = vpop.permute.xlu1 %666  ;;  %5150 = vmatpush3.msra.mxu0 %v1958_v25 }
  0xee   : > { %v665_v28 = vpop.permute.xlu0 %664  ;;  %748 = vst.msk [vmem:[#allocation4 + $0x78] sm:$0xff] %vm732_vm3, %v667_v29  ;;  %v1957_v29 = vld [vmem:[%s8082_s1 + $0x8] sm:$0xff] }
  0xef   : > { %747 = vst.msk [vmem:[#allocation4 + $0x70] sm:$0xff] %vm732_vm3, %v665_v28  ;;  %1040 = vrot.lane.b32.xlu1 %v5538_v50, %s5292_s21  ;;  %5151 = vmatprep.subr.mxu0 %v1957_v29 }
  0xf0   : > { %1038 = vrot.lane.b32.xlu0 %v5536_v49, %s5292_s21  ;;  %5152 = vmatpush3.msra.mxu0 %v1957_v29 }
  0xf1   : > { %v671_v32 = vpop.permute.xlu1 %670 }
  0xf2   : > { %v669_v30 = vpop.permute.xlu0 %668  ;;  %750 = vst.msk [vmem:[#allocation4 + $0x88] sm:$0xff] %vm732_vm3, %v671_v32  ;;  %v1539_v32 = vld [vmem:[#allocation2 + $0x39] sm:$0xff] }
  0xf3   : > { %749 = vst.msk [vmem:[#allocation4 + $0x80] sm:$0xff] %vm732_vm3, %v669_v30  ;;  %1044 = vrot.lane.b32.xlu1 %v5548_v54, %s5292_s21  ;;  %v1538_v30 = vld [vmem:[#allocation2 + $0x31] sm:$0xff] }
  0xf4   : > { %1042 = vrot.lane.b32.xlu0 %v5546_v53, %s5292_s21 }
  0xf5   : > { %v675_v44 = vpop.permute.xlu1 %674 }
  0xf6   : > { %v673_v43 = vpop.permute.xlu0 %672  ;;  %752 = vst.msk [vmem:[#allocation4 + $0x98] sm:$0xff] %vm732_vm3, %v675_v44 }
  0xf7   : > { %751 = vst.msk [vmem:[#allocation4 + $0x90] sm:$0xff] %vm732_vm3, %v673_v43  ;;  %1048 = vrot.lane.b32.xlu1 %v5560_v62, %s5292_s21 }
  0xf8   : > { %1046 = vrot.lane.b32.xlu0 %v5556_v59, %s5292_s21 }
  0xf9   : > { %v679_v50 = vpop.permute.xlu1 %678 }
  0xfa   : > { %v677_v49 = vpop.permute.xlu0 %676  ;;  %754 = vst.msk [vmem:[#allocation4 + $0xa8] sm:$0xff] %vm732_vm3, %v679_v50 }
  0xfb   : > { %753 = vst.msk [vmem:[#allocation4 + $0xa0] sm:$0xff] %vm732_vm3, %v677_v49  ;;  %1052 = vrot.lane.b32.xlu1 %v5583_v46, %s5292_s21  ;;  %v1956_v49 = vld [vmem:[%s8082_s1] sm:$0xff] }
  0xfc   : > { %1050 = vrot.lane.b32.xlu0 %v5571_v39, %s5292_s21  ;;  %5153 = vmatprep.subr.mxu0 %v1956_v49 }
  0xfd   : > { %v683_v54 = vpop.permute.xlu1 %682  ;;  %5154 = vmatpush3.msra.mxu0 %v1956_v49 }
  0xfe   : > { %v681_v53 = vpop.permute.xlu0 %680  ;;  %756 = vst.msk [vmem:[#allocation4 + $0xb8] sm:$0xff] %vm732_vm3, %v683_v54  ;;  %v1540_v54 = vld [vmem:[#allocation2 + $0x49] sm:$0xff] }
  0xff   : > { %755 = vst.msk [vmem:[#allocation4 + $0xb0] sm:$0xff] %vm732_vm3, %v681_v53  ;;  %1056 = vrot.lane.b32.xlu1 %v5616_v24, %s5292_s21 }
 0x100   : > { %1054 = vrot.lane.b32.xlu0 %v5607_v58, %s5292_s21 }
 0x101   : > { %v687_v62 = vpop.permute.xlu1 %686 }
 0x102   : > { %v685_v59 = vpop.permute.xlu0 %684  ;;  %758 = vst.msk [vmem:[#allocation4 + $0xc8] sm:$0xff] %vm732_vm3, %v687_v62 }
 0x103   : > { %757 = vst.msk [vmem:[#allocation4 + $0xc0] sm:$0xff] %vm732_vm3, %v685_v59  ;;  %1060 = vrot.lane.b32.xlu1 %v5632_v55, %s5292_s21  ;;  %v1541_v59 = vld [vmem:[#allocation2 + $0x51] sm:$0xff] }
 0x104   : > { %1058 = vrot.lane.b32.xlu0 %v5630_v52, %s5292_s21 }
 0x105   : > { %v691_v46 = vpop.permute.xlu1 %690 }
 0x106   : > { %v689_v39 = vpop.permute.xlu0 %688  ;;  %760 = vst.msk [vmem:[#allocation4 + $0xd8] sm:$0xff] %vm732_vm3, %v691_v46  ;;  %v1733_v46 = vld [vmem:[#allocation2 + $0x4a] sm:$0xff] }
 0x107   : > { %759 = vst.msk [vmem:[#allocation4 + $0xd0] sm:$0xff] %vm732_vm3, %v689_v39  ;;  %1064 = vrot.lane.b32.xlu1 %v5689_v20, %s5292_s21  ;;  %v8175_v20 = vld [vmem:[#allocation36_spill] sm:$0xff] }
 0x108   : > { %1062 = vrot.lane.b32.xlu0 %v5687_v23, %s5292_s21  ;;  %v8176_v23 = vld [vmem:[#allocation37_spill] sm:$0xff] }
 0x109   : > { %v695_v24 = vpop.permute.xlu1 %694 }
 0x10a   : > { %v693_v58 = vpop.permute.xlu0 %692  ;;  %762 = vst.msk [vmem:[#allocation4 + $0xe8] sm:$0xff] %vm732_vm3, %v695_v24 }
 0x10b   : > { %761 = vst.msk [vmem:[#allocation4 + $0xe0] sm:$0xff] %vm732_vm3, %v693_v58  ;;  %1068 = vrot.lane.b32.xlu1 %v5722_v14, %s5292_s21  ;;  %v8177_v14 = vld [vmem:[#allocation39_spill] sm:$0xff] }
 0x10c   : > { %1066 = vrot.lane.b32.xlu0 %v5720_v15, %s5292_s21  ;;  %v8178_v15 = vld [vmem:[#allocation40_spill] sm:$0xff] }
 0x10d   : > { %v699_v55 = vpop.permute.xlu1 %698  ;;  %v1734_v58 = vld [vmem:[#allocation2 + $0x52] sm:$0xff] }
 0x10e   : > { %v697_v52 = vpop.permute.xlu0 %696  ;;  %764 = vst.msk [vmem:[#allocation4 + $0xf8] sm:$0xff] %vm732_vm3, %v699_v55  ;;  %v1542_v55 = vld [vmem:[#allocation2 + $0x61] sm:$0xff] }
 0x10f   : > { %763 = vst.msk [vmem:[#allocation4 + $0xf0] sm:$0xff] %vm732_vm3, %v697_v52  ;;  %1072 = vrot.lane.b32.xlu1 %v8176_v23, %s5292_s21 }
 0x110   : > { %1070 = vrot.lane.b32.xlu0 %v8175_v20, %s5292_s21  ;;  %v1543_v20 = vld [vmem:[#allocation2 + $0x69] sm:$0xff] }
 0x111   : > { %v832_v7 = vpop.permute.xlu1 %831 }
 0x112   : > { %v830_v3 = vpop.permute.xlu0 %829  ;;  %927 = vst.msk [vmem:[#allocation4 + $0x8] sm:$0xff] %vm925_vm4, %v832_v7  ;;  %v1735_v7 = vld [vmem:[#allocation2 + $0x62] sm:$0xff] }
 0x113   : > { %926 = vst.msk [vmem:[#allocation4] sm:$0xff] %vm925_vm4, %v830_v3  ;;  %1076 = vrot.lane.b32.xlu1 %v8178_v15, %s5292_s21 }
 0x114   : > { %1074 = vrot.lane.b32.xlu0 %v8177_v14, %s5292_s21 }
 0x115   : > { %v836_v56 = vpop.permute.xlu1 %835 }
 0x116   : > { %v834_v63 = vpop.permute.xlu0 %833  ;;  %929 = vst.msk [vmem:[#allocation4 + $0x18] sm:$0xff] %vm925_vm4, %v836_v56 }
 0x117   : > { %928 = vst.msk [vmem:[#allocation4 + $0x10] sm:$0xff] %vm925_vm4, %v834_v63  ;;  %1080 = vrot.lane.b32.xlu1 %v8180_v8, %s5292_s21  ;;  %v1544_v8 = vld [vmem:[#allocation2 + $0x79] sm:$0xff] }
 0x118   : > { %1078 = vrot.lane.b32.xlu0 %v8179_v1, %s5292_s21 }
 0x119   : > { %v840_v21 = vpop.permute.xlu1 %839 }
 0x11a   : > { %v838_v26 = vpop.permute.xlu0 %837  ;;  %931 = vst.msk [vmem:[#allocation4 + $0x28] sm:$0xff] %vm925_vm4, %v840_v21  ;;  %v1737_v21 = vld [vmem:[#allocation2 + $0x7a] sm:$0xff] }
 0x11b   : > { %930 = vst.msk [vmem:[#allocation4 + $0x20] sm:$0xff] %vm925_vm4, %v838_v26  ;;  %1084 = vrot.lane.b32.xlu1 %v989_v9, %s5292_s21 }
 0x11c   : > { %1082 = vrot.lane.b32.xlu0 %v988_v6, %s5292_s21  ;;  %v1545_v6 = vld [vmem:[#allocation2 + $0x81] sm:$0xff] }
 0x11d   : > { %v844_v34 = vpop.permute.xlu1 %843 }
 0x11e   : > { %v842_v16 = vpop.permute.xlu0 %841  ;;  %933 = vst.msk [vmem:[#allocation4 + $0x38] sm:$0xff] %vm925_vm4, %v844_v34 }
 0x11f   : > { %932 = vst.msk [vmem:[#allocation4 + $0x30] sm:$0xff] %vm925_vm4, %v842_v16  ;;  %1217 = vrot.lane.b32.xlu1 %v8182_v31, %s5293_s22 }
 0x120   : > { %1215 = vrot.lane.b32.xlu0 %v8181_v13, %s5293_s22 }
 0x121   : > { %v848_v45 = vpop.permute.xlu1 %847 }
 0x122   : > { %v846_v12 = vpop.permute.xlu0 %845  ;;  %935 = vst.msk [vmem:[#allocation4 + $0x48] sm:$0xff] %vm925_vm4, %v848_v45  ;;  %v1546_v45 = vld [vmem:[#allocation2 + $0x91] sm:$0xff] }
 0x123   : > { %934 = vst.msk [vmem:[#allocation4 + $0x40] sm:$0xff] %vm925_vm4, %v846_v12  ;;  %1221 = vrot.lane.b32.xlu1 %v8184_v4, %s5293_s22 }
 0x124   : > { %1219 = vrot.lane.b32.xlu0 %v8183_v2, %s5293_s22 }
 0x125   : > { %v852_v10 = vpop.permute.xlu1 %851 }
 0x126   : > { %v850_v22 = vpop.permute.xlu0 %849  ;;  %937 = vst.msk [vmem:[#allocation4 + $0x58] sm:$0xff] %vm925_vm4, %v852_v10 }
 0x127   : > { %936 = vst.msk [vmem:[#allocation4 + $0x50] sm:$0xff] %vm925_vm4, %v850_v22  ;;  %1225 = vrot.lane.b32.xlu1 %v8186_v5, %s5293_s22  ;;  %v1739_v22 = vld [vmem:[#allocation2 + $0x92] sm:$0xff] }
 0x128   : > { %1223 = vrot.lane.b32.xlu0 %v8185_v0, %s5293_s22 }
 0x129   : > { %v856_v28 = vpop.permute.xlu1 %855 }
 0x12a   : > { %v854_v27 = vpop.permute.xlu0 %853  ;;  %939 = vst.msk [vmem:[#allocation4 + $0x68] sm:$0xff] %vm925_vm4, %v856_v28  ;;  %v1549_v28 = vld [vmem:[#allocation2 + $0xb1] sm:$0xff] }
 0x12b   : > { %938 = vst.msk [vmem:[#allocation4 + $0x60] sm:$0xff] %vm925_vm4, %v854_v27  ;;  %1411 = vrot.lane.b32.xlu1 %v5569_v38, %s5294_s4  ;;  %v1548_v27 = vld [vmem:[#allocation2 + $0xa9] sm:$0xff] }
 0x12c   : > { %1409 = vrot.lane.b32.xlu0 %v5623_v41, %s5294_s4 }
 0x12d   : > { %v860_v44 = vpop.permute.xlu1 %859 }
 0x12e   : > { %v858_v43 = vpop.permute.xlu0 %857  ;;  %941 = vst.msk [vmem:[#allocation4 + $0x78] sm:$0xff] %vm925_vm4, %v860_v44 }
 0x12f   : > { %940 = vst.msk [vmem:[#allocation4 + $0x70] sm:$0xff] %vm925_vm4, %v858_v43  ;;  %1604 = vrot.lane.b32.xlu1 %v1539_v32, %s5295_s7  ;;  %v1741_v32 = vld [vmem:[#allocation2 + $0xaa] sm:$0xff] }
 0x130   : > { %1602 = vrot.lane.b32.xlu0 %v1538_v30, %s5295_s7 }
 0x131   : > { %v864_v41 = vpop.permute.xlu1 %863 }
 0x132   : > { %v862_v38 = vpop.permute.xlu0 %861  ;;  %943 = vst.msk [vmem:[#allocation4 + $0x88] sm:$0xff] %vm925_vm4, %v864_v41 }
 0x133   : > { %942 = vst.msk [vmem:[#allocation4 + $0x80] sm:$0xff] %vm925_vm4, %v862_v38  ;;  %1797 = vrot.lane.b32.xlu1 %v8184_v4, %s5296_s8 }
 0x134   : > { %1795 = vrot.lane.b32.xlu0 %v8183_v2, %s5296_s8  ;;  %v1547_v2 = vld [vmem:[#allocation2 + $0x99] sm:$0xff] }
 0x135   : > { %v868_v53 = vpop.permute.xlu1 %867 }
 0x136   : > { %v866_v50 = vpop.permute.xlu0 %865  ;;  %945 = vst.msk [vmem:[#allocation4 + $0x98] sm:$0xff] %vm925_vm4, %v868_v53  ;;  %v1551_v53 = vld [vmem:[#allocation2 + $0xc9] sm:$0xff] }
 0x137   : > { %944 = vst.msk [vmem:[#allocation4 + $0x90] sm:$0xff] %vm925_vm4, %v866_v50  ;;  %1415 = vrot.lane.b32.xlu1 %v5581_v42, %s5294_s4  ;;  %v1550_v50 = vld [vmem:[#allocation2 + $0xc1] sm:$0xff] }
 0x138   : > { %1413 = vrot.lane.b32.xlu0 %v5645_v37, %s5294_s4 }
 0x139   : > { %v872_v39 = vpop.permute.xlu1 %871 }
 0x13a   : > { %v870_v62 = vpop.permute.xlu0 %869  ;;  %947 = vst.msk [vmem:[#allocation4 + $0xa8] sm:$0xff] %vm925_vm4, %v872_v39  ;;  %v1743_v39 = vld [vmem:[#allocation2 + $0xc2] sm:$0xff] }
 0x13b   : > { %946 = vst.msk [vmem:[#allocation4 + $0xa0] sm:$0xff] %vm925_vm4, %v870_v62  ;;  %1608 = vrot.lane.b32.xlu1 %v1541_v59, %s5295_s7  ;;  %v295_v62 = vld [vmem:[#allocation2 + $0x18f] sm:$0x1] }
 0x13c   : > { %1606 = vrot.lane.b32.xlu0 %v1540_v54, %s5295_s7  ;;  %313 = vst.msk [vmem:[#allocation2 + $0x191] sm:$0x1] %vm260_vm1, %v295_v62 }
 0x13d   : > { %v876_v52 = vpop.permute.xlu1 %875 }
 0x13e   : > { %v874_v24 = vpop.permute.xlu0 %873  ;;  %949 = vst.msk [vmem:[#allocation4 + $0xb8] sm:$0xff] %vm925_vm4, %v876_v52 }
 0x13f   : > { %948 = vst.msk [vmem:[#allocation4 + $0xb0] sm:$0xff] %vm925_vm4, %v874_v24  ;;  %1801 = vrot.lane.b32.xlu1 %v1734_v58, %s5296_s8  ;;  %v1744_v58 = vld [vmem:[#allocation2 + $0xca] sm:$0xff] }
 0x140   : > { %1799 = vrot.lane.b32.xlu0 %v1733_v46, %s5296_s8 }
 0x141   : > { %v880_v42 = vpop.permute.xlu1 %879 }
 0x142   : > { %v878_v37 = vpop.permute.xlu0 %877  ;;  %951 = vst.msk [vmem:[#allocation4 + $0xc8] sm:$0xff] %vm925_vm4, %v880_v42 }
 0x143   : > { %950 = vst.msk [vmem:[#allocation4 + $0xc0] sm:$0xff] %vm925_vm4, %v878_v37  ;;  %1419 = vrot.lane.b32.xlu1 %v5589_v47, %s5294_s4 }
 0x144   : > { %1417 = vrot.lane.b32.xlu0 %v5647_v36, %s5294_s4  ;;  %v1736_v36 = vld [vmem:[#allocation2 + $0x6a] sm:$0xff] }
 0x145   : > { %v884_v3 = vpop.permute.xlu1 %883 }
 0x146   : > { %v882_v23 = vpop.permute.xlu0 %881  ;;  %953 = vst.msk [vmem:[#allocation4 + $0xd8] sm:$0xff] %vm925_vm4, %v884_v3 }
 0x147   : > { %952 = vst.msk [vmem:[#allocation4 + $0xd0] sm:$0xff] %vm925_vm4, %v882_v23  ;;  %1612 = vrot.lane.b32.xlu1 %v1543_v20, %s5295_s7  ;;  %v1552_v20 = vld [vmem:[#allocation2 + $0xd9] sm:$0xff]  ;;  %v1553_v23 = vld [vmem:[#allocation2 + $0xe1] sm:$0xff] }
 0x148   : > { %1610 = vrot.lane.b32.xlu0 %v1542_v55, %s5295_s7  ;;  %v296_v55 = vld [vmem:[#allocation2 + $0x1a7] sm:$0x1] }
 0x149   : > { %v888_v15 = vpop.permute.xlu1 %887  ;;  %314 = vst.msk [vmem:[#allocation2 + $0x1a9] sm:$0x1] %vm260_vm1, %v296_v55 }
 0x14a   : > { %v886_v14 = vpop.permute.xlu0 %885  ;;  %955 = vst.msk [vmem:[#allocation4 + $0xe8] sm:$0xff] %vm925_vm4, %v888_v15 }
 0x14b   : > { %954 = vst.msk [vmem:[#allocation4 + $0xe0] sm:$0xff] %vm925_vm4, %v886_v14  ;;  %1227 = vrot.lane.b32.xlu1 %v1735_v7, %s5293_s22  ;;  %v1745_v14 = vld [vmem:[#allocation2 + $0xda] sm:$0xff] }
 0x14c   : > { %1803 = vrot.lane.b32.xlu0 %v1735_v7, %s5296_s8 }
 0x14d   : > { %v892_v63 = vpop.permute.xlu1 %891 }
 0x14e   : > { %v890_v47 = vpop.permute.xlu0 %889  ;;  %957 = vst.msk [vmem:[#allocation4 + $0xf8] sm:$0xff] %vm925_vm4, %v892_v63  ;;  %v1361_v63 = vld [vmem:[#allocation2 + $0xf0] sm:$0xff] }
 0x14f   : > { %956 = vst.msk [vmem:[#allocation4 + $0xf0] sm:$0xff] %vm925_vm4, %v890_v47  ;;  %1229 = vrot.lane.b32.xlu1 %v1736_v36, %s5293_s22 }
 0x150   : > { %1805 = vrot.lane.b32.xlu0 %v1736_v36, %s5296_s8 }
 0x151   : > { %v1025_v1 = vpop.permute.xlu1 %1024 }
 0x152   : > { %v1023_v56 = vpop.permute.xlu0 %1022  ;;  %1120 = vst.msk [vmem:[#allocation4 + $0x8] sm:$0xff] %vm1118_vm6, %v1025_v1 }
 0x153   : > { %1119 = vst.msk [vmem:[#allocation4] sm:$0xff] %vm1118_vm6, %v1023_v56  ;;  %1423 = vrot.lane.b32.xlu1 %v5594_v51, %s5294_s4  ;;  %v1362_v56 = vld [vmem:[#allocation2 + $0xf8] sm:$0xff] }
 0x154   : > { %1421 = vrot.lane.b32.xlu0 %v5656_v35, %s5294_s4  ;;  %v1738_v35 = vld [vmem:[#allocation2 + $0x82] sm:$0xff] }
 0x155   : > { %v1029_v26 = vpop.permute.xlu1 %1028 }
 0x156   : > { %v1027_v9 = vpop.permute.xlu0 %1026  ;;  %1122 = vst.msk [vmem:[#allocation4 + $0x18] sm:$0xff] %vm1118_vm6, %v1029_v26 }
 0x157   : > { %1121 = vst.msk [vmem:[#allocation4 + $0x10] sm:$0xff] %vm1118_vm6, %v1027_v9  ;;  %1616 = vrot.lane.b32.xlu1 %v1545_v6, %s5295_s7  ;;  %v1554_v6 = vld [vmem:[#allocation2 + $0xf1] sm:$0xff]  ;;  %v1555_v9 = vld [vmem:[#allocation2 + $0xf9] sm:$0xff] }
 0x158   : > { %1614 = vrot.lane.b32.xlu0 %v1544_v8, %s5295_s7 }
 0x159   : > { %v1033_v34 = vpop.permute.xlu1 %1032 }
 0x15a   : > { %v1031_v16 = vpop.permute.xlu0 %1030  ;;  %1124 = vst.msk [vmem:[#allocation4 + $0x28] sm:$0xff] %vm1118_vm6, %v1033_v34 }
 0x15b   : > { %1123 = vst.msk [vmem:[#allocation4 + $0x20] sm:$0xff] %vm1118_vm6, %v1031_v16  ;;  %1231 = vrot.lane.b32.xlu1 %v1737_v21, %s5293_s22  ;;  %v1747_v16 = vld [vmem:[#allocation2 + $0xf2] sm:$0xff] }
 0x15c   : > { %1807 = vrot.lane.b32.xlu0 %v1737_v21, %s5296_s8 }
 0x15d   : > { %v1037_v13 = vpop.permute.xlu1 %1036 }
 0x15e   : > { %v1035_v51 = vpop.permute.xlu0 %1034  ;;  %1126 = vst.msk [vmem:[#allocation4 + $0x38] sm:$0xff] %vm1118_vm6, %v1037_v13 }
 0x15f   : > { %1125 = vst.msk [vmem:[#allocation4 + $0x30] sm:$0xff] %vm1118_vm6, %v1035_v51  ;;  %1233 = vrot.lane.b32.xlu1 %v1738_v35, %s5293_s22  ;;  %v1748_v51 = vld [vmem:[#allocation2 + $0xfa] sm:$0xff] }
 0x160   : > { %1809 = vrot.lane.b32.xlu0 %v1738_v35, %s5296_s8 }
 0x161   : > { %v1041_v12 = vpop.permute.xlu1 %1040 }
 0x162   : > { %v1039_v31 = vpop.permute.xlu0 %1038  ;;  %1128 = vst.msk [vmem:[#allocation4 + $0x48] sm:$0xff] %vm1118_vm6, %v1041_v12 }
 0x163   : > { %1127 = vst.msk [vmem:[#allocation4 + $0x40] sm:$0xff] %vm1118_vm6, %v1039_v31  ;;  %1427 = vrot.lane.b32.xlu1 %v5601_v57, %s5294_s4  ;;  %v1740_v57 = vld [vmem:[#allocation2 + $0x9a] sm:$0xff] }
 0x164   : > { %1425 = vrot.lane.b32.xlu0 %v5663_v60, %s5294_s4 }
 0x165   : > { %v1045_v17 = vpop.permute.xlu1 %1044 }
 0x166   : > { %v1043_v4 = vpop.permute.xlu0 %1042  ;;  %1130 = vst.msk [vmem:[#allocation4 + $0x58] sm:$0xff] %vm1118_vm6, %v1045_v17 }
 0x167   : > { %1129 = vst.msk [vmem:[#allocation4 + $0x50] sm:$0xff] %vm1118_vm6, %v1043_v4  ;;  %1620 = vrot.lane.b32.xlu1 %v1547_v2, %s5295_s7  ;;  %v1363_v2 = vld [vmem:[#allocation2 + $0x108] sm:$0xff] }
 0x168   : > { %1618 = vrot.lane.b32.xlu0 %v1546_v45, %s5295_s7 }
 0x169   : > { %v1049_v11 = vpop.permute.xlu1 %1048 }
 0x16a   : > { %v1047_v10 = vpop.permute.xlu0 %1046  ;;  %1132 = vst.msk [vmem:[#allocation4 + $0x68] sm:$0xff] %vm1118_vm6, %v1049_v11 }
 0x16b   : > { %1131 = vst.msk [vmem:[#allocation4 + $0x60] sm:$0xff] %vm1118_vm6, %v1047_v10  ;;  %1235 = vrot.lane.b32.xlu1 %v1739_v22, %s5293_s22  ;;  %v1556_v10 = vld [vmem:[#allocation2 + $0x109] sm:$0xff] }
 0x16c   : > { %1811 = vrot.lane.b32.xlu0 %v1739_v22, %s5296_s8  ;;  %v1364_v22 = vld [vmem:[#allocation2 + $0x110] sm:$0xff] }
 0x16d   : > { %v1053_v0 = vpop.permute.xlu1 %1052 }
 0x16e   : > { %v1051_v60 = vpop.permute.xlu0 %1050  ;;  %1134 = vst.msk [vmem:[#allocation4 + $0x78] sm:$0xff] %vm1118_vm6, %v1053_v0  ;;  %v1749_v0 = vld [vmem:[#allocation2 + $0x10a] sm:$0xff] }
 0x16f   : > { %1133 = vst.msk [vmem:[#allocation4 + $0x70] sm:$0xff] %vm1118_vm6, %v1051_v60  ;;  %1237 = vrot.lane.b32.xlu1 %v1740_v57, %s5293_s22  ;;  %v1557_v60 = vld [vmem:[#allocation2 + $0x111] sm:$0xff] }
 0x170   : > { %1813 = vrot.lane.b32.xlu0 %v1740_v57, %s5296_s8 }
 0x171   : > { %v1057_v25 = vpop.permute.xlu1 %1056 }
 0x172   : > { %v1055_v5 = vpop.permute.xlu0 %1054  ;;  %1136 = vst.msk [vmem:[#allocation4 + $0x88] sm:$0xff] %vm1118_vm6, %v1057_v25 }
 0x173   : > { %1135 = vst.msk [vmem:[#allocation4 + $0x80] sm:$0xff] %vm1118_vm6, %v1055_v5  ;;  %1431 = vrot.lane.b32.xlu1 %v5614_v61, %s5294_s4  ;;  %v1742_v61 = vld [vmem:[#allocation2 + $0xb2] sm:$0xff] }
 0x174   : > { %1429 = vrot.lane.b32.xlu0 %v5681_v33, %s5294_s4 }
 0x175   : > { %v1061_v30 = vpop.permute.xlu1 %1060 }
 0x176   : > { %v1059_v29 = vpop.permute.xlu0 %1058  ;;  %1138 = vst.msk [vmem:[#allocation4 + $0x98] sm:$0xff] %vm1118_vm6, %v1061_v30 }
 0x177   : > { %1137 = vst.msk [vmem:[#allocation4 + $0x90] sm:$0xff] %vm1118_vm6, %v1059_v29  ;;  %1624 = vrot.lane.b32.xlu1 %v1549_v28, %s5295_s7  ;;  %v1750_v29 = vld [vmem:[#allocation2 + $0x112] sm:$0xff] }
 0x178   : > { %1622 = vrot.lane.b32.xlu0 %v1548_v27, %s5295_s7 }
 0x179   : > { %v1065_v44 = vpop.permute.xlu1 %1064 }
 0x17a   : > { %v1063_v43 = vpop.permute.xlu0 %1062  ;;  %1140 = vst.msk [vmem:[#allocation4 + $0xa8] sm:$0xff] %vm1118_vm6, %v1065_v44 }
 0x17b   : > { %1139 = vst.msk [vmem:[#allocation4 + $0xa0] sm:$0xff] %vm1118_vm6, %v1063_v43  ;;  %1239 = vrot.lane.b32.xlu1 %v1741_v32, %s5293_s22  ;;  %v1365_v43 = vld [vmem:[#allocation2 + $0x120] sm:$0xff] }
 0x17c   : > { %1815 = vrot.lane.b32.xlu0 %v1741_v32, %s5296_s8 }
 0x17d   : > { %v1069_v49 = vpop.permute.xlu1 %1068 }
 0x17e   : > { %v1067_v33 = vpop.permute.xlu0 %1066  ;;  %1142 = vst.msk [vmem:[#allocation4 + $0xb8] sm:$0xff] %vm1118_vm6, %v1069_v49  ;;  %v1558_v49 = vld [vmem:[#allocation2 + $0x121] sm:$0xff] }
 0x17f   : > { %1141 = vst.msk [vmem:[#allocation4 + $0xb0] sm:$0xff] %vm1118_vm6, %v1067_v33  ;;  %1241 = vrot.lane.b32.xlu1 %v1742_v61, %s5293_s22  ;;  %v1366_v33 = vld [vmem:[#allocation2 + $0x128] sm:$0xff] }
 0x180   : > { %1817 = vrot.lane.b32.xlu0 %v1742_v61, %s5296_s8 }
 0x181   : > { %v1073_v41 = vpop.permute.xlu1 %1072 }
 0x182   : > { %v1071_v38 = vpop.permute.xlu0 %1070  ;;  %1144 = vst.msk [vmem:[#allocation4 + $0xc8] sm:$0xff] %vm1118_vm6, %v1073_v41 }
 0x183   : > { %1143 = vst.msk [vmem:[#allocation4 + $0xc0] sm:$0xff] %vm1118_vm6, %v1071_v38  ;;  %1435 = vrot.lane.b32.xlu1 %v5621_v40, %s5294_s4  ;;  %v259_v40 = vld [vmem:[#allocation2 + $0x19a] sm:$0x1] }
 0x184   : > { %1433 = vrot.lane.b32.xlu0 %v5693_v19, %s5294_s4  ;;  %278 = vst.msk [vmem:[#allocation2 + $0x198] sm:$0x1] %vm260_vm1, %v259_v40 }
 0x185   : > { %v1077_v59 = vpop.permute.xlu1 %1076 }
 0x186   : > { %v1075_v54 = vpop.permute.xlu0 %1074  ;;  %1146 = vst.msk [vmem:[#allocation4 + $0xd8] sm:$0xff] %vm1118_vm6, %v1077_v59 }
 0x187   : > { %1145 = vst.msk [vmem:[#allocation4 + $0xd0] sm:$0xff] %vm1118_vm6, %v1075_v54  ;;  %1628 = vrot.lane.b32.xlu1 %v1551_v53, %s5295_s7  ;;  %v1559_v53 = vld [vmem:[#allocation2 + $0x129] sm:$0xff] }
 0x188   : > { %1626 = vrot.lane.b32.xlu0 %v1550_v50, %s5295_s7  ;;  %v1751_v54 = vld [vmem:[#allocation2 + $0x122] sm:$0xff] }
 0x189   : > { %v1081_v46 = vpop.permute.xlu1 %1080 }
 0x18a   : > { %v1079_v19 = vpop.permute.xlu0 %1078  ;;  %1148 = vst.msk [vmem:[#allocation4 + $0xe8] sm:$0xff] %vm1118_vm6, %v1081_v46 }
 0x18b   : > { %1147 = vst.msk [vmem:[#allocation4 + $0xe0] sm:$0xff] %vm1118_vm6, %v1079_v19  ;;  %1243 = vrot.lane.b32.xlu1 %v1743_v39, %s5293_s22  ;;  %v1752_v19 = vld [vmem:[#allocation2 + $0x12a] sm:$0xff] }
 0x18c   : > { %1819 = vrot.lane.b32.xlu0 %v1743_v39, %s5296_s8 }
 0x18d   : > { %v1085_v52 = vpop.permute.xlu1 %1084 }
 0x18e   : > { %v1083_v24 = vpop.permute.xlu0 %1082  ;;  %1150 = vst.msk [vmem:[#allocation4 + $0xf8] sm:$0xff] %vm1118_vm6, %v1085_v52 }
 0x18f   : > { %1149 = vst.msk [vmem:[#allocation4 + $0xf0] sm:$0xff] %vm1118_vm6, %v1083_v24  ;;  %1245 = vrot.lane.b32.xlu1 %v1744_v58, %s5293_s22 }
 0x190   : > { %1821 = vrot.lane.b32.xlu0 %v1744_v58, %s5296_s8  ;;  %v1367_v58 = vld [vmem:[#allocation2 + $0x138] sm:$0xff] }
 0x191   : > { %v1218_v42 = vpop.permute.xlu1 %1217 }
 0x192   : > { %v1216_v37 = vpop.permute.xlu0 %1215  ;;  %1313 = vst.msk [vmem:[#allocation4 + $0x8] sm:$0xff] %vm1311_vm7, %v1218_v42  ;;  %v1560_v42 = vld [vmem:[#allocation2 + $0x139] sm:$0xff] }
 0x193   : > { %1312 = vst.msk [vmem:[#allocation4] sm:$0xff] %vm1311_vm7, %v1216_v37  ;;  %1439 = vrot.lane.b32.xlu1 %v5628_v48, %s5294_s4  ;;  %v1746_v48 = vld [vmem:[#allocation2 + $0xe2] sm:$0xff] }
 0x194   : > { %1437 = vrot.lane.b32.xlu0 %v5697_v18, %s5294_s4  ;;  %v1368_v37 = vld [vmem:[#allocation2 + $0x140] sm:$0xff] }
 0x195   : > { %v1222_v7 = vpop.permute.xlu1 %1221 }
 0x196   : > { %v1220_v3 = vpop.permute.xlu0 %1219  ;;  %1315 = vst.msk [vmem:[#allocation4 + $0x18] sm:$0xff] %vm1311_vm7, %v1222_v7  ;;  %v1753_v7 = vld [vmem:[#allocation2 + $0x13a] sm:$0xff] }
 0x197   : > { %1314 = vst.msk [vmem:[#allocation4 + $0x10] sm:$0xff] %vm1311_vm7, %v1220_v3  ;;  %1632 = vrot.lane.b32.xlu1 %v1553_v23, %s5295_s7  ;;  %v1561_v3 = vld [vmem:[#allocation2 + $0x141] sm:$0xff] }
 0x198   : > { %1630 = vrot.lane.b32.xlu0 %v1552_v20, %s5295_s7 }
 0x199   : > { %v1226_v15 = vpop.permute.xlu1 %1225 }
 0x19a   : > { %v1224_v18 = vpop.permute.xlu0 %1223  ;;  %1317 = vst.msk [vmem:[#allocation4 + $0x28] sm:$0xff] %vm1311_vm7, %v1226_v15 }
 0x19b   : > { %1316 = vst.msk [vmem:[#allocation4 + $0x20] sm:$0xff] %vm1311_vm7, %v1224_v18  ;;  %1247 = vrot.lane.b32.xlu1 %v1745_v14, %s5293_s22 }
 0x19c   : > { %1823 = vrot.lane.b32.xlu0 %v1745_v14, %s5296_s8 }
 0x19d   : > { %v1412_v47 = vpop.permute.xlu1 %1411 }
 0x19e   : > { %v1410_v36 = vpop.permute.xlu0 %1409  ;;  %1507 = vst.msk [vmem:[#allocation4 + $0x8] sm:$0xff] %vm1505_vm8, %v1412_v47 }
 0x19f   : > { %1506 = vst.msk [vmem:[#allocation4] sm:$0xff] %vm1505_vm8, %v1410_v36  ;;  %1249 = vrot.lane.b32.xlu1 %v1746_v48, %s5293_s22 }
 0x1a0   : > { %1825 = vrot.lane.b32.xlu0 %v1746_v48, %s5296_s8  ;;  %v1754_v48 = vld [vmem:[#allocation2 + $0x142] sm:$0xff] }
 0x1a1   : > { %v1605_v8 = vpop.permute.xlu1 %1604 }
 0x1a2   : > { %v1603_v1 = vpop.permute.xlu0 %1602  ;;  %1700 = vst.msk [vmem:[#allocation4 + $0x8] sm:$0xff] %vm1698_vm9, %v1605_v8  ;;  %v1370_v8 = vld [vmem:[#allocation2 + $0x158] sm:$0xff] }
 0x1a3   : > { %1699 = vst.msk [vmem:[#allocation4] sm:$0xff] %vm1698_vm9, %v1603_v1  ;;  %1443 = vrot.lane.b32.xlu1 %v1362_v56, %s5294_s4 }
 0x1a4   : > { %1441 = vrot.lane.b32.xlu0 %v1361_v63, %s5294_s4  ;;  %v1369_v63 = vld [vmem:[#allocation2 + $0x150] sm:$0xff] }
 0x1a5   : > { %v1798_v21 = vpop.permute.xlu1 %1797 }
 0x1a6   : > { %v1796_v26 = vpop.permute.xlu0 %1795  ;;  %1893 = vst.msk [vmem:[#allocation4 + $0x8] sm:$0xff] %vm1891_vm10, %v1798_v21 }
 0x1a7   : > { %1892 = vst.msk [vmem:[#allocation4] sm:$0xff] %vm1891_vm10, %v1796_v26  ;;  %1636 = vrot.lane.b32.xlu1 %v1555_v9, %s5295_s7 }
 0x1a8   : > { %1634 = vrot.lane.b32.xlu0 %v1554_v6, %s5295_s7  ;;  %v1562_v6 = vld [vmem:[#allocation2 + $0x151] sm:$0xff] }
 0x1a9   : > { %v1416_v35 = vpop.permute.xlu1 %1415 }
 0x1aa   : > { %v1414_v34 = vpop.permute.xlu0 %1413  ;;  %1509 = vst.msk [vmem:[#allocation4 + $0x18] sm:$0xff] %vm1505_vm8, %v1416_v35 }
 0x1ab   : > { %1508 = vst.msk [vmem:[#allocation4 + $0x10] sm:$0xff] %vm1505_vm8, %v1414_v34  ;;  %1251 = vrot.lane.b32.xlu1 %v1747_v16, %s5293_s22  ;;  %v1755_v34 = vld [vmem:[#allocation2 + $0x152] sm:$0xff] }
 0x1ac   : > { %1827 = vrot.lane.b32.xlu0 %v1747_v16, %s5296_s8  ;;  %v1563_v16 = vld [vmem:[#allocation2 + $0x159] sm:$0xff] }
 0x1ad   : > { %v1609_v31 = vpop.permute.xlu1 %1608  ;;  %v1925_v45 = vld [vmem:[#allocation4 + $0x8] sm:$0xff] }
 0x1ae   : > { %v1607_v13 = vpop.permute.xlu0 %1606  ;;  %v1924_v12 = vld [vmem:[#allocation4] sm:$0xff]  ;;  %1702 = vst.msk [vmem:[#allocation4 + $0x18] sm:$0xff] %vm1698_vm9, %v1609_v31 }
 0x1af   : > { %1701 = vst.msk [vmem:[#allocation4 + $0x10] sm:$0xff] %vm1698_vm9, %v1607_v13  ;;  %5155 = vmatprep.mubr.msk.f32.mxu0 %vm1961_vm11, %v1924_v12  ;;  %1253 = vrot.lane.b32.xlu1 %v1748_v51, %s5293_s22  ;;  %v1756_v31 = vld [vmem:[#allocation2 + $0x15a] sm:$0xff] }
 0x1b0   : > { %1829 = vrot.lane.b32.xlu0 %v1748_v51, %s5296_s8  ;;  %5156 = vmatmul.mubr.msk.f32.vlgmr.msra.gmra.mxu0 %vm1961_vm11, %v1925_v45 }
 0x1b1   : > { %v1802_v17 = vpop.permute.xlu1 %1801 }
 0x1b2   : > { %v1800_v4 = vpop.permute.xlu0 %1799  ;;  %1895 = vst.msk [vmem:[#allocation4 + $0x18] sm:$0xff] %vm1891_vm10, %v1802_v17 }
 0x1b3   : > { %1894 = vst.msk [vmem:[#allocation4 + $0x10] sm:$0xff] %vm1891_vm10, %v1800_v4  ;;  %1447 = vrot.lane.b32.xlu1 %v1364_v22, %s5294_s4  ;;  %v1372_v22 = vld [vmem:[#allocation2 + $0x170] sm:$0xff] }
 0x1b4   : > { %1445 = vrot.lane.b32.xlu0 %v1363_v2, %s5294_s4  ;;  %v1371_v2 = vld [vmem:[#allocation2 + $0x168] sm:$0xff] }
 0x1b5   : > { %v1420_v57 = vpop.permute.xlu1 %1419 }
 0x1b6   : > { %v1418_v11 = vpop.permute.xlu0 %1417  ;;  %1511 = vst.msk [vmem:[#allocation4 + $0x28] sm:$0xff] %vm1505_vm8, %v1420_v57 }
 0x1b7   : > { %1510 = vst.msk [vmem:[#allocation4 + $0x20] sm:$0xff] %vm1505_vm8, %v1418_v11  ;;  %1640 = vrot.lane.b32.xlu1 %v1557_v60, %s5295_s7 }
 0x1b8   : > { %1638 = vrot.lane.b32.xlu0 %v1556_v10, %s5295_s7  ;;  %v1564_v10 = vld [vmem:[#allocation2 + $0x169] sm:$0xff] }
 0x1b9   : > { %v1613_v25 = vpop.permute.xlu1 %1612  ;;  %v1927_v28 = vld [vmem:[#allocation4 + $0x18] sm:$0xff] }
 0x1ba   : > { %v1611_v5 = vpop.permute.xlu0 %1610  ;;  %v1926_v27 = vld [vmem:[#allocation4 + $0x10] sm:$0xff]  ;;  %1704 = vst.msk [vmem:[#allocation4 + $0x28] sm:$0xff] %vm1698_vm9, %v1613_v25 }
 0x1bb   : > { %1703 = vst.msk [vmem:[#allocation4 + $0x20] sm:$0xff] %vm1698_vm9, %v1611_v5  ;;  %5158 = vmatprep.mubr.msk.f32.mxu0 %vm1961_vm11, %v1926_v27  ;;  %1255 = vrot.lane.b32.xlu1 %v1749_v0, %s5293_s22  ;;  %v1757_v5 = vld [vmem:[#allocation2 + $0x16a] sm:$0xff] }
 0x1bc   : > { %1831 = vrot.lane.b32.xlu0 %v1749_v0, %s5296_s8  ;;  %5159 = vmatmul.mubr.msk.f32.gmra.mxu0 %vm1961_vm11, %v1927_v28  ;;  %v1565_v0 = vld [vmem:[#allocation2 + $0x171] sm:$0xff] }
 0x1bd   : > { %v1228_v32 = vpop.permute.xlu1 %1227 }
 0x1be   : > { %v1804_v30 = vpop.permute.xlu0 %1803  ;;  %1318 = vst.msk [vmem:[#allocation4 + $0x30] sm:$0xff] %vm1311_vm7, %v1228_v32 }
 0x1bf   : > { %1896 = vst.msk [vmem:[#allocation4 + $0x20] sm:$0xff] %vm1891_vm10, %v1804_v30  ;;  %1257 = vrot.lane.b32.xlu1 %v1750_v29, %s5293_s22 }
 0x1c0   : > { %1833 = vrot.lane.b32.xlu0 %v1750_v29, %s5296_s8  ;;  %v1758_v29 = vld [vmem:[#allocation2 + $0x172] sm:$0xff] }
 0x1c1   : > { %v1230_v61 = vpop.permute.xlu1 %1229 }
 0x1c2   : > { %v1806_v44 = vpop.permute.xlu0 %1805  ;;  %1319 = vst.msk [vmem:[#allocation4 + $0x38] sm:$0xff] %vm1311_vm7, %v1230_v61 }
 0x1c3   : > { %1897 = vst.msk [vmem:[#allocation4 + $0x28] sm:$0xff] %vm1891_vm10, %v1806_v44  ;;  %1451 = vrot.lane.b32.xlu1 %v1366_v33, %s5294_s4  ;;  %v1374_v33 = vld [vmem:[#allocation2 + $0x188] sm:$0xff] }
 0x1c4   : > { %1449 = vrot.lane.b32.xlu0 %v1365_v43, %s5294_s4  ;;  %v1373_v43 = vld [vmem:[#allocation2 + $0x180] sm:$0xff] }
 0x1c5   : > { %v1424_v41 = vpop.permute.xlu1 %1423 }
 0x1c6   : > { %v1422_v38 = vpop.permute.xlu0 %1421  ;;  %v1928_v50 = vld [vmem:[#allocation4 + $0x20] sm:$0xff]  ;;  %1513 = vst.msk [vmem:[#allocation4 + $0x38] sm:$0xff] %vm1505_vm8, %v1424_v41 }
 0x1c7   : > { %1512 = vst.msk [vmem:[#allocation4 + $0x30] sm:$0xff] %vm1505_vm8, %v1422_v38  ;;  %5161 = vmatprep.mubr.msk.f32.mxu0 %vm1961_vm11, %v1928_v50  ;;  %1644 = vrot.lane.b32.xlu1 %v1559_v53, %s5295_s7  ;;  %v1567_v53 = vld [vmem:[#allocation2 + $0x189] sm:$0xff] }
 0x1c8   : > { %1642 = vrot.lane.b32.xlu0 %v1558_v49, %s5295_s7  ;;  %v1566_v49 = vld [vmem:[#allocation2 + $0x181] sm:$0xff] }
 0x1c9   : > { %v1617_v62 = vpop.permute.xlu1 %1616 }
 0x1ca   : > { %v1615_v59 = vpop.permute.xlu0 %1614  ;;  %v1929_v39 = vld [vmem:[#allocation4 + $0x28] sm:$0xff]  ;;  %1706 = vst.msk [vmem:[#allocation4 + $0x38] sm:$0xff] %vm1698_vm9, %v1617_v62 }
 0x1cb   : > { %1705 = vst.msk [vmem:[#allocation4 + $0x30] sm:$0xff] %vm1698_vm9, %v1615_v59  ;;  %5162 = vmatmul.mubr.msk.f32.gmra.mxu0 %vm1961_vm11, %v1929_v39  ;;  %1259 = vrot.lane.b32.xlu1 %v1751_v54, %s5293_s22 }
 0x1cc   : > { %1835 = vrot.lane.b32.xlu0 %v1751_v54, %s5296_s8  ;;  %v1759_v54 = vld [vmem:[#allocation2 + $0x182] sm:$0xff] }
 0x1cd   : > { %v1232_v40 = vpop.permute.xlu1 %1231 }
 0x1ce   : > { %v1808_v46 = vpop.permute.xlu0 %1807  ;;  %1320 = vst.msk [vmem:[#allocation4 + $0x40] sm:$0xff] %vm1311_vm7, %v1232_v40 }
 0x1cf   : > { %1898 = vst.msk [vmem:[#allocation4 + $0x30] sm:$0xff] %vm1891_vm10, %v1808_v46  ;;  %1261 = vrot.lane.b32.xlu1 %v1752_v19, %s5293_s22 }
 0x1d0   : > { %1837 = vrot.lane.b32.xlu0 %v1752_v19, %s5296_s8  ;;  %v1760_v19 = vld [vmem:[#allocation2 + $0x18a] sm:$0xff] }
 0x1d1   : > { %v1234_v52 = vpop.permute.xlu1 %1233 }
 0x1d2   : > { %v1810_v24 = vpop.permute.xlu0 %1809  ;;  %1321 = vst.msk [vmem:[#allocation4 + $0x48] sm:$0xff] %vm1311_vm7, %v1234_v52 }
 0x1d3   : > { %1899 = vst.msk [vmem:[#allocation4 + $0x38] sm:$0xff] %vm1891_vm10, %v1810_v24  ;;  %1455 = vrot.lane.b32.xlu1 %v1368_v37, %s5294_s4  ;;  %v1376_v37 = vld [vmem:[#allocation2 + $0x1a0] sm:$0xff] }
 0x1d4   : > { %1453 = vrot.lane.b32.xlu0 %v1367_v58, %s5294_s4  ;;  %v1375_v58 = vld [vmem:[#allocation2 + $0x198] sm:$0xff] }
 0x1d5   : > { %v1428_v20 = vpop.permute.xlu1 %1427 }
 0x1d6   : > { %v1426_v55 = vpop.permute.xlu0 %1425  ;;  %v1930_v23 = vld [vmem:[#allocation4 + $0x30] sm:$0xff]  ;;  %1515 = vst.msk [vmem:[#allocation4 + $0x48] sm:$0xff] %vm1505_vm8, %v1428_v20 }
 0x1d7   : > { %1514 = vst.msk [vmem:[#allocation4 + $0x40] sm:$0xff] %vm1505_vm8, %v1426_v55  ;;  %5164 = vmatprep.mubr.msk.f32.mxu0 %vm1961_vm11, %v1930_v23  ;;  %1648 = vrot.lane.b32.xlu1 %v1561_v3, %s5295_s7  ;;  %v1569_v3 = vld [vmem:[#allocation2 + $0x1a1] sm:$0xff] }
 0x1d8   : > { %1646 = vrot.lane.b32.xlu0 %v1560_v42, %s5295_s7  ;;  %v1568_v42 = vld [vmem:[#allocation2 + $0x199] sm:$0xff] }
 0x1d9   : > { %v1621_v18 = vpop.permute.xlu1 %1620 }
 0x1da   : > { %v1619_v14 = vpop.permute.xlu0 %1618  ;;  %v1931_v15 = vld [vmem:[#allocation4 + $0x38] sm:$0xff]  ;;  %1708 = vst.msk [vmem:[#allocation4 + $0x48] sm:$0xff] %vm1698_vm9, %v1621_v18 }
 0x1db   : > { %1707 = vst.msk [vmem:[#allocation4 + $0x40] sm:$0xff] %vm1698_vm9, %v1619_v14  ;;  %5165 = vmatmul.mubr.msk.f32.gmra.mxu0 %vm1961_vm11, %v1931_v15  ;;  %1263 = vrot.lane.b32.xlu1 %v1753_v7, %s5293_s22 }
 0x1dc   : > { %1839 = vrot.lane.b32.xlu0 %v1753_v7, %s5296_s8  ;;  %v1761_v7 = vld [vmem:[#allocation2 + $0x19a] sm:$0xff] }
 0x1dd   : > { %v1236_v47 = vpop.permute.xlu1 %1235 }
 0x1de   : > { %v1812_v36 = vpop.permute.xlu0 %1811  ;;  %1322 = vst.msk [vmem:[#allocation4 + $0x50] sm:$0xff] %vm1311_vm7, %v1236_v47 }
 0x1df   : > { %1900 = vst.msk [vmem:[#allocation4 + $0x40] sm:$0xff] %vm1891_vm10, %v1812_v36  ;;  %1265 = vrot.lane.b32.xlu1 %v1754_v48, %s5293_s22 }
 0x1e0   : > { %1841 = vrot.lane.b32.xlu0 %v1754_v48, %s5296_s8  ;;  %v1762_v48 = vld [vmem:[#allocation2 + $0x1a2] sm:$0xff] }
 0x1e1   : > { %v1238_v1 = vpop.permute.xlu1 %1237 }
 0x1e2   : > { %v1814_v56 = vpop.permute.xlu0 %1813  ;;  %1323 = vst.msk [vmem:[#allocation4 + $0x58] sm:$0xff] %vm1311_vm7, %v1238_v1 }
 0x1e3   : > { %1901 = vst.msk [vmem:[#allocation4 + $0x48] sm:$0xff] %vm1891_vm10, %v1814_v56  ;;  %1459 = vrot.lane.b32.xlu1 %v1370_v8, %s5294_s4 }
 0x1e4   : > { %1457 = vrot.lane.b32.xlu0 %v1369_v63, %s5294_s4 }
 0x1e5   : > { %v1432_v26 = vpop.permute.xlu1 %1431 }
 0x1e6   : > { %v1430_v9 = vpop.permute.xlu0 %1429  ;;  %v1932_v21 = vld [vmem:[#allocation4 + $0x40] sm:$0xff]  ;;  %1517 = vst.msk [vmem:[#allocation4 + $0x58] sm:$0xff] %vm1505_vm8, %v1432_v26 }
 0x1e7   : > { %1516 = vst.msk [vmem:[#allocation4 + $0x50] sm:$0xff] %vm1505_vm8, %v1430_v9  ;;  %5167 = vmatprep.mubr.msk.f32.mxu0 %vm1961_vm11, %v1932_v21  ;;  %1652 = vrot.lane.b32.xlu1 %v1563_v16, %s5295_s7 }
 0x1e8   : > { %1650 = vrot.lane.b32.xlu0 %v1562_v6, %s5295_s7 }
 0x1e9   : > { %v1625_v51 = vpop.permute.xlu1 %1624 }
 0x1ea   : > { %v1623_v35 = vpop.permute.xlu0 %1622  ;;  %v1933_v13 = vld [vmem:[#allocation4 + $0x48] sm:$0xff]  ;;  %1710 = vst.msk [vmem:[#allocation4 + $0x58] sm:$0xff] %vm1698_vm9, %v1625_v51 }
 0x1eb   : > { %1709 = vst.msk [vmem:[#allocation4 + $0x50] sm:$0xff] %vm1698_vm9, %v1623_v35  ;;  %5168 = vmatmul.mubr.msk.f32.gmra.mxu0 %vm1961_vm11, %v1933_v13  ;;  %1267 = vrot.lane.b32.xlu1 %v1755_v34, %s5293_s22 }
 0x1ec   : > { %1843 = vrot.lane.b32.xlu0 %v1755_v34, %s5296_s8 }
 0x1ed   : > { %v1240_v45 = vpop.permute.xlu1 %1239 }
 0x1ee   : > { %v1816_v12 = vpop.permute.xlu0 %1815  ;;  %1324 = vst.msk [vmem:[#allocation4 + $0x60] sm:$0xff] %vm1311_vm7, %v1240_v45 }
 0x1ef   : > { %1902 = vst.msk [vmem:[#allocation4 + $0x50] sm:$0xff] %vm1891_vm10, %v1816_v12  ;;  %1269 = vrot.lane.b32.xlu1 %v1756_v31, %s5293_s22 }
 0x1f0   : > { %1845 = vrot.lane.b32.xlu0 %v1756_v31, %s5296_s8 }
 0x1f1   : > { %v1242_v17 = vpop.permute.xlu1 %1241 }
 0x1f2   : > { %v1818_v4 = vpop.permute.xlu0 %1817  ;;  %1325 = vst.msk [vmem:[#allocation4 + $0x68] sm:$0xff] %vm1311_vm7, %v1242_v17 }
 0x1f3   : > { %1903 = vst.msk [vmem:[#allocation4 + $0x58] sm:$0xff] %vm1891_vm10, %v1818_v4  ;;  %1463 = vrot.lane.b32.xlu1 %v1372_v22, %s5294_s4 }
 0x1f4   : > { %1461 = vrot.lane.b32.xlu0 %v1371_v2, %s5294_s4 }
 0x1f5   : > { %v1436_v57 = vpop.permute.xlu1 %1435 }
 0x1f6   : > { %v1434_v11 = vpop.permute.xlu0 %1433  ;;  %v1934_v60 = vld [vmem:[#allocation4 + $0x50] sm:$0xff]  ;;  %1519 = vst.msk [vmem:[#allocation4 + $0x68] sm:$0xff] %vm1505_vm8, %v1436_v57 }
 0x1f7   : > { %1518 = vst.msk [vmem:[#allocation4 + $0x60] sm:$0xff] %vm1505_vm8, %v1434_v11  ;;  %5170 = vmatprep.mubr.msk.f32.mxu0 %vm1961_vm11, %v1934_v60  ;;  %1656 = vrot.lane.b32.xlu1 %v1565_v0, %s5295_s7 }
 0x1f8   : > { %1654 = vrot.lane.b32.xlu0 %v1564_v10, %s5295_s7 }
 0x1f9   : > { %v1629_v27 = vpop.permute.xlu1 %1628 }
 0x1fa   : > { %v1627_v25 = vpop.permute.xlu0 %1626  ;;  %v1935_v28 = vld [vmem:[#allocation4 + $0x58] sm:$0xff]  ;;  %1712 = vst.msk [vmem:[#allocation4 + $0x68] sm:$0xff] %vm1698_vm9, %v1629_v27 }
 0x1fb   : > { %1711 = vst.msk [vmem:[#allocation4 + $0x60] sm:$0xff] %vm1698_vm9, %v1627_v25  ;;  %5171 = vmatmul.mubr.msk.f32.gmra.mxu0 %vm1961_vm11, %v1935_v28  ;;  %1271 = vrot.lane.b32.xlu1 %v1757_v5, %s5293_s22 }
 0x1fc   : > { %1847 = vrot.lane.b32.xlu0 %v1757_v5, %s5296_s8 }
 0x1fd   : > { %v1244_v32 = vpop.permute.xlu1 %1243 }
 0x1fe   : > { %v1820_v30 = vpop.permute.xlu0 %1819  ;;  %1326 = vst.msk [vmem:[#allocation4 + $0x70] sm:$0xff] %vm1311_vm7, %v1244_v32 }
 0x1ff   : > { %1904 = vst.msk [vmem:[#allocation4 + $0x60] sm:$0xff] %vm1891_vm10, %v1820_v30  ;;  %1273 = vrot.lane.b32.xlu1 %v1758_v29, %s5293_s22 }
 0x200   : > { %1849 = vrot.lane.b32.xlu0 %v1758_v29, %s5296_s8 }
 0x201   : > { %v1246_v61 = vpop.permute.xlu1 %1245 }
 0x202   : > { %v1822_v44 = vpop.permute.xlu0 %1821  ;;  %1327 = vst.msk [vmem:[#allocation4 + $0x78] sm:$0xff] %vm1311_vm7, %v1246_v61 }
 0x203   : > { %1905 = vst.msk [vmem:[#allocation4 + $0x68] sm:$0xff] %vm1891_vm10, %v1822_v44  ;;  %1467 = vrot.lane.b32.xlu1 %v1374_v33, %s5294_s4 }
 0x204   : > { %1465 = vrot.lane.b32.xlu0 %v1373_v43, %s5294_s4 }
 0x205   : > { %v1440_v41 = vpop.permute.xlu1 %1439 }
 0x206   : > { %v1438_v38 = vpop.permute.xlu0 %1437  ;;  %v1936_v50 = vld [vmem:[#allocation4 + $0x60] sm:$0xff]  ;;  %1521 = vst.msk [vmem:[#allocation4 + $0x78] sm:$0xff] %vm1505_vm8, %v1440_v41 }
 0x207   : > { %1520 = vst.msk [vmem:[#allocation4 + $0x70] sm:$0xff] %vm1505_vm8, %v1438_v38  ;;  %5173 = vmatprep.mubr.msk.f32.mxu0 %vm1961_vm11, %v1936_v50  ;;  %1660 = vrot.lane.b32.xlu1 %v1567_v53, %s5295_s7 }
 0x208   : > { %1658 = vrot.lane.b32.xlu0 %v1566_v49, %s5295_s7 }
 0x209   : > { %v1633_v62 = vpop.permute.xlu1 %1632 }
 0x20a   : > { %v1631_v59 = vpop.permute.xlu0 %1630  ;;  %v1937_v39 = vld [vmem:[#allocation4 + $0x68] sm:$0xff]  ;;  %1714 = vst.msk [vmem:[#allocation4 + $0x78] sm:$0xff] %vm1698_vm9, %v1633_v62 }
 0x20b   : > { %1713 = vst.msk [vmem:[#allocation4 + $0x70] sm:$0xff] %vm1698_vm9, %v1631_v59  ;;  %5174 = vmatmul.mubr.msk.f32.gmra.mxu0 %vm1961_vm11, %v1937_v39  ;;  %1275 = vrot.lane.b32.xlu1 %v1759_v54, %s5293_s22 }
 0x20c   : > { %1851 = vrot.lane.b32.xlu0 %v1759_v54, %s5296_s8 }
 0x20d   : > { %v1248_v40 = vpop.permute.xlu1 %1247 }
 0x20e   : > { %v1824_v46 = vpop.permute.xlu0 %1823  ;;  %1328 = vst.msk [vmem:[#allocation4 + $0x80] sm:$0xff] %vm1311_vm7, %v1248_v40 }
 0x20f   : > { %1906 = vst.msk [vmem:[#allocation4 + $0x70] sm:$0xff] %vm1891_vm10, %v1824_v46  ;;  %1277 = vrot.lane.b32.xlu1 %v1760_v19, %s5293_s22 }
 0x210   : > { %1853 = vrot.lane.b32.xlu0 %v1760_v19, %s5296_s8 }
 0x211   : > { %v1250_v52 = vpop.permute.xlu1 %1249 }
 0x212   : > { %v1826_v24 = vpop.permute.xlu0 %1825  ;;  %1329 = vst.msk [vmem:[#allocation4 + $0x88] sm:$0xff] %vm1311_vm7, %v1250_v52 }
 0x213   : > { %1907 = vst.msk [vmem:[#allocation4 + $0x78] sm:$0xff] %vm1891_vm10, %v1826_v24  ;;  %1471 = vrot.lane.b32.xlu1 %v1376_v37, %s5294_s4 }
 0x214   : > { %1469 = vrot.lane.b32.xlu0 %v1375_v58, %s5294_s4 }
 0x215   : > { %v1444_v20 = vpop.permute.xlu1 %1443 }
 0x216   : > { %v1442_v55 = vpop.permute.xlu0 %1441  ;;  %v1938_v23 = vld [vmem:[#allocation4 + $0x70] sm:$0xff]  ;;  %1523 = vst.msk [vmem:[#allocation4 + $0x88] sm:$0xff] %vm1505_vm8, %v1444_v20 }
 0x217   : > { %1522 = vst.msk [vmem:[#allocation4 + $0x80] sm:$0xff] %vm1505_vm8, %v1442_v55  ;;  %5176 = vmatprep.mubr.msk.f32.mxu0 %vm1961_vm11, %v1938_v23  ;;  %1664 = vrot.lane.b32.xlu1 %v1569_v3, %s5295_s7 }
 0x218   : > { %1662 = vrot.lane.b32.xlu0 %v1568_v42, %s5295_s7 }
 0x219   : > { %v1637_v18 = vpop.permute.xlu1 %1636 }
 0x21a   : > { %v1635_v14 = vpop.permute.xlu0 %1634  ;;  %v1939_v15 = vld [vmem:[#allocation4 + $0x78] sm:$0xff]  ;;  %1716 = vst.msk [vmem:[#allocation4 + $0x88] sm:$0xff] %vm1698_vm9, %v1637_v18 }
 0x21b   : > { %1715 = vst.msk [vmem:[#allocation4 + $0x80] sm:$0xff] %vm1698_vm9, %v1635_v14  ;;  %5177 = vmatmul.mubr.msk.f32.gmra.mxu0 %vm1961_vm11, %v1939_v15  ;;  %1857 = vrot.lane.b32.xlu1 %v1762_v48, %s5296_s8 }
 0x21c   : > { %1855 = vrot.lane.b32.xlu0 %v1761_v7, %s5296_s8 }
 0x21d   : > { %v1252_v47 = vpop.permute.xlu1 %1251 }
 0x21e   : > { %v1828_v36 = vpop.permute.xlu0 %1827  ;;  %1330 = vst.msk [vmem:[#allocation4 + $0x90] sm:$0xff] %vm1311_vm7, %v1252_v47 }
 0x21f   : > { %1908 = vst.msk [vmem:[#allocation4 + $0x80] sm:$0xff] %vm1891_vm10, %v1828_v36 }
 0x221   : > { %v1254_v56 = vpop.permute.xlu1 %1253 }
 0x222   : > { %v1830_v63 = vpop.permute.xlu0 %1829  ;;  %1331 = vst.msk [vmem:[#allocation4 + $0x98] sm:$0xff] %vm1311_vm7, %v1254_v56 }
 0x223   : > { %1909 = vst.msk [vmem:[#allocation4 + $0x88] sm:$0xff] %vm1891_vm10, %v1830_v63 }
 0x225   : > { %v1448_v6 = vpop.permute.xlu1 %1447 }
 0x226   : > { %v1446_v1 = vpop.permute.xlu0 %1445  ;;  %v1940_v8 = vld [vmem:[#allocation4 + $0x80] sm:$0xff]  ;;  %1525 = vst.msk [vmem:[#allocation4 + $0x98] sm:$0xff] %vm1505_vm8, %v1448_v6 }
 0x227   : > { %1524 = vst.msk [vmem:[#allocation4 + $0x90] sm:$0xff] %vm1505_vm8, %v1446_v1  ;;  %5179 = vmatprep.mubr.msk.f32.mxu0 %vm1961_vm11, %v1940_v8 }
 0x229   : > { %v1641_v21 = vpop.permute.xlu1 %1640 }
 0x22a   : > { %v1639_v9 = vpop.permute.xlu0 %1638  ;;  %v1941_v26 = vld [vmem:[#allocation4 + $0x88] sm:$0xff]  ;;  %1718 = vst.msk [vmem:[#allocation4 + $0x98] sm:$0xff] %vm1698_vm9, %v1641_v21 }
 0x22b   : > { %1717 = vst.msk [vmem:[#allocation4 + $0x90] sm:$0xff] %vm1698_vm9, %v1639_v9  ;;  %5180 = vmatmul.mubr.msk.f32.gmra.mxu0 %vm1961_vm11, %v1941_v26 }
 0x22d   : > { %v1256_v34 = vpop.permute.xlu1 %1255 }
 0x22e   : > { %v1832_v16 = vpop.permute.xlu0 %1831  ;;  %1332 = vst.msk [vmem:[#allocation4 + $0xa0] sm:$0xff] %vm1311_vm7, %v1256_v34 }
 0x22f   : > { %1910 = vst.msk [vmem:[#allocation4 + $0x90] sm:$0xff] %vm1891_vm10, %v1832_v16 }
 0x231   : > { %v1258_v51 = vpop.permute.xlu1 %1257 }
 0x232   : > { %v1834_v35 = vpop.permute.xlu0 %1833  ;;  %1333 = vst.msk [vmem:[#allocation4 + $0xa8] sm:$0xff] %vm1311_vm7, %v1258_v51 }
 0x233   : > { %1911 = vst.msk [vmem:[#allocation4 + $0x98] sm:$0xff] %vm1891_vm10, %v1834_v35 }
 0x235   : > { %v1452_v12 = vpop.permute.xlu1 %1451 }
 0x236   : > { %v1450_v13 = vpop.permute.xlu0 %1449  ;;  %v1942_v31 = vld [vmem:[#allocation4 + $0x90] sm:$0xff]  ;;  %1527 = vst.msk [vmem:[#allocation4 + $0xa8] sm:$0xff] %vm1505_vm8, %v1452_v12 }
 0x237   : > { %1526 = vst.msk [vmem:[#allocation4 + $0xa0] sm:$0xff] %vm1505_vm8, %v1450_v13  ;;  %5182 = vmatprep.mubr.msk.f32.mxu0 %vm1961_vm11, %v1942_v31 }
 0x239   : > { %v1645_v4 = vpop.permute.xlu1 %1644 }
 0x23a   : > { %v1643_v45 = vpop.permute.xlu0 %1642  ;;  %v1943_v2 = vld [vmem:[#allocation4 + $0x98] sm:$0xff]  ;;  %1720 = vst.msk [vmem:[#allocation4 + $0xa8] sm:$0xff] %vm1698_vm9, %v1645_v4 }
 0x23b   : > { %1719 = vst.msk [vmem:[#allocation4 + $0xa0] sm:$0xff] %vm1698_vm9, %v1643_v45  ;;  %5183 = vmatmul.mubr.msk.f32.gmra.mxu0 %vm1961_vm11, %v1943_v2 }
 0x23d   : > { %v1260_v22 = vpop.permute.xlu1 %1259 }
 0x23e   : > { %v1836_v17 = vpop.permute.xlu0 %1835  ;;  %1334 = vst.msk [vmem:[#allocation4 + $0xb0] sm:$0xff] %vm1311_vm7, %v1260_v22 }
 0x23f   : > { %1912 = vst.msk [vmem:[#allocation4 + $0xa0] sm:$0xff] %vm1891_vm10, %v1836_v17 }
 0x241   : > { %v1262_v11 = vpop.permute.xlu1 %1261 }
 0x242   : > { %v1838_v10 = vpop.permute.xlu0 %1837  ;;  %1335 = vst.msk [vmem:[#allocation4 + $0xb8] sm:$0xff] %vm1311_vm7, %v1262_v11 }
 0x243   : > { %1913 = vst.msk [vmem:[#allocation4 + $0xa8] sm:$0xff] %vm1891_vm10, %v1838_v10 }
 0x245   : > { %v1456_v0 = vpop.permute.xlu1 %1455 }
 0x246   : > { %v1454_v57 = vpop.permute.xlu0 %1453  ;;  %v1944_v60 = vld [vmem:[#allocation4 + $0xa0] sm:$0xff]  ;;  %1529 = vst.msk [vmem:[#allocation4 + $0xb8] sm:$0xff] %vm1505_vm8, %v1456_v0 }
 0x247   : > { %1528 = vst.msk [vmem:[#allocation4 + $0xb0] sm:$0xff] %vm1505_vm8, %v1454_v57  ;;  %5185 = vmatprep.mubr.msk.f32.mxu0 %vm1961_vm11, %v1944_v60 }
 0x249   : > { %v1649_v27 = vpop.permute.xlu1 %1648 }
 0x24a   : > { %v1647_v5 = vpop.permute.xlu0 %1646  ;;  %v1945_v25 = vld [vmem:[#allocation4 + $0xa8] sm:$0xff]  ;;  %1722 = vst.msk [vmem:[#allocation4 + $0xb8] sm:$0xff] %vm1698_vm9, %v1649_v27 }
 0x24b   : > { %1721 = vst.msk [vmem:[#allocation4 + $0xb0] sm:$0xff] %vm1698_vm9, %v1647_v5  ;;  %5186 = vmatmul.mubr.msk.f32.gmra.mxu0 %vm1961_vm11, %v1945_v25 }
 0x24d   : > { %v1264_v29 = vpop.permute.xlu1 %1263 }
 0x24e   : > { %v1840_v28 = vpop.permute.xlu0 %1839  ;;  %1336 = vst.msk [vmem:[#allocation4 + $0xc0] sm:$0xff] %vm1311_vm7, %v1264_v29 }
 0x24f   : > { %1914 = vst.msk [vmem:[#allocation4 + $0xb0] sm:$0xff] %vm1891_vm10, %v1840_v28 }
 0x251   : > { %v1266_v32 = vpop.permute.xlu1 %1265 }
 0x252   : > { %v1842_v30 = vpop.permute.xlu0 %1841  ;;  %1337 = vst.msk [vmem:[#allocation4 + $0xc8] sm:$0xff] %vm1311_vm7, %v1266_v32 }
 0x253   : > { %1915 = vst.msk [vmem:[#allocation4 + $0xb8] sm:$0xff] %vm1891_vm10, %v1842_v30 }
 0x255   : > { %v1460_v61 = vpop.permute.xlu1 %1459 }
 0x256   : > { %v1458_v43 = vpop.permute.xlu0 %1457  ;;  %v1946_v44 = vld [vmem:[#allocation4 + $0xb0] sm:$0xff]  ;;  %1531 = vst.msk [vmem:[#allocation4 + $0xc8] sm:$0xff] %vm1505_vm8, %v1460_v61 }
 0x257   : > { %1530 = vst.msk [vmem:[#allocation4 + $0xc0] sm:$0xff] %vm1505_vm8, %v1458_v43  ;;  %5188 = vmatprep.mubr.msk.f32.mxu0 %vm1961_vm11, %v1946_v44 }
 0x259   : > { %v1653_v38 = vpop.permute.xlu1 %1652 }
 0x25a   : > { %v1651_v33 = vpop.permute.xlu0 %1650  ;;  %v1947_v49 = vld [vmem:[#allocation4 + $0xb8] sm:$0xff]  ;;  %1724 = vst.msk [vmem:[#allocation4 + $0xc8] sm:$0xff] %vm1698_vm9, %v1653_v38 }
 0x25b   : > { %1723 = vst.msk [vmem:[#allocation4 + $0xc0] sm:$0xff] %vm1698_vm9, %v1651_v33  ;;  %5189 = vmatmul.mubr.msk.f32.gmra.mxu0 %vm1961_vm11, %v1947_v49 }
 0x25d   : > { %v1268_v50 = vpop.permute.xlu1 %1267 }
 0x25e   : > { %v1844_v41 = vpop.permute.xlu0 %1843  ;;  %1338 = vst.msk [vmem:[#allocation4 + $0xd0] sm:$0xff] %vm1311_vm7, %v1268_v50 }
 0x25f   : > { %1916 = vst.msk [vmem:[#allocation4 + $0xc0] sm:$0xff] %vm1891_vm10, %v1844_v41 }
 0x261   : > { %v1270_v54 = vpop.permute.xlu1 %1269 }
 0x262   : > { %v1846_v53 = vpop.permute.xlu0 %1845  ;;  %1339 = vst.msk [vmem:[#allocation4 + $0xd8] sm:$0xff] %vm1311_vm7, %v1270_v54 }
 0x263   : > { %1917 = vst.msk [vmem:[#allocation4 + $0xc8] sm:$0xff] %vm1891_vm10, %v1846_v53 }
 0x265   : > { %v1464_v39 = vpop.permute.xlu1 %1463 }
 0x266   : > { %v1462_v59 = vpop.permute.xlu0 %1461  ;;  %v1948_v62 = vld [vmem:[#allocation4 + $0xc0] sm:$0xff]  ;;  %1533 = vst.msk [vmem:[#allocation4 + $0xd8] sm:$0xff] %vm1505_vm8, %v1464_v39 }
 0x267   : > { %1532 = vst.msk [vmem:[#allocation4 + $0xd0] sm:$0xff] %vm1505_vm8, %v1462_v59  ;;  %5191 = vmatprep.mubr.msk.f32.mxu0 %vm1961_vm11, %v1948_v62 }
 0x269   : > { %v1657_v40 = vpop.permute.xlu1 %1656 }
 0x26a   : > { %v1655_v19 = vpop.permute.xlu0 %1654  ;;  %v1949_v46 = vld [vmem:[#allocation4 + $0xc8] sm:$0xff]  ;;  %1726 = vst.msk [vmem:[#allocation4 + $0xd8] sm:$0xff] %vm1698_vm9, %v1657_v40 }
 0x26b   : > { %1725 = vst.msk [vmem:[#allocation4 + $0xd0] sm:$0xff] %vm1698_vm9, %v1655_v19  ;;  %5192 = vmatmul.mubr.msk.f32.gmra.mxu0 %vm1961_vm11, %v1949_v46 }
 0x26d   : > { %v1272_v24 = vpop.permute.xlu1 %1271 }
 0x26e   : > { %v1848_v58 = vpop.permute.xlu0 %1847  ;;  %1340 = vst.msk [vmem:[#allocation4 + $0xe0] sm:$0xff] %vm1311_vm7, %v1272_v24 }
 0x26f   : > { %1918 = vst.msk [vmem:[#allocation4 + $0xd0] sm:$0xff] %vm1891_vm10, %v1848_v58 }
 0x270   : > { %v6414_v16 = vpop.f32.mrf.mxu0 }
 0x271   : > { %v1274_v37 = vpop.permute.xlu1 %1273  ;;  %v2357_v12 = vmul.f32 %v6414_v16, %v6414_v16  ;;  %v2288_v4 = vsel %vm204_vm0, %v6414_v16, 0.0 }
 0x272   : > { %v1850_v52 = vpop.permute.xlu0 %1849  ;;  %1341 = vst.msk [vmem:[#allocation4 + $0xe8] sm:$0xff] %vm1311_vm7, %v1274_v37  ;;  %v6416_v34 = vpop.f32.mrf.mxu0 }
 0x273   : > { %1919 = vst.msk [vmem:[#allocation4 + $0xd8] sm:$0xff] %vm1891_vm10, %v1850_v52  ;;  %v2356_v13 = vmul.f32 %v6416_v34, %v6416_v34  ;;  %v2287_v45 = vsel %vm204_vm0, %v6416_v34, 0.0  ;;  %v2389_v57 = vsel %vm204_vm0, %v2357_v12, 0.0 }
 0x274   : > { %v2289_v10 = vadd.f32 %v2288_v4, %v2287_v45 }
 0x275   : > { %v1468_v20 = vpop.permute.xlu1 %1467  ;;  %v2388_v17 = vsel %vm204_vm0, %v2356_v13, 0.0 }
 0x276   : > { %v1466_v42 = vpop.permute.xlu0 %1465  ;;  %v1950_v55 = vld [vmem:[#allocation4 + $0xd0] sm:$0xff]  ;;  %1535 = vst.msk [vmem:[#allocation4 + $0xe8] sm:$0xff] %vm1505_vm8, %v1468_v20  ;;  %v2390_v0 = vadd.f32 %v2389_v57, %v2388_v17 }
 0x277   : > { %1534 = vst.msk [vmem:[#allocation4 + $0xe0] sm:$0xff] %vm1505_vm8, %v1466_v42  ;;  %5194 = vmatprep.mubr.msk.f32.mxu0 %vm1961_vm11, %v1950_v55 }
 0x279   : > { %v1661_v7 = vpop.permute.xlu1 %1660 }
 0x27a   : > { %v1659_v23 = vpop.permute.xlu0 %1658  ;;  %v1951_v3 = vld [vmem:[#allocation4 + $0xd8] sm:$0xff]  ;;  %1728 = vst.msk [vmem:[#allocation4 + $0xe8] sm:$0xff] %vm1698_vm9, %v1661_v7 }
 0x27b   : > { %1727 = vst.msk [vmem:[#allocation4 + $0xe0] sm:$0xff] %vm1698_vm9, %v1659_v23  ;;  %5195 = vmatmul.mubr.msk.f32.gmra.mxu0 %vm1961_vm11, %v1951_v3 }
 0x27c   : > { %v6418_v35 = vpop.f32.mrf.mxu0 }
 0x27d   : > { %v1276_v18 = vpop.permute.xlu1 %1275  ;;  %v2359_v27 = vmul.f32 %v6418_v35, %v6418_v35  ;;  %v2292_v30 = vsel %vm204_vm0, %v6418_v35, 0.0 }
 0x27e   : > { %v1852_v14 = vpop.permute.xlu0 %1851  ;;  %1342 = vst.msk [vmem:[#allocation4 + $0xf0] sm:$0xff] %vm1311_vm7, %v1276_v18  ;;  %v6420_v51 = vpop.f32.mrf.mxu0 }
 0x27f   : > { %1920 = vst.msk [vmem:[#allocation4 + $0xe0] sm:$0xff] %vm1891_vm10, %v1852_v14  ;;  %v2358_v2 = vmul.f32 %v6420_v51, %v6420_v51  ;;  %v2290_v22 = vsel %vm204_vm0, %v6420_v51, 0.0  ;;  %v2393_v61 = vsel %vm204_vm0, %v2359_v27, 0.0 }
 0x280   : > { %v2291_v5 = vadd.f32 %v2290_v22, %v2289_v10 }
 0x281   : > { %v1278_v48 = vpop.permute.xlu1 %1277  ;;  %v2391_v60 = vsel %vm204_vm0, %v2358_v2, 0.0 }
 0x282   : > { %v1854_v15 = vpop.permute.xlu0 %1853  ;;  %1343 = vst.msk [vmem:[#allocation4 + $0xf8] sm:$0xff] %vm1311_vm7, %v1278_v48  ;;  %v2392_v29 = vadd.f32 %v2391_v60, %v2390_v0  ;;  %v2293_v43 = vadd.f32 %v2292_v30, %v2291_v5 }
 0x283   : > { %1921 = vst.msk [vmem:[#allocation4 + $0xe8] sm:$0xff] %vm1891_vm10, %v1854_v15 }
 0x284   : > { %v2394_v38 = vadd.f32 %v2393_v61, %v2392_v29 }
 0x285   : > { %v1472_v63 = vpop.permute.xlu1 %1471 }
 0x286   : > { %v1470_v36 = vpop.permute.xlu0 %1469  ;;  %v1952_v47 = vld [vmem:[#allocation4 + $0xe0] sm:$0xff]  ;;  %1537 = vst.msk [vmem:[#allocation4 + $0xf8] sm:$0xff] %vm1505_vm8, %v1472_v63 }
 0x287   : > { %1536 = vst.msk [vmem:[#allocation4 + $0xf0] sm:$0xff] %vm1505_vm8, %v1470_v36  ;;  %5197 = vmatprep.mubr.msk.f32.mxu0 %vm1961_vm11, %v1952_v47 }
 0x289   : > { %v1665_v8 = vpop.permute.xlu1 %1664 }
 0x28a   : > { %v1663_v56 = vpop.permute.xlu0 %1662  ;;  %v1953_v1 = vld [vmem:[#allocation4 + $0xe8] sm:$0xff]  ;;  %1730 = vst.msk [vmem:[#allocation4 + $0xf8] sm:$0xff] %vm1698_vm9, %v1665_v8 }
 0x28b   : > { %1729 = vst.msk [vmem:[#allocation4 + $0xf0] sm:$0xff] %vm1698_vm9, %v1663_v56  ;;  %5198 = vmatmul.mubr.msk.f32.gmra.mxu0 %vm1961_vm11, %v1953_v1  ;;  %v6424_v31 = vpop.f32.mrf.mxu0 }
 0x28c   : > { %v2361_v50 = vmul.f32 %v6424_v31, %v6424_v31  ;;  %v2296_v59 = vsel %vm204_vm0, %v6424_v31, 0.0 }
 0x28d   : > { %v1858_v9 = vpop.permute.xlu1 %1857  ;;  %v6437_v11 = vpop.f32.mrf.mxu0 }
 0x28e   : > { %v1856_v6 = vpop.permute.xlu0 %1855  ;;  %1923 = vst.msk [vmem:[#allocation4 + $0xf8] sm:$0xff] %vm1891_vm10, %v1858_v9  ;;  %v2360_v28 = vmul.f32 %v6437_v11, %v6437_v11  ;;  %v2294_v32 = vsel %vm204_vm0, %v6437_v11, 0.0  ;;  %v2397_v46 = vsel %vm204_vm0, %v2361_v50, 0.0 }
 0x28f   : > { %1922 = vst.msk [vmem:[#allocation4 + $0xf0] sm:$0xff] %vm1891_vm10, %v1856_v6  ;;  %v2295_v49 = vadd.f32 %v2294_v32, %v2293_v43 }
 0x290   : > { %v2395_v33 = vsel %vm204_vm0, %v2360_v28, 0.0 }
 0x291   : > { %v2396_v54 = vadd.f32 %v2395_v33, %v2394_v38  ;;  %v2297_v39 = vadd.f32 %v2296_v59, %v2295_v49 }
 0x293   : > { %v2398_v24 = vadd.f32 %v2397_v46, %v2396_v54 }
 0x295   : > { %v1955_v21 = vld [vmem:[#allocation4 + $0xf8] sm:$0xff] }
 0x296   : > { %v1954_v26 = vld [vmem:[#allocation4 + $0xf0] sm:$0xff] }
 0x297   : > { %5200 = vmatprep.mubr.msk.f32.mxu0 %vm1961_vm11, %v1954_v26 }
 0x298   : > { %5201 = vmatmul.mubr.msk.f32.gmra.mxu0 %vm1961_vm11, %v1955_v21 }
 0x29b   : > { %v6441_v25 = vpop.f32.mrf.mxu0 }
 0x29c   : > { %v2363_v37 = vmul.f32 %v6441_v25, %v6441_v25  ;;  %v2300_v20 = vsel %vm204_vm0, %v6441_v25, 0.0 }
 0x29d   : > { %v6451_v44 = vpop.f32.mrf.mxu0 }
 0x29e   : > { %v2362_v53 = vmul.f32 %v6451_v44, %v6451_v44  ;;  %v2298_v62 = vsel %vm204_vm0, %v6451_v44, 0.0  ;;  %v2401_v14 = vsel %vm204_vm0, %v2363_v37, 0.0 }
 0x29f   : > { %v2299_v58 = vadd.f32 %v2298_v62, %v2297_v39 }
 0x2a0   : > { %v2399_v40 = vsel %vm204_vm0, %v2362_v53, 0.0 }
 0x2a1   : > { %v2400_v55 = vadd.f32 %v2399_v40, %v2398_v24  ;;  %v2301_v3 = vadd.f32 %v2300_v20, %v2299_v58 }
 0x2a3   : > { %v2402_v48 = vadd.f32 %v2401_v14, %v2400_v55 }
 0x2ab   : > { %v6455_v41 = vpop.f32.mrf.mxu0 }
 0x2ac   : > { %v2365_v47 = vmul.f32 %v6455_v41, %v6455_v41  ;;  %v2304_v1 = vsel %vm204_vm0, %v6455_v41, 0.0 }
 0x2ad   : > { %v6465_v19 = vpop.f32.mrf.mxu0 }
 0x2ae   : > { %v2364_v42 = vmul.f32 %v6465_v19, %v6465_v19  ;;  %v2302_v23 = vsel %vm204_vm0, %v6465_v19, 0.0  ;;  %v2405_v26 = vsel %vm204_vm0, %v2365_v47, 0.0 }
 0x2af   : > { %v2303_v15 = vadd.f32 %v2302_v23, %v2301_v3 }
 0x2b0   : > { %v2403_v18 = vsel %vm204_vm0, %v2364_v42, 0.0 }
 0x2b1   : > { %v2404_v56 = vadd.f32 %v2403_v18, %v2402_v48  ;;  %v2305_v6 = vadd.f32 %v2304_v1, %v2303_v15 }
 0x2b3   : > { %v2406_v12 = vadd.f32 %v2405_v26, %v2404_v56 }
 0x2bb   : > { %v6469_v52 = vpop.f32.mrf.mxu0 }
 0x2bc   : > { %v2367_v2 = vmul.f32 %v6469_v52, %v6469_v52  ;;  %v2308_v22 = vsel %vm204_vm0, %v6469_v52, 0.0 }
 0x2bd   : > { %v6479_v7 = vpop.f32.mrf.mxu0 }
 0x2be   : > { %v2366_v63 = vmul.f32 %v6479_v7, %v6479_v7  ;;  %v2306_v8 = vsel %vm204_vm0, %v6479_v7, 0.0  ;;  %v2409_v0 = vsel %vm204_vm0, %v2367_v2, 0.0 }
 0x2bf   : > { %v2307_v13 = vadd.f32 %v2306_v8, %v2305_v6 }
 0x2c0   : > { %v2407_v21 = vsel %vm204_vm0, %v2366_v63, 0.0 }
 0x2c1   : > { %v2408_v17 = vadd.f32 %v2407_v21, %v2406_v12  ;;  %v2309_v57 = vadd.f32 %v2308_v22, %v2307_v13 }
 0x2c3   : > { %v2410_v28 = vadd.f32 %v2409_v0, %v2408_v17 }
 0x2cb   : > { %v6483_v36 = vpop.f32.mrf.mxu0 }
 0x2cc   : > { %v2369_v30 = vmul.f32 %v6483_v36, %v6483_v36  ;;  %v2312_v61 = vsel %vm204_vm0, %v6483_v36, 0.0 }
 0x2cd   : > { %v6493_v9 = vpop.f32.mrf.mxu0 }
 0x2ce   : > { %v2368_v4 = vmul.f32 %v6493_v9, %v6493_v9  ;;  %v2310_v10 = vsel %vm204_vm0, %v6493_v9, 0.0  ;;  %v2413_v50 = vsel %vm204_vm0, %v2369_v30, 0.0 }
 0x2cf   : > { %v2311_v27 = vadd.f32 %v2310_v10, %v2309_v57 }
 0x2d0   : > { %v2411_v5 = vsel %vm204_vm0, %v2368_v4, 0.0 }
 0x2d1   : > { %v2412_v43 = vadd.f32 %v2411_v5, %v2410_v28  ;;  %v2313_v49 = vadd.f32 %v2312_v61, %v2311_v27 }
 0x2d3   : > { %v2414_v59 = vadd.f32 %v2413_v50, %v2412_v43 }
 0x2db   : > { %v6497_v45 = vpop.f32.mrf.mxu0 }
 0x2dc   : > { %v2371_v39 = vmul.f32 %v6497_v45, %v6497_v45  ;;  %v2316_v58 = vsel %vm204_vm0, %v6497_v45, 0.0 }
 0x2dd   : > { %v6507_v60 = vpop.f32.mrf.mxu0 }
 0x2de   : > { %v2370_v32 = vmul.f32 %v6507_v60, %v6507_v60  ;;  %v2314_v33 = vsel %vm204_vm0, %v6507_v60, 0.0  ;;  %v2417_v55 = vsel %vm204_vm0, %v2371_v39, 0.0 }
 0x2df   : > { %v2315_v54 = vadd.f32 %v2314_v33, %v2313_v49 }
 0x2e0   : > { %v2415_v53 = vsel %vm204_vm0, %v2370_v32, 0.0 }
 0x2e1   : > { %v2416_v40 = vadd.f32 %v2415_v53, %v2414_v59  ;;  %v2317_v37 = vadd.f32 %v2316_v58, %v2315_v54 }
 0x2e3   : > { %v2418_v3 = vadd.f32 %v2417_v55, %v2416_v40 }
 0x2eb   : > { %v6511_v29 = vpop.f32.mrf.mxu0 }
 0x2ec   : > { %v2373_v18 = vmul.f32 %v6511_v29, %v6511_v29  ;;  %v2320_v47 = vsel %vm204_vm0, %v6511_v29, 0.0 }
 0x2ed   : > { %v6521_v38 = vpop.f32.mrf.mxu0 }
 0x2ee   : > { %v2372_v46 = vmul.f32 %v6521_v38, %v6521_v38  ;;  %v2318_v24 = vsel %vm204_vm0, %v6521_v38, 0.0  ;;  %v2421_v8 = vsel %vm204_vm0, %v2373_v18, 0.0 }
 0x2ef   : > { %v2319_v23 = vadd.f32 %v2318_v24, %v2317_v37 }
 0x2f0   : > { %v2419_v20 = vsel %vm204_vm0, %v2372_v46, 0.0 }
 0x2f1   : > { %v2420_v48 = vadd.f32 %v2419_v20, %v2418_v3  ;;  %v2321_v56 = vadd.f32 %v2320_v47, %v2319_v23 }
 0x2f3   : > { %v2422_v21 = vadd.f32 %v2421_v8, %v2420_v48 }
 0x2fb   : > { %v6525_v62 = vpop.f32.mrf.mxu0 }
 0x2fc   : > { %v2375_v12 = vmul.f32 %v6525_v62, %v6525_v62  ;;  %v2324_v17 = vsel %vm204_vm0, %v6525_v62, 0.0 }
 0x2fd   : > { %v6535_v42 = vpop.f32.mrf.mxu0 }
 0x2fe   : > { %v2374_v15 = vmul.f32 %v6535_v42, %v6535_v42  ;;  %v2322_v63 = vsel %vm204_vm0, %v6535_v42, 0.0  ;;  %v2425_v0 = vsel %vm204_vm0, %v2375_v12, 0.0 }
 0x2ff   : > { %v2323_v26 = vadd.f32 %v2322_v63, %v2321_v56 }
 0x300   : > { %v2423_v6 = vsel %vm204_vm0, %v2374_v15, 0.0 }
 0x301   : > { %v2424_v4 = vadd.f32 %v2423_v6, %v2422_v21  ;;  %v2325_v10 = vadd.f32 %v2324_v17, %v2323_v26 }
 0x303   : > { %v2426_v28 = vadd.f32 %v2425_v0, %v2424_v4 }
 0x30b   : > { %v6539_v14 = vpop.f32.mrf.mxu0 }
 0x30c   : > { %v2377_v32 = vmul.f32 %v6539_v14, %v6539_v14  ;;  %v2328_v33 = vsel %vm204_vm0, %v6539_v14, 0.0 }
 0x30d   : > { %v6549_v1 = vpop.f32.mrf.mxu0 }
 0x30e   : > { %v2376_v2 = vmul.f32 %v6549_v1, %v6549_v1  ;;  %v2326_v22 = vsel %vm204_vm0, %v6549_v1, 0.0  ;;  %v2429_v54 = vsel %vm204_vm0, %v2377_v32, 0.0 }
 0x30f   : > { %v2327_v27 = vadd.f32 %v2326_v22, %v2325_v10 }
 0x310   : > { %v2427_v5 = vsel %vm204_vm0, %v2376_v2, 0.0 }
 0x311   : > { %v2428_v61 = vadd.f32 %v2427_v5, %v2426_v28  ;;  %v2329_v50 = vadd.f32 %v2328_v33, %v2327_v27 }
 0x313   : > { %v2430_v46 = vadd.f32 %v2429_v54, %v2428_v61 }
 0x31b   : > { %v6553_v13 = vpop.f32.mrf.mxu0 }
 0x31c   : > { %v2379_v58 = vmul.f32 %v6553_v13, %v6553_v13  ;;  %v2332_v55 = vsel %vm204_vm0, %v6553_v13, 0.0 }
 0x31d   : > { %v6563_v57 = vpop.f32.mrf.mxu0 }
 0x31e   : > { %v2378_v43 = vmul.f32 %v6563_v57, %v6563_v57  ;;  %v2330_v49 = vsel %vm204_vm0, %v6563_v57, 0.0  ;;  %v2433_v18 = vsel %vm204_vm0, %v2379_v58, 0.0 }
 0x31f   : > { %v2331_v39 = vadd.f32 %v2330_v49, %v2329_v50 }
 0x320   : > { %v2431_v59 = vsel %vm204_vm0, %v2378_v43, 0.0 }
 0x321   : > { %v2432_v37 = vadd.f32 %v2431_v59, %v2430_v46  ;;  %v2333_v23 = vadd.f32 %v2332_v55, %v2331_v39 }
 0x323   : > { %v2434_v47 = vadd.f32 %v2433_v18, %v2432_v37 }
 0x32b   : > { %v6567_v30 = vpop.f32.mrf.mxu0 }
 0x32c   : > { %v2381_v63 = vmul.f32 %v6567_v30, %v6567_v30  ;;  %v2336_v26 = vsel %vm204_vm0, %v6567_v30, 0.0 }
 0x32d   : > { %v6577_v53 = vpop.f32.mrf.mxu0 }
 0x32e   : > { %v2380_v24 = vmul.f32 %v6577_v53, %v6577_v53  ;;  %v2334_v20 = vsel %vm204_vm0, %v6577_v53, 0.0  ;;  %v2437_v4 = vsel %vm204_vm0, %v2381_v63, 0.0 }
 0x32f   : > { %v2335_v48 = vadd.f32 %v2334_v20, %v2333_v23 }
 0x330   : > { %v2435_v15 = vsel %vm204_vm0, %v2380_v24, 0.0 }
 0x331   : > { %v2436_v6 = vadd.f32 %v2435_v15, %v2434_v47  ;;  %v2337_v12 = vadd.f32 %v2336_v26, %v2335_v48 }
 0x333   : > { %v2438_v10 = vadd.f32 %v2437_v4, %v2436_v6 }
 0x33b   : > { %v6581_v40 = vpop.f32.mrf.mxu0 }
 0x33c   : > { %v2383_v0 = vmul.f32 %v6581_v40, %v6581_v40  ;;  %v2340_v28 = vsel %vm204_vm0, %v6581_v40, 0.0 }
 0x33d   : > { %v6591_v3 = vpop.f32.mrf.mxu0 }
 0x33e   : > { %v2382_v56 = vmul.f32 %v6591_v3, %v6591_v3  ;;  %v2338_v21 = vsel %vm204_vm0, %v6591_v3, 0.0  ;;  %v2441_v61 = vsel %vm204_vm0, %v2383_v0, 0.0 }
 0x33f   : > { %v2339_v22 = vadd.f32 %v2338_v21, %v2337_v12 }
 0x340   : > { %v2439_v17 = vsel %vm204_vm0, %v2382_v56, 0.0 }
 0x341   : > { %v2440_v27 = vadd.f32 %v2439_v17, %v2438_v10  ;;  %v2341_v43 = vadd.f32 %v2340_v28, %v2339_v22 }
 0x343   : > { %v2442_v50 = vadd.f32 %v2441_v61, %v2440_v27 }
 0x34b   : > { %v6599_v8 = vpop.f32.mrf.mxu0 }
 0x34c   : > { %v2385_v54 = vmul.f32 %v6599_v8, %v6599_v8  ;;  %v2344_v46 = vsel %vm204_vm0, %v6599_v8, 0.0 }
 0x34d   : > { %v6605_v2 = vpop.f32.mrf.mxu0 }
 0x34e   : > { %v2384_v5 = vmul.f32 %v6605_v2, %v6605_v2  ;;  %v2342_v32 = vsel %vm204_vm0, %v6605_v2, 0.0  ;;  %v2445_v37 = vsel %vm204_vm0, %v2385_v54, 0.0 }
 0x34f   : > { %v2343_v49 = vadd.f32 %v2342_v32, %v2341_v43 }
 0x350   : > { %v2443_v33 = vsel %vm204_vm0, %v2384_v5, 0.0 }
 0x351   : > { %v2444_v59 = vadd.f32 %v2443_v33, %v2442_v50  ;;  %v2345_v24 = vadd.f32 %v2344_v46, %v2343_v49 }
 0x353   : > { %v2446_v15 = vadd.f32 %v2445_v37, %v2444_v59 }
 0x358   : > { %v6621_v39 = vpop.f32.mrf.mxu0 }
 0x359   : > { %v2387_v55 = vmul.f32 %v6621_v39, %v6621_v39  ;;  %v2348_v48 = vsel %vm204_vm0, %v6621_v39, 0.0 }
 0x35a   : > { %v6625_v58 = vpop.f32.mrf.mxu0 }
 0x35b   : > { %v2346_v20 = vsel %vm204_vm0, %v6625_v58, 0.0  ;;  %v2386_v23 = vmul.f32 %v6625_v58, %v6625_v58  ;;  %v2449_v6 = vsel %vm204_vm0, %v2387_v55, 0.0 }
 0x35c   : > { %v2347_v18 = vadd.f32 %v2346_v20, %v2345_v24 }
 0x35d   : > { %v2447_v47 = vsel %vm204_vm0, %v2386_v23, 0.0 }
 0x35e   : > { %v2349_v63 = vadd.f32 %v2348_v48, %v2347_v18  ;;  %v2448_v56 = vadd.f32 %v2447_v47, %v2446_v15 }
 0x360   : > { %v2350_v26 = vrot.slane %v2349_v63, 4  ;;  %v2450_v21 = vadd.f32 %v2449_v6, %v2448_v56 }
 0x362   : > { %v2351_v12 = vadd.f32 %v2350_v26, %v2349_v63  ;;  %v2451_v4 = vrot.slane %v2450_v21, 4 }
 0x364   : > { %v2352_v17 = vrot.slane %v2351_v12, 2  ;;  %v2452_v22 = vadd.f32 %v2451_v4, %v2450_v21 }
 0x366   : > { %v2353_v10 = vadd.f32 %v2352_v17, %v2351_v12  ;;  %v2453_v0 = vrot.slane %v2452_v22, 2 }
 0x368   : > { %v2354_v5 = vrot.slane %v2353_v10, 1  ;;  %v2454_v27 = vadd.f32 %v2453_v0, %v2452_v22 }
 0x36a   : > { %v2355_v28 = vadd.f32 %v2354_v5, %v2353_v10  ;;  %v2455_v32 = vrot.slane %v2454_v27, 1 }
 0x36c   : > { %v2456_v43 = vadd.f32 %v2455_v32, %v2454_v27  ;;  %v6638_v61 = vmul.f32 0.00390625, %v2355_v28 }
 0x36e   : > { %v2458_v33 = vmul.f32 0.00390625, %v2456_v43  ;;  %v2459_v49 = vmul.f32 %v6638_v61, %v6638_v61  ;;  %v2492_v46 = vsub.f32 %v6625_v58, %v6638_v61  ;;  %v2462_v24 = vsub.f32 %v6416_v34, %v6638_v61 }
 0x36f   : > { %v2463_v37 = vsub.f32 %v6414_v16, %v6638_v61  ;;  %v2464_v55 = vsub.f32 %v6420_v51, %v6638_v61  ;;  %v2465_v20 = vsub.f32 %v6418_v35, %v6638_v61  ;;  %v2466_v23 = vsub.f32 %v6437_v11, %v6638_v61 }
 0x370   : > { %v2460_v50 = vsub.f32 %v2458_v33, %v2459_v49  ;;  %v2467_v18 = vsub.f32 %v6424_v31, %v6638_v61  ;;  %v2468_v58 = vsub.f32 %v6451_v44, %v6638_v61  ;;  %v2469_v34 = vsub.f32 %v6441_v25, %v6638_v61 }
 0x371   : > { %v2470_v16 = vsub.f32 %v6465_v19, %v6638_v61  ;;  %v2471_v51 = vsub.f32 %v6455_v41, %v6638_v61  ;;  %v2472_v35 = vsub.f32 %v6479_v7, %v6638_v61  ;;  %v2473_v11 = vsub.f32 %v6469_v52, %v6638_v61 }
 0x372   : > { %v2461_v54 = vmax.f32 %v2460_v50, 0.0  ;;  %v2474_v31 = vsub.f32 %v6493_v9, %v6638_v61  ;;  %v2475_v44 = vsub.f32 %v6483_v36, %v6638_v61  ;;  %v2476_v25 = vsub.f32 %v6507_v60, %v6638_v61 }
 0x373   : > { %v2477_v19 = vsub.f32 %v6497_v45, %v6638_v61  ;;  %v2478_v41 = vsub.f32 %v6521_v38, %v6638_v61  ;;  %v2479_v7 = vsub.f32 %v6511_v29, %v6638_v61  ;;  %v2480_v52 = vsub.f32 %v6535_v42, %v6638_v61 }
 0x374   : > { %v2494_v59 = vadd.f32 1e-05, %v2461_v54  ;;  %v2481_v9 = vsub.f32 %v6525_v62, %v6638_v61  ;;  %v2482_v36 = vsub.f32 %v6549_v1, %v6638_v61  ;;  %v2483_v60 = vsub.f32 %v6539_v14, %v6638_v61 }
 0x375   : > { %v2484_v45 = vsub.f32 %v6563_v57, %v6638_v61  ;;  %v2485_v38 = vsub.f32 %v6553_v13, %v6638_v61  ;;  %v2486_v29 = vsub.f32 %v6577_v53, %v6638_v61  ;;  %v2487_v42 = vsub.f32 %v6567_v30, %v6638_v61 }
 0x376   : > { %5277 = vrsqrt.f32 %v2494_v59  ;;  %v2488_v62 = vsub.f32 %v6591_v3, %v6638_v61  ;;  %v2489_v1 = vsub.f32 %v6581_v40, %v6638_v61  ;;  %v2490_v14 = vsub.f32 %v6605_v2, %v6638_v61 }
 0x377   : > { %v2491_v57 = vsub.f32 %v6599_v8, %v6638_v61  ;;  %v2493_v13 = vsub.f32 %v6621_v39, %v6638_v61 }
 0x383   : > { %v5278_v15 = vpop.eup %5277 }
 0x384   : > { %v2526_v53 = vmul.f32 %v5278_v15, %v2492_v46  ;;  %v2499_v48 = vmul.f32 %v5278_v15, %v2465_v20  ;;  %v2496_v47 = vmul.f32 %v5278_v15, %v2462_v24  ;;  %v2497_v30 = vmul.f32 %v5278_v15, %v2463_v37 }
 0x385   : > { %v2498_v63 = vmul.f32 %v5278_v15, %v2464_v55  ;;  %v2500_v56 = vmul.f32 %v5278_v15, %v2466_v23  ;;  %v2501_v3 = vmul.f32 %v5278_v15, %v2467_v18  ;;  %v2502_v6 = vmul.f32 %v5278_v15, %v2468_v58 }
 0x386   : > { %v2558_v26 = vmax.f32 %v2526_v53, 0.0  ;;  %v2531_v21 = vmax.f32 %v2499_v48, 0.0  ;;  %v2503_v40 = vmul.f32 %v5278_v15, %v2469_v34  ;;  %v2504_v12 = vmul.f32 %v5278_v15, %v2470_v16 }
 0x387   : > { %v2505_v4 = vmul.f32 %v5278_v15, %v2471_v51  ;;  %v2506_v2 = vmul.f32 %v5278_v15, %v2472_v35  ;;  %v2507_v17 = vmul.f32 %v5278_v15, %v2473_v11  ;;  %v2508_v22 = vmul.f32 %v5278_v15, %v2474_v31 }
 0x388   : > { %2591 = vst.msk [vmem:[#allocation3 + $0x181] sm:$0xff] %vm204_vm0, %v2558_v26  ;;  %2594 = vst.msk [vmem:[#allocation3 + $0x9] sm:$0xff] %vm204_vm0, %v2531_v21  ;;  %v2509_v8 = vmul.f32 %v5278_v15, %v2475_v44  ;;  %v2510_v39 = vmul.f32 %v5278_v15, %v2476_v25  ;;  %v6708_v10 = vmul.f32 %v5278_v15, %v2477_v19  ;;  %v2530_v55 = vmax.f32 %v2498_v63, 0.0 }
 0x389   : > { %v6710_v0 = vmul.f32 %v5278_v15, %v2478_v41  ;;  %2564 = vst.msk [vmem:[#allocation3 + $0x39] sm:$0xff] %vm204_vm0, %v2531_v21  ;;  %v6713_v5 = vmul.f32 %v5278_v15, %v2479_v7  ;;  %v6715_v27 = vmul.f32 %v5278_v15, %v2480_v52  ;;  %v6717_v28 = vmul.f32 %v5278_v15, %v2481_v9 }
 0x38a   : > { %v6719_v32 = vmul.f32 %v5278_v15, %v2482_v36  ;;  %v6721_v43 = vmul.f32 %v5278_v15, %v2483_v60  ;;  %v6723_v61 = vmul.f32 %v5278_v15, %v2484_v45  ;;  %v6725_v33 = vmul.f32 %v5278_v15, %v2485_v38  ;;  %2593 = vst.msk [vmem:[#allocation3 + $0x1] sm:$0xff] %vm204_vm0, %v2530_v55 }
 0x38b   : > { %v6727_v49 = vmul.f32 %v5278_v15, %v2486_v29  ;;  %v6729_v50 = vmul.f32 %v5278_v15, %v2487_v42  ;;  %v6731_v54 = vmul.f32 %v5278_v15, %v2488_v62  ;;  %v6733_v59 = vmul.f32 %v5278_v15, %v2489_v1  ;;  %2563 = vst.msk [vmem:[#allocation3 + $0x31] sm:$0xff] %vm204_vm0, %v2530_v55 }
 0x38c   : > { %v6735_v46 = vmul.f32 %v5278_v15, %v2490_v14  ;;  %v6737_v24 = vmul.f32 %v5278_v15, %v2491_v57  ;;  %v6739_v37 = vmul.f32 %v5278_v15, %v2493_v13  ;;  %v2528_v20 = vmax.f32 %v2496_v47, 0.0 }
 0x38d   : > { %v2529_v23 = vmax.f32 %v2497_v30, 0.0  ;;  %v2532_v18 = vmax.f32 %v2500_v56, 0.0  ;;  %v2533_v58 = vmax.f32 %v2501_v3, 0.0  ;;  %v2534_v34 = vmax.f32 %v2502_v6, 0.0 }
 0x38e   : > { %v2535_v16 = vmax.f32 %v2503_v40, 0.0  ;;  %v2536_v51 = vmax.f32 %v2504_v12, 0.0  ;;  %v2537_v35 = vmax.f32 %v2505_v4, 0.0  ;;  %v2538_v11 = vmax.f32 %v2506_v2, 0.0  ;;  %2561 = vst.msk [vmem:[#allocation3 + $0x19] sm:$0xff] %vm204_vm0, %v2528_v20 }
 0x38f   : > { %v2735_v31 = vld [vmem:[#allocation3 + $0x9] sm:$0xff]  ;;  %v2539_v44 = vmax.f32 %v2507_v17, 0.0  ;;  %v2540_v25 = vmax.f32 %v2508_v22, 0.0  ;;  %v2541_v19 = vmax.f32 %v2509_v8, 0.0  ;;  %v2542_v41 = vmax.f32 %v2510_v39, 0.0  ;;  %2562 = vst.msk [vmem:[#allocation3 + $0x21] sm:$0xff] %vm204_vm0, %v2529_v23 }
 0x390   : > { %2565 = vst.msk [vmem:[#allocation3 + $0x49] sm:$0xff] %vm204_vm0, %v2532_v18  ;;  %2566 = vst.msk [vmem:[#allocation3 + $0x51] sm:$0xff] %vm204_vm0, %v2533_v58  ;;  %2800 = vrot.lane.b32.xlu1 %v2735_v31, %s5289_s18  ;;  %v2543_v7 = vmax.f32 %v6708_v10, 0.0  ;;  %v2544_v52 = vmax.f32 %v6710_v0, 0.0  ;;  %v2545_v9 = vmax.f32 %v6713_v5, 0.0  ;;  %v2546_v36 = vmax.f32 %v6715_v27, 0.0 }
 0x391   : > { %2567 = vst.msk [vmem:[#allocation3 + $0x61] sm:$0xff] %vm204_vm0, %v2534_v34  ;;  %2568 = vst.msk [vmem:[#allocation3 + $0x69] sm:$0xff] %vm204_vm0, %v2535_v16  ;;  %v2634_v60 = vld [vmem:[#allocation3 + $0xf] sm:$0x1]  ;;  %v2547_v45 = vmax.f32 %v6717_v28, 0.0  ;;  %v2548_v38 = vmax.f32 %v6719_v32, 0.0 }
 0x392   : > { %2569 = vst.msk [vmem:[#allocation3 + $0x79] sm:$0xff] %vm204_vm0, %v2536_v51  ;;  %2570 = vst.msk [vmem:[#allocation3 + $0x81] sm:$0xff] %vm204_vm0, %v2537_v35  ;;  %v2549_v29 = vmax.f32 %v6721_v43, 0.0  ;;  %v2550_v42 = vmax.f32 %v6723_v61, 0.0  ;;  %v2636_v62 = vld [vmem:[#allocation3 + $0x3f] sm:$0x1] }
 0x393   : > { %2571 = vst.msk [vmem:[#allocation3 + $0x91] sm:$0xff] %vm204_vm0, %v2538_v11  ;;  %2572 = vst.msk [vmem:[#allocation3 + $0x99] sm:$0xff] %vm204_vm0, %v2539_v44  ;;  %v2551_v15 = vmax.f32 %v6725_v33, 0.0  ;;  %v2552_v1 = vmax.f32 %v6727_v49, 0.0  ;;  %v2553_v14 = vmax.f32 %v6729_v50, 0.0  ;;  %v2554_v57 = vmax.f32 %v6731_v54, 0.0 }
 0x394   : > { %2573 = vst.msk [vmem:[#allocation3 + $0xa9] sm:$0xff] %vm204_vm0, %v2540_v25  ;;  %2574 = vst.msk [vmem:[#allocation3 + $0xb1] sm:$0xff] %vm204_vm0, %v2541_v19  ;;  %v2614_v13 = vld [vmem:[#allocation3 + $0x182] sm:$0x1]  ;;  %v2555_v53 = vmax.f32 %v6733_v59, 0.0  ;;  %v2556_v48 = vmax.f32 %v6735_v46, 0.0 }
 0x395   : > { %2575 = vst.msk [vmem:[#allocation3 + $0xc1] sm:$0xff] %vm204_vm0, %v2542_v41  ;;  %2576 = vst.msk [vmem:[#allocation3 + $0xc9] sm:$0xff] %vm204_vm0, %v2543_v7  ;;  %v2557_v47 = vmax.f32 %v6737_v24, 0.0  ;;  %v2559_v30 = vmax.f32 %v6739_v37, 0.0  ;;  %v2734_v63 = vld [vmem:[#allocation3 + $0x1] sm:$0xff]  ;;  %v6805_v22 = vld [vmem:[#allocation3 + $0x19] sm:$0xff] }
 0x396   : > { %2652 = vst.msk [vmem:[#allocation3 + $0x11] sm:$0x1] %vm260_vm1, %v2634_v60  ;;  %2654 = vst.msk [vmem:[#allocation3 + $0x41] sm:$0x1] %vm260_vm1, %v2636_v62  ;;  %v2598_v56 = vld [vmem:[#allocation3 + $0x2] sm:$0x1]  ;;  %2798 = vrot.lane.b32.xlu0 %v2734_v63, %s5289_s18 }
 0x397   : > { %2577 = vst.msk [vmem:[#allocation3 + $0xd9] sm:$0xff] %vm204_vm0, %v2544_v52  ;;  %2578 = vst.msk [vmem:[#allocation3 + $0xe1] sm:$0xff] %vm204_vm0, %v2545_v9  ;;  %v2600_v3 = vld [vmem:[#allocation3 + $0x32] sm:$0x1]  ;;  %v6795_v6 = vld [vmem:[#allocation3 + $0x21] sm:$0xff] }
 0x398   : > { %2579 = vst.msk [vmem:[#allocation3 + $0xf1] sm:$0xff] %vm204_vm0, %v2546_v36  ;;  %2580 = vst.msk [vmem:[#allocation3 + $0xf9] sm:$0xff] %vm204_vm0, %v2547_v45  ;;  %v2599_v26 = vld [vmem:[#allocation3 + $0x1a] sm:$0x1]  ;;  %2804 = vrot.lane.b32.xlu1 %v6795_v6, %s5289_s18  ;;  %v2601_v21 = vld [vmem:[#allocation3 + $0x4a] sm:$0x1] }
 0x399   : > { %2581 = vst.msk [vmem:[#allocation3 + $0x109] sm:$0xff] %vm204_vm0, %v2548_v38  ;;  %2582 = vst.msk [vmem:[#allocation3 + $0x111] sm:$0xff] %vm204_vm0, %v2549_v29  ;;  %v2602_v40 = vld [vmem:[#allocation3 + $0x62] sm:$0x1]  ;;  %v2603_v12 = vld [vmem:[#allocation3 + $0x7a] sm:$0x1] }
 0x39a   : > { %2583 = vst.msk [vmem:[#allocation3 + $0x121] sm:$0xff] %vm204_vm0, %v2550_v42  ;;  %2584 = vst.msk [vmem:[#allocation3 + $0x129] sm:$0xff] %vm204_vm0, %v2551_v15  ;;  %v2604_v4 = vld [vmem:[#allocation3 + $0x92] sm:$0x1]  ;;  %2802 = vrot.lane.b32.xlu0 %v6805_v22, %s5289_s18  ;;  %v6812_v5 = vld [vmem:[#allocation3 + $0x39] sm:$0xff] }
 0x39b   : > { %2632 = vst.msk [vmem:[#allocation3 + $0x180] sm:$0x1] %vm260_vm1, %v2614_v13  ;;  %2616 = vst.msk [vmem:[#allocation3] sm:$0x1] %vm260_vm1, %v2598_v56  ;;  %v2605_v2 = vld [vmem:[#allocation3 + $0xaa] sm:$0x1] }
 0x39c   : > { %2585 = vst.msk [vmem:[#allocation3 + $0x139] sm:$0xff] %vm204_vm0, %v2552_v1  ;;  %2586 = vst.msk [vmem:[#allocation3 + $0x141] sm:$0xff] %vm204_vm0, %v2553_v14  ;;  %v2606_v17 = vld [vmem:[#allocation3 + $0xc2] sm:$0x1]  ;;  %2808 = vrot.lane.b32.xlu1 %v6812_v5, %s5289_s18  ;;  %v6823_v43 = vld [vmem:[#allocation3 + $0x31] sm:$0xff] }
 0x39d   : > { %2587 = vst.msk [vmem:[#allocation3 + $0x151] sm:$0xff] %vm204_vm0, %v2554_v57  ;;  %2588 = vst.msk [vmem:[#allocation3 + $0x159] sm:$0xff] %vm204_vm0, %v2555_v53  ;;  %v6827_v61 = vld [vmem:[#allocation3 + $0x51] sm:$0xff]  ;;  %v6831_v33 = vld [vmem:[#allocation3 + $0x49] sm:$0xff] }
 0x39e   : > { %2589 = vst.msk [vmem:[#allocation3 + $0x169] sm:$0xff] %vm204_vm0, %v2556_v48  ;;  %2590 = vst.msk [vmem:[#allocation3 + $0x171] sm:$0xff] %vm204_vm0, %v2557_v47  ;;  %v2607_v8 = vld [vmem:[#allocation3 + $0xda] sm:$0x1]  ;;  %2806 = vrot.lane.b32.xlu0 %v6823_v43, %s5289_s18  ;;  %v6835_v49 = vld [vmem:[#allocation3 + $0x69] sm:$0xff] }
 0x39f   : > { %2592 = vst.msk [vmem:[#allocation3 + $0x189] sm:$0xff] %vm204_vm0, %v2559_v30  ;;  %2596 = vst.msk [vmem:[#allocation3 + $0x199] sm:$0xff] %vm204_vm0, %v2556_v48  ;;  %v2608_v39 = vld [vmem:[#allocation3 + $0xf2] sm:$0x1]  ;;  %v6839_v50 = vld [vmem:[#allocation3 + $0x61] sm:$0xff] }
 0x3a0   : > { %2597 = vst.msk [vmem:[#allocation3 + $0x1a1] sm:$0xff] %vm204_vm0, %v2557_v47  ;;  %v2609_v10 = vld [vmem:[#allocation3 + $0x10a] sm:$0x1]  ;;  %2812 = vrot.lane.b32.xlu1 %v6827_v61, %s5289_s18  ;;  %v2635_v54 = vld [vmem:[#allocation3 + $0x27] sm:$0x1]  ;;  %v6851_v20 = vld [vmem:[#allocation3 + $0x79] sm:$0xff] }
 0x3a1   : > { %2618 = vst.msk [vmem:[#allocation3 + $0x30] sm:$0x1] %vm260_vm1, %v2600_v3  ;;  %2617 = vst.msk [vmem:[#allocation3 + $0x18] sm:$0x1] %vm260_vm1, %v2599_v26  ;;  %v2610_v0 = vld [vmem:[#allocation3 + $0x122] sm:$0x1] }
 0x3a2   : > { %2619 = vst.msk [vmem:[#allocation3 + $0x48] sm:$0x1] %vm260_vm1, %v2601_v21  ;;  %2620 = vst.msk [vmem:[#allocation3 + $0x60] sm:$0x1] %vm260_vm1, %v2602_v40  ;;  %2810 = vrot.lane.b32.xlu0 %v6831_v33, %s5289_s18  ;;  %v6843_v59 = vld [vmem:[#allocation3 + $0x81] sm:$0xff]  ;;  %v6856_v58 = vld [vmem:[#allocation3 + $0x99] sm:$0xff] }
 0x3a3   : > { %2621 = vst.msk [vmem:[#allocation3 + $0x78] sm:$0x1] %vm260_vm1, %v2603_v12  ;;  %2622 = vst.msk [vmem:[#allocation3 + $0x90] sm:$0x1] %vm260_vm1, %v2604_v4  ;;  %v2611_v27 = vld [vmem:[#allocation3 + $0x13a] sm:$0x1] }
 0x3a4   : > { %2623 = vst.msk [vmem:[#allocation3 + $0xa8] sm:$0x1] %vm260_vm1, %v2605_v2  ;;  %2624 = vst.msk [vmem:[#allocation3 + $0xc0] sm:$0x1] %vm260_vm1, %v2606_v17  ;;  %v2612_v28 = vld [vmem:[#allocation3 + $0x152] sm:$0x1]  ;;  %2816 = vrot.lane.b32.xlu1 %v6835_v49, %s5289_s18 }
 0x3a5   : > { %2625 = vst.msk [vmem:[#allocation3 + $0xd8] sm:$0x1] %vm260_vm1, %v2607_v8  ;;  %2626 = vst.msk [vmem:[#allocation3 + $0xf0] sm:$0x1] %vm260_vm1, %v2608_v39  ;;  %v2613_v32 = vld [vmem:[#allocation3 + $0x16a] sm:$0x1] }
 0x3a6   : > { %2627 = vst.msk [vmem:[#allocation3 + $0x108] sm:$0x1] %vm260_vm1, %v2609_v10  ;;  %2628 = vst.msk [vmem:[#allocation3 + $0x120] sm:$0x1] %vm260_vm1, %v2610_v0  ;;  %2814 = vrot.lane.b32.xlu0 %v6839_v50, %s5289_s18  ;;  %v2637_v46 = vld [vmem:[#allocation3 + $0x57] sm:$0x1] }
 0x3a7   : > { %2629 = vst.msk [vmem:[#allocation3 + $0x138] sm:$0x1] %vm260_vm1, %v2611_v27  ;;  %2630 = vst.msk [vmem:[#allocation3 + $0x150] sm:$0x1] %vm260_vm1, %v2612_v28  ;;  %v2638_v24 = vld [vmem:[#allocation3 + $0x6f] sm:$0x1] }
 0x3a8   : > { %2631 = vst.msk [vmem:[#allocation3 + $0x168] sm:$0x1] %vm260_vm1, %v2613_v32  ;;  %2653 = vst.msk [vmem:[#allocation3 + $0x29] sm:$0x1] %vm260_vm1, %v2635_v54  ;;  %2820 = vrot.lane.b32.xlu1 %v6843_v59, %s5289_s18  ;;  %v2639_v37 = vld [vmem:[#allocation3 + $0x87] sm:$0x1] }
 0x3a9   : > { %2655 = vst.msk [vmem:[#allocation3 + $0x59] sm:$0x1] %vm260_vm1, %v2637_v46  ;;  %2656 = vst.msk [vmem:[#allocation3 + $0x71] sm:$0x1] %vm260_vm1, %v2638_v24  ;;  %v2640_v55 = vld [vmem:[#allocation3 + $0x9f] sm:$0x1] }
 0x3aa   : > { %2657 = vst.msk [vmem:[#allocation3 + $0x89] sm:$0x1] %vm260_vm1, %v2639_v37  ;;  %2658 = vst.msk [vmem:[#allocation3 + $0xa1] sm:$0x1] %vm260_vm1, %v2640_v55  ;;  %v2641_v23 = vld [vmem:[#allocation3 + $0xb7] sm:$0x1]  ;;  %2818 = vrot.lane.b32.xlu0 %v6851_v20, %s5289_s18 }
 0x3ab   : > { %v2642_v18 = vld [vmem:[#allocation3 + $0xcf] sm:$0x1]  ;;  %2659 = vst.msk [vmem:[#allocation3 + $0xb9] sm:$0x1] %vm260_vm1, %v2641_v23  ;;  %v2643_v34 = vld [vmem:[#allocation3 + $0xe7] sm:$0x1] }
 0x3ac   : > { %2660 = vst.msk [vmem:[#allocation3 + $0xd1] sm:$0x1] %vm260_vm1, %v2642_v18  ;;  %2824 = vrot.lane.b32.xlu1 %v6856_v58, %s5289_s18  ;;  %2661 = vst.msk [vmem:[#allocation3 + $0xe9] sm:$0x1] %vm260_vm1, %v2643_v34  ;;  %v2644_v16 = vld [vmem:[#allocation3 + $0xff] sm:$0x1] }
 0x3ad   : > { %v2645_v51 = vld [vmem:[#allocation3 + $0x117] sm:$0x1]  ;;  %2662 = vst.msk [vmem:[#allocation3 + $0x101] sm:$0x1] %vm260_vm1, %v2644_v16  ;;  %v2646_v35 = vld [vmem:[#allocation3 + $0x12f] sm:$0x1] }
 0x3ae   : > { %2663 = vst.msk [vmem:[#allocation3 + $0x119] sm:$0x1] %vm260_vm1, %v2645_v51  ;;  %v6865_v11 = vld [vmem:[#allocation3 + $0x91] sm:$0xff]  ;;  %2664 = vst.msk [vmem:[#allocation3 + $0x131] sm:$0x1] %vm260_vm1, %v2646_v35  ;;  %v2671_v31 = vld [vmem:[#allocation3 + $0x8] sm:$0xff] }
 0x3af   : > { %v2670_v44 = vld [vmem:[#allocation3] sm:$0xff]  ;;  %2822 = vrot.lane.b32.xlu0 %v6865_v11, %s5289_s18  ;;  %v6870_v25 = vld [vmem:[#allocation3 + $0xb1] sm:$0xff]  ;;  %2703 = vst.msk [vmem:[#allocation4 + $0x8] sm:$0xff] %vm204_vm0, %v2671_v31  ;;  %v2648_v52 = vld [vmem:[#allocation3 + $0x15f] sm:$0x1] }
 0x3b0   : > { %2702 = vst.msk [vmem:[#allocation4] sm:$0xff] %vm204_vm0, %v2670_v44  ;;  %v2647_v19 = vld [vmem:[#allocation3 + $0x147] sm:$0x1]  ;;  %2828 = vrot.lane.b32.xlu1 %v6870_v25, %s5289_s18  ;;  %v6881_v7 = vld [vmem:[#allocation3 + $0x18] sm:$0xff]  ;;  %v6883_v9 = vld [vmem:[#allocation3 + $0xa9] sm:$0xff] }
 0x3b1   : > { %2665 = vst.msk [vmem:[#allocation3 + $0x149] sm:$0x1] %vm260_vm1, %v2647_v19  ;;  %v6877_v41 = vld [vmem:[#allocation3 + $0x20] sm:$0xff]  ;;  %2666 = vst.msk [vmem:[#allocation3 + $0x161] sm:$0x1] %vm260_vm1, %v2648_v52  ;;  %v2751_v36 = vld [vmem:[#allocation3 + $0xc9] sm:$0xff] }
 0x3b2   : > { %2705 = vst.msk [vmem:[#allocation4 + $0x18] sm:$0xff] %vm204_vm0, %v6877_v41  ;;  %2704 = vst.msk [vmem:[#allocation4 + $0x10] sm:$0xff] %vm204_vm0, %v6881_v7  ;;  %v6890_v60 = vld [vmem:[#allocation3 + $0x38] sm:$0xff]  ;;  %v6892_v45 = vld [vmem:[#allocation3 + $0x30] sm:$0xff] }
 0x3b3   : > { %2826 = vrot.lane.b32.xlu0 %v6883_v9, %s5289_s18  ;;  %2707 = vst.msk [vmem:[#allocation4 + $0x28] sm:$0xff] %vm204_vm0, %v6890_v60  ;;  %2706 = vst.msk [vmem:[#allocation4 + $0x20] sm:$0xff] %vm204_vm0, %v6892_v45  ;;  %v2649_v38 = vld [vmem:[#allocation3 + $0x177] sm:$0x1]  ;;  %v2750_v29 = vld [vmem:[#allocation3 + $0xc1] sm:$0xff] }
 0x3b4   : > { %2832 = vrot.lane.b32.xlu1 %v2751_v36, %s5289_s18  ;;  %2667 = vst.msk [vmem:[#allocation3 + $0x179] sm:$0x1] %vm260_vm1, %v2649_v38  ;;  %v6900_v42 = vld [vmem:[#allocation3 + $0x50] sm:$0xff]  ;;  %v6904_v62 = vld [vmem:[#allocation3 + $0x48] sm:$0xff]  ;;  %v6908_v1 = vld [vmem:[#allocation3 + $0x60] sm:$0xff] }
 0x3b5   : > { %2709 = vst.msk [vmem:[#allocation4 + $0x38] sm:$0xff] %vm204_vm0, %v6900_v42  ;;  %v6906_v15 = vld [vmem:[#allocation3 + $0x68] sm:$0xff]  ;;  %2708 = vst.msk [vmem:[#allocation4 + $0x30] sm:$0xff] %vm204_vm0, %v6904_v62  ;;  %v6917_v57 = vld [vmem:[#allocation3 + $0x80] sm:$0xff] }
 0x3b6   : > { %v2753_v14 = vld [vmem:[#allocation3 + $0xe1] sm:$0xff]  ;;  %2711 = vst.msk [vmem:[#allocation4 + $0x48] sm:$0xff] %vm204_vm0, %v6906_v15  ;;  %2710 = vst.msk [vmem:[#allocation4 + $0x40] sm:$0xff] %vm204_vm0, %v6908_v1  ;;  %v6919_v13 = vld [vmem:[#allocation3 + $0x78] sm:$0xff] }
 0x3b7   : > { %2830 = vrot.lane.b32.xlu0 %v2750_v29, %s5289_s18  ;;  %v2752_v53 = vld [vmem:[#allocation3 + $0xd9] sm:$0xff]  ;;  %2713 = vst.msk [vmem:[#allocation4 + $0x58] sm:$0xff] %vm204_vm0, %v6917_v57  ;;  %2712 = vst.msk [vmem:[#allocation4 + $0x50] sm:$0xff] %vm204_vm0, %v6919_v13  ;;  %v6928_v47 = vld [vmem:[#allocation3 + $0x90] sm:$0xff] }
 0x3b8   : > { %2836 = vrot.lane.b32.xlu1 %v2753_v14, %s5289_s18  ;;  %v6926_v48 = vld [vmem:[#allocation3 + $0x98] sm:$0xff]  ;;  %v6930_v30 = vld [vmem:[#allocation3 + $0xb0] sm:$0xff]  ;;  %2714 = vst.msk [vmem:[#allocation4 + $0x60] sm:$0xff] %vm204_vm0, %v6928_v47  ;;  %v6938_v56 = vld [vmem:[#allocation3 + $0xa8] sm:$0xff] }
 0x3b9   : > { %v2755_v63 = vld [vmem:[#allocation3 + $0xf9] sm:$0xff]  ;;  %2715 = vst.msk [vmem:[#allocation4 + $0x68] sm:$0xff] %vm204_vm0, %v6926_v48  ;;  %2717 = vst.msk [vmem:[#allocation4 + $0x78] sm:$0xff] %vm204_vm0, %v6930_v30  ;;  %v6940_v3 = vld [vmem:[#allocation3 + $0xc8] sm:$0xff] }
 0x3ba   : > { %2716 = vst.msk [vmem:[#allocation4 + $0x70] sm:$0xff] %vm204_vm0, %v6938_v56  ;;  %2719 = vst.msk [vmem:[#allocation4 + $0x88] sm:$0xff] %vm204_vm0, %v6940_v3  ;;  %v6946_v26 = vld [vmem:[#allocation3 + $0xc0] sm:$0xff]  ;;  %v6950_v40 = vld [vmem:[#allocation3 + $0xd8] sm:$0xff] }
 0x3bb   : > { %v6948_v21 = vld [vmem:[#allocation3 + $0xe0] sm:$0xff]  ;;  %2834 = vrot.lane.b32.xlu0 %v2752_v53, %s5289_s18  ;;  %2718 = vst.msk [vmem:[#allocation4 + $0x80] sm:$0xff] %vm204_vm0, %v6946_v26  ;;  %2720 = vst.msk [vmem:[#allocation4 + $0x90] sm:$0xff] %vm204_vm0, %v6950_v40  ;;  %v6959_v12 = vld [vmem:[#allocation3 + $0xf8] sm:$0xff] }
 0x3bc   : > { %2721 = vst.msk [vmem:[#allocation4 + $0x98] sm:$0xff] %vm204_vm0, %v6948_v21  ;;  %v6961_v4 = vld [vmem:[#allocation3 + $0xf0] sm:$0xff]  ;;  %2840 = vrot.lane.b32.xlu1 %v2755_v63, %s5289_s18  ;;  %2723 = vst.msk [vmem:[#allocation4 + $0xa8] sm:$0xff] %vm204_vm0, %v6959_v12  ;;  %v6972_v8 = vld [vmem:[#allocation3 + $0x108] sm:$0xff] }
 0x3bd   : > { %v6963_v2 = vld [vmem:[#allocation3 + $0x110] sm:$0xff]  ;;  %2722 = vst.msk [vmem:[#allocation4 + $0xa0] sm:$0xff] %vm204_vm0, %v6961_v4  ;;  %v6974_v39 = vld [vmem:[#allocation3 + $0x128] sm:$0xff]  ;;  %2724 = vst.msk [vmem:[#allocation4 + $0xb0] sm:$0xff] %vm204_vm0, %v6972_v8 }
 0x3be   : > { %v2754_v17 = vld [vmem:[#allocation3 + $0xf1] sm:$0xff]  ;;  %2725 = vst.msk [vmem:[#allocation4 + $0xb8] sm:$0xff] %vm204_vm0, %v6963_v2  ;;  %2727 = vst.msk [vmem:[#allocation4 + $0xc8] sm:$0xff] %vm204_vm0, %v6974_v39  ;;  %v6980_v10 = vld [vmem:[#allocation3 + $0x120] sm:$0xff] }
 0x3bf   : > { %v2697_v0 = vld [vmem:[#allocation3 + $0x140] sm:$0xff]  ;;  %v2696_v27 = vld [vmem:[#allocation3 + $0x138] sm:$0xff]  ;;  %2726 = vst.msk [vmem:[#allocation4 + $0xc0] sm:$0xff] %vm204_vm0, %v6980_v10  ;;  %v2698_v32 = vld [vmem:[#allocation3 + $0x150] sm:$0xff]  ;;  %2838 = vrot.lane.b32.xlu0 %v2754_v17, %s5289_s18 }
 0x3c0   : > { %2729 = vst.msk [vmem:[#allocation4 + $0xd8] sm:$0xff] %vm204_vm0, %v2697_v0  ;;  %2728 = vst.msk [vmem:[#allocation4 + $0xd0] sm:$0xff] %vm204_vm0, %v2696_v27  ;;  %v2699_v28 = vld [vmem:[#allocation3 + $0x158] sm:$0xff]  ;;  %v2701_v54 = vld [vmem:[#allocation3 + $0x170] sm:$0xff] }
 0x3c1   : > { %v2757_v46 = vld [vmem:[#allocation3 + $0x111] sm:$0xff]  ;;  %2731 = vst.msk [vmem:[#allocation4 + $0xe8] sm:$0xff] %vm204_vm0, %v2699_v28  ;;  %2730 = vst.msk [vmem:[#allocation4 + $0xe0] sm:$0xff] %vm204_vm0, %v2698_v32  ;;  %v2700_v24 = vld [vmem:[#allocation3 + $0x168] sm:$0xff] }
 0x3c2   : > { %2733 = vst.msk [vmem:[#allocation4 + $0xf8] sm:$0xff] %vm204_vm0, %v2701_v54  ;;  %2844 = vrot.lane.b32.xlu1 %v2757_v46, %s5289_s18  ;;  %2732 = vst.msk [vmem:[#allocation4 + $0xf0] sm:$0xff] %vm204_vm0, %v2700_v24  ;;  %v2756_v37 = vld [vmem:[#allocation3 + $0x109] sm:$0xff]  ;;  %v2758_v23 = vld [vmem:[#allocation3 + $0x121] sm:$0xff] }
 0x3c3   : > { %2842 = vrot.lane.b32.xlu0 %v2756_v37, %s5289_s18  ;;  %v2759_v55 = vld [vmem:[#allocation3 + $0x129] sm:$0xff]  ;;  %v2761_v18 = vld [vmem:[#allocation3 + $0x141] sm:$0xff]  ;;  %v2760_v34 = vld [vmem:[#allocation3 + $0x139] sm:$0xff] }
 0x3c4   : > { %v2763_v16 = vld [vmem:[#allocation3 + $0x159] sm:$0xff]  ;;  %v2650_v51 = vld [vmem:[#allocation3 + $0x18f] sm:$0x1]  ;;  %v2762_v31 = vld [vmem:[#allocation3 + $0x151] sm:$0xff] }
 0x3c5   : > { %2668 = vst.msk [vmem:[#allocation3 + $0x191] sm:$0x1] %vm260_vm1, %v2650_v51  ;;  %v2615_v35 = vld [vmem:[#allocation3 + $0x19a] sm:$0x1]  ;;  %v2651_v44 = vld [vmem:[#allocation3 + $0x1a7] sm:$0x1] }
 0x3c6   : > { %2848 = vrot.lane.b32.xlu1 %v2759_v55, %s5289_s18  ;;  %2633 = vst.msk [vmem:[#allocation3 + $0x198] sm:$0x1] %vm260_vm1, %v2615_v35  ;;  %v2765_v19 = vld [vmem:[#allocation3 + $0x171] sm:$0xff]  ;;  %2669 = vst.msk [vmem:[#allocation3 + $0x1a9] sm:$0x1] %vm260_vm1, %v2651_v44  ;;  %v2764_v52 = vld [vmem:[#allocation3 + $0x169] sm:$0xff] }
 0x3c7   : > { %2846 = vrot.lane.b32.xlu0 %v2758_v23, %s5289_s18  ;;  %v2927_v36 = vld [vmem:[#allocation3 + $0xa] sm:$0xff]  ;;  %v2926_v38 = vld [vmem:[#allocation3 + $0x2] sm:$0xff]  ;;  %v7010_v14 = vld [vmem:[#allocation3 + $0x1a] sm:$0xff] }
 0x3c8   : > { %v7006_v29 = vld [vmem:[#allocation3 + $0x22] sm:$0xff]  ;;  %v7014_v53 = vld [vmem:[#allocation3 + $0x3a] sm:$0xff]  ;;  %v7018_v63 = vld [vmem:[#allocation3 + $0x32] sm:$0xff] }
 0x3c9   : > { %v7022_v17 = vld [vmem:[#allocation3 + $0x52] sm:$0xff]  ;;  %v7026_v0 = vld [vmem:[#allocation3 + $0x4a] sm:$0xff]  ;;  %v7034_v28 = vld [vmem:[#allocation3 + $0x62] sm:$0xff] }
 0x3ca   : > { %2852 = vrot.lane.b32.xlu1 %v2761_v18, %s5289_s18  ;;  %v7030_v27 = vld [vmem:[#allocation3 + $0x6a] sm:$0xff]  ;;  %v7038_v32 = vld [vmem:[#allocation3 + $0x82] sm:$0xff]  ;;  %v7042_v54 = vld [vmem:[#allocation3 + $0x7a] sm:$0xff] }
 0x3cb   : > { %2850 = vrot.lane.b32.xlu0 %v2760_v34, %s5289_s18  ;;  %v7046_v46 = vld [vmem:[#allocation3 + $0x9a] sm:$0xff]  ;;  %v7050_v24 = vld [vmem:[#allocation3 + $0x92] sm:$0xff]  ;;  %v7058_v55 = vld [vmem:[#allocation3 + $0xaa] sm:$0xff] }
 0x3cc   : > { %v7054_v37 = vld [vmem:[#allocation3 + $0xb2] sm:$0xff]  ;;  %v7062_v23 = vld [vmem:[#allocation3 + $0xca] sm:$0xff]  ;;  %v7066_v18 = vld [vmem:[#allocation3 + $0xc2] sm:$0xff] }
 0x3cd   : > { %v2945_v34 = vld [vmem:[#allocation3 + $0xe2] sm:$0xff]  ;;  %v2947_v51 = vld [vmem:[#allocation3 + $0xfa] sm:$0xff]  ;;  %v2946_v35 = vld [vmem:[#allocation3 + $0xf2] sm:$0xff] }
 0x3ce   : > { %2856 = vrot.lane.b32.xlu1 %v2763_v16, %s5289_s18  ;;  %v2944_v16 = vld [vmem:[#allocation3 + $0xda] sm:$0xff]  ;;  %v2948_v44 = vld [vmem:[#allocation3 + $0x10a] sm:$0xff] }
 0x3cf   : > { %2854 = vrot.lane.b32.xlu0 %v2762_v31, %s5289_s18  ;;  %v2949_v31 = vld [vmem:[#allocation3 + $0x112] sm:$0xff] }
 0x3d2   : > { %2860 = vrot.lane.b32.xlu1 %v2765_v19, %s5289_s18  ;;  %v2951_v19 = vld [vmem:[#allocation3 + $0x12a] sm:$0xff] }
 0x3d3   : > { %2858 = vrot.lane.b32.xlu0 %v2764_v52, %s5289_s18 }
 0x3d6   : > { %2992 = vrot.lane.b32.xlu1 %v2927_v36, %s5290_s19  ;;  %v2950_v36 = vld [vmem:[#allocation3 + $0x122] sm:$0xff] }
 0x3d7   : > { %2990 = vrot.lane.b32.xlu0 %v2926_v38, %s5290_s19  ;;  %v2953_v38 = vld [vmem:[#allocation3 + $0x142] sm:$0xff] }
 0x3da   : > { %2996 = vrot.lane.b32.xlu1 %v7006_v29, %s5290_s19 }
 0x3db   : > { %2994 = vrot.lane.b32.xlu0 %v7010_v14, %s5290_s19 }
 0x3de   : > { %3000 = vrot.lane.b32.xlu1 %v7014_v53, %s5290_s19 }
 0x3df   : > { %2998 = vrot.lane.b32.xlu0 %v7018_v63, %s5290_s19 }
 0x3e2   : > { %3004 = vrot.lane.b32.xlu1 %v7022_v17, %s5290_s19 }
 0x3e3   : > { %3002 = vrot.lane.b32.xlu0 %v7026_v0, %s5290_s19 }
 0x3e6   : > { %3008 = vrot.lane.b32.xlu1 %v7030_v27, %s5290_s19 }
 0x3e7   : > { %3006 = vrot.lane.b32.xlu0 %v7034_v28, %s5290_s19 }
 0x3ea   : > { %3012 = vrot.lane.b32.xlu1 %v7038_v32, %s5290_s19 }
 0x3eb   : > { %3010 = vrot.lane.b32.xlu0 %v7042_v54, %s5290_s19 }
 0x3ee   : > { %3016 = vrot.lane.b32.xlu1 %v7046_v46, %s5290_s19 }
 0x3ef   : > { %3014 = vrot.lane.b32.xlu0 %v7050_v24, %s5290_s19 }
 0x3f2   : > { %3020 = vrot.lane.b32.xlu1 %v7054_v37, %s5290_s19 }
 0x3f3   : > { %3018 = vrot.lane.b32.xlu0 %v7058_v55, %s5290_s19 }
 0x3f6   : > { %3024 = vrot.lane.b32.xlu1 %v7062_v23, %s5290_s19 }
 0x3f7   : > { %3022 = vrot.lane.b32.xlu0 %v7066_v18, %s5290_s19 }
 0x3fa   : > { %3028 = vrot.lane.b32.xlu1 %v2945_v34, %s5290_s19 }
 0x3fb   : > { %3026 = vrot.lane.b32.xlu0 %v2944_v16, %s5290_s19  ;;  %v2952_v16 = vld [vmem:[#allocation3 + $0x13a] sm:$0xff] }
 0x3fe   : > { %3032 = vrot.lane.b32.xlu1 %v2947_v51, %s5290_s19 }
 0x3ff   : > { %3030 = vrot.lane.b32.xlu0 %v2946_v35, %s5290_s19  ;;  %v2955_v35 = vld [vmem:[#allocation3 + $0x15a] sm:$0xff] }
 0x402   : > { %3036 = vrot.lane.b32.xlu1 %v2949_v31, %s5290_s19  ;;  %v2801_v52 = vpop.permute.xlu1 %2800 }
 0x403   : > { %3034 = vrot.lane.b32.xlu0 %v2948_v44, %s5290_s19  ;;  %2895 = vst.msk [vmem:[#allocation4 + $0x8] sm:$0xff] %vm539_vm2, %v2801_v52  ;;  %v2954_v44 = vld [vmem:[#allocation3 + $0x152] sm:$0xff] }
 0x404   : > { %v2957_v52 = vld [vmem:[#allocation3 + $0x172] sm:$0xff] }
 0x406   : > { %3040 = vrot.lane.b32.xlu1 %v2951_v19, %s5290_s19 }
 0x407   : > { %3038 = vrot.lane.b32.xlu0 %v2950_v36, %s5290_s19 }
 0x408   : > { %v2799_v34 = vpop.permute.xlu0 %2798 }
 0x409   : > { %2894 = vst.msk [vmem:[#allocation4] sm:$0xff] %vm539_vm2, %v2799_v34 }
 0x40a   : > { %3044 = vrot.lane.b32.xlu1 %v2953_v38, %s5290_s19  ;;  %v2805_v51 = vpop.permute.xlu1 %2804  ;;  %v2956_v38 = vld [vmem:[#allocation3 + $0x16a] sm:$0xff] }
 0x40b   : > { %3042 = vrot.lane.b32.xlu0 %v2952_v16, %s5290_s19  ;;  %2897 = vst.msk [vmem:[#allocation4 + $0x18] sm:$0xff] %vm539_vm2, %v2805_v51 }
 0x40c   : > { %v2803_v31 = vpop.permute.xlu0 %2802 }
 0x40d   : > { %2896 = vst.msk [vmem:[#allocation4 + $0x10] sm:$0xff] %vm539_vm2, %v2803_v31 }
 0x40e   : > { %3048 = vrot.lane.b32.xlu1 %v2955_v35, %s5290_s19  ;;  %v2809_v19 = vpop.permute.xlu1 %2808 }
 0x40f   : > { %3046 = vrot.lane.b32.xlu0 %v2954_v44, %s5290_s19  ;;  %2899 = vst.msk [vmem:[#allocation4 + $0x28] sm:$0xff] %vm539_vm2, %v2809_v19 }
 0x410   : > { %v2807_v36 = vpop.permute.xlu0 %2806 }
 0x411   : > { %2898 = vst.msk [vmem:[#allocation4 + $0x20] sm:$0xff] %vm539_vm2, %v2807_v36 }
 0x412   : > { %3052 = vrot.lane.b32.xlu1 %v2957_v52, %s5290_s19  ;;  %v2813_v34 = vpop.permute.xlu1 %2812 }
 0x413   : > { %3050 = vrot.lane.b32.xlu0 %v2956_v38, %s5290_s19  ;;  %2901 = vst.msk [vmem:[#allocation4 + $0x38] sm:$0xff] %vm539_vm2, %v2813_v34  ;;  %v4305_v34 = vld [vmem:[%s8083_s2 + $0x10] sm:$0xff] }
 0x414   : > { %v2811_v16 = vpop.permute.xlu0 %2810 }
 0x415   : > { %2900 = vst.msk [vmem:[#allocation4 + $0x30] sm:$0xff] %vm539_vm2, %v2811_v16 }
 0x416   : > { %3184 = vrot.lane.b32.xlu1 %v6877_v41, %s5291_s20  ;;  %v2817_v51 = vpop.permute.xlu1 %2816 }
 0x417   : > { %3182 = vrot.lane.b32.xlu0 %v6881_v7, %s5291_s20  ;;  %2903 = vst.msk [vmem:[#allocation4 + $0x48] sm:$0xff] %vm539_vm2, %v2817_v51 }
 0x418   : > { %v2815_v35 = vpop.permute.xlu0 %2814 }
 0x419   : > { %2902 = vst.msk [vmem:[#allocation4 + $0x40] sm:$0xff] %vm539_vm2, %v2815_v35  ;;  %v4303_v35 = vld [vmem:[%s8083_s2] sm:$0xff] }
 0x41a   : > { %3188 = vrot.lane.b32.xlu1 %v6890_v60, %s5291_s20  ;;  %v2821_v31 = vpop.permute.xlu1 %2820 }
 0x41b   : > { %3186 = vrot.lane.b32.xlu0 %v6892_v45, %s5291_s20  ;;  %2905 = vst.msk [vmem:[#allocation4 + $0x58] sm:$0xff] %vm539_vm2, %v2821_v31 }
 0x41c   : > { %v2819_v41 = vpop.permute.xlu0 %2818 }
 0x41d   : > { %2904 = vst.msk [vmem:[#allocation4 + $0x50] sm:$0xff] %vm539_vm2, %v2819_v41 }
 0x41e   : > { %3192 = vrot.lane.b32.xlu1 %v6900_v42, %s5291_s20  ;;  %v2825_v7 = vpop.permute.xlu1 %2824 }
 0x41f   : > { %3190 = vrot.lane.b32.xlu0 %v6904_v62, %s5291_s20  ;;  %2907 = vst.msk [vmem:[#allocation4 + $0x68] sm:$0xff] %vm539_vm2, %v2825_v7 }
 0x421   : > { %v2823_v44 = vpop.permute.xlu0 %2822 }
 0x422   : > { %3374 = vrot.lane.b32.xlu1 %v6805_v22, %s5292_s21  ;;  %2906 = vst.msk [vmem:[#allocation4 + $0x60] sm:$0xff] %vm539_vm2, %v2823_v44  ;;  %v2829_v19 = vpop.permute.xlu1 %2828 }
 0x423   : > { %3194 = vrot.lane.b32.xlu0 %v6908_v1, %s5291_s20  ;;  %2909 = vst.msk [vmem:[#allocation4 + $0x78] sm:$0xff] %vm539_vm2, %v2829_v19 }
 0x425   : > { %v2827_v52 = vpop.permute.xlu0 %2826 }
 0x426   : > { %3566 = vrot.lane.b32.xlu1 %v7010_v14, %s5293_s22  ;;  %2908 = vst.msk [vmem:[#allocation4 + $0x70] sm:$0xff] %vm539_vm2, %v2827_v52  ;;  %v2833_v36 = vpop.permute.xlu1 %2832  ;;  %v4307_v14 = vld [vmem:[%s8083_s2 + $0x20] sm:$0xf] }
 0x427   : > { %3376 = vrot.lane.b32.xlu0 %v6795_v6, %s5292_s21  ;;  %2911 = vst.msk [vmem:[#allocation4 + $0x88] sm:$0xff] %vm539_vm2, %v2833_v36  ;;  %5203 = vmatprep.subr.msk.mxu1 %vm2058_vm5, %v4307_v14 }
 0x428   : > { %5204 = vmatpush3.msk.msra.mxu1 %vm2058_vm5, %v4307_v14 }
 0x429   : > { %v2831_v22 = vpop.permute.xlu0 %2830 }
 0x42a   : > { %3759 = vrot.lane.b32.xlu1 %v6892_v45, %s5294_s4  ;;  %2910 = vst.msk [vmem:[#allocation4 + $0x80] sm:$0xff] %vm539_vm2, %v2831_v22  ;;  %v2837_v38 = vpop.permute.xlu1 %2836 }
 0x42b   : > { %3568 = vrot.lane.b32.xlu0 %v7006_v29, %s5293_s22  ;;  %2913 = vst.msk [vmem:[#allocation4 + $0x98] sm:$0xff] %vm539_vm2, %v2837_v38  ;;  %v4306_v29 = vld [vmem:[%s8083_s2 + $0x18] sm:$0xff] }
 0x42c   : > { %5205 = vmatprep.subr.mxu1 %v4306_v29 }
 0x42d   : > { %v2835_v6 = vpop.permute.xlu0 %2834  ;;  %5206 = vmatpush3.msra.mxu1 %v4306_v29 }
 0x42e   : > { %3951 = vrot.lane.b32.xlu1 %v6823_v43, %s5295_s7  ;;  %2912 = vst.msk [vmem:[#allocation4 + $0x90] sm:$0xff] %vm539_vm2, %v2835_v6  ;;  %v2841_v45 = vpop.permute.xlu1 %2840  ;;  %5207 = vmatprep.subr.mxu1 %v4305_v34 }
 0x42f   : > { %3761 = vrot.lane.b32.xlu0 %v6890_v60, %s5294_s4  ;;  %2915 = vst.msk [vmem:[#allocation4 + $0xa8] sm:$0xff] %vm539_vm2, %v2841_v45  ;;  %5208 = vmatpush3.msra.mxu1 %v4305_v34  ;;  %v4304_v60 = vld [vmem:[%s8083_s2 + $0x8] sm:$0xff] }
 0x430   : > { %5209 = vmatprep.subr.mxu1 %v4304_v60 }
 0x431   : > { %v2839_v16 = vpop.permute.xlu0 %2838  ;;  %5210 = vmatpush3.msra.mxu1 %v4304_v60 }
 0x432   : > { %3953 = vrot.lane.b32.xlu1 %v6812_v5, %s5295_s7  ;;  %2914 = vst.msk [vmem:[#allocation4 + $0xa0] sm:$0xff] %vm539_vm2, %v2839_v16  ;;  %5211 = vmatprep.subr.mxu1 %v4303_v35 }
 0x433   : > { %3378 = vrot.lane.b32.xlu0 %v6823_v43, %s5292_s21  ;;  %5212 = vmatpush3.msra.mxu1 %v4303_v35 }
 0x434   : > { %v2845_v51 = vpop.permute.xlu1 %2844 }
 0x435   : > { %2917 = vst.msk [vmem:[#allocation4 + $0xb8] sm:$0xff] %vm539_vm2, %v2845_v51  ;;  %v2843_v31 = vpop.permute.xlu0 %2842 }
 0x436   : > { %3380 = vrot.lane.b32.xlu1 %v6812_v5, %s5292_s21  ;;  %2916 = vst.msk [vmem:[#allocation4 + $0xb0] sm:$0xff] %vm539_vm2, %v2843_v31 }
 0x437   : > { %4143 = vrot.lane.b32.xlu0 %v7018_v63, %s5296_s8 }
 0x438   : > { %v2849_v41 = vpop.permute.xlu1 %2848 }
 0x439   : > { %2919 = vst.msk [vmem:[#allocation4 + $0xc8] sm:$0xff] %vm539_vm2, %v2849_v41  ;;  %v2847_v43 = vpop.permute.xlu0 %2846 }
 0x43a   : > { %4145 = vrot.lane.b32.xlu1 %v7014_v53, %s5296_s8  ;;  %2918 = vst.msk [vmem:[#allocation4 + $0xc0] sm:$0xff] %vm539_vm2, %v2847_v43 }
 0x43b   : > { %3570 = vrot.lane.b32.xlu0 %v7018_v63, %s5293_s22 }
 0x43c   : > { %v2853_v7 = vpop.permute.xlu1 %2852 }
 0x43d   : > { %2921 = vst.msk [vmem:[#allocation4 + $0xd8] sm:$0xff] %vm539_vm2, %v2853_v7  ;;  %v2851_v5 = vpop.permute.xlu0 %2850 }
 0x43e   : > { %3763 = vrot.lane.b32.xlu1 %v6904_v62, %s5294_s4  ;;  %2920 = vst.msk [vmem:[#allocation4 + $0xd0] sm:$0xff] %vm539_vm2, %v2851_v5 }
 0x43f   : > { %3572 = vrot.lane.b32.xlu0 %v7014_v53, %s5293_s22 }
 0x440   : > { %v2857_v44 = vpop.permute.xlu1 %2856 }
 0x441   : > { %2923 = vst.msk [vmem:[#allocation4 + $0xe8] sm:$0xff] %vm539_vm2, %v2857_v44  ;;  %v2855_v19 = vpop.permute.xlu0 %2854 }
 0x442   : > { %3955 = vrot.lane.b32.xlu1 %v6831_v33, %s5295_s7  ;;  %2922 = vst.msk [vmem:[#allocation4 + $0xe0] sm:$0xff] %vm539_vm2, %v2855_v19 }
 0x443   : > { %3765 = vrot.lane.b32.xlu0 %v6900_v42, %s5294_s4 }
 0x444   : > { %v2861_v63 = vpop.permute.xlu1 %2860 }
 0x445   : > { %2925 = vst.msk [vmem:[#allocation4 + $0xf8] sm:$0xff] %vm539_vm2, %v2861_v63  ;;  %v2859_v62 = vpop.permute.xlu0 %2858 }
 0x446   : > { %3957 = vrot.lane.b32.xlu1 %v6827_v61, %s5295_s7  ;;  %2924 = vst.msk [vmem:[#allocation4 + $0xf0] sm:$0xff] %vm539_vm2, %v2859_v62 }
 0x447   : > { %3382 = vrot.lane.b32.xlu0 %v6831_v33, %s5292_s21 }
 0x448   : > { %v2993_v53 = vpop.permute.xlu1 %2992 }
 0x449   : > { %3087 = vst.msk [vmem:[#allocation4 + $0x8] sm:$0xff] %vm732_vm3, %v2993_v53  ;;  %v2991_v52 = vpop.permute.xlu0 %2990 }
 0x44a   : > { %3384 = vrot.lane.b32.xlu1 %v6827_v61, %s5292_s21  ;;  %3086 = vst.msk [vmem:[#allocation4] sm:$0xff] %vm732_vm3, %v2991_v52 }
 0x44b   : > { %4147 = vrot.lane.b32.xlu0 %v7026_v0, %s5296_s8 }
 0x44c   : > { %v2997_v42 = vpop.permute.xlu1 %2996 }
 0x44d   : > { %3089 = vst.msk [vmem:[#allocation4 + $0x18] sm:$0xff] %vm732_vm3, %v2997_v42  ;;  %v2995_v36 = vpop.permute.xlu0 %2994 }
 0x44e   : > { %4149 = vrot.lane.b32.xlu1 %v7022_v17, %s5296_s8  ;;  %3088 = vst.msk [vmem:[#allocation4 + $0x10] sm:$0xff] %vm732_vm3, %v2995_v36 }
 0x44f   : > { %3574 = vrot.lane.b32.xlu0 %v7026_v0, %s5293_s22 }
 0x450   : > { %v3001_v33 = vpop.permute.xlu1 %3000 }
 0x451   : > { %3091 = vst.msk [vmem:[#allocation4 + $0x28] sm:$0xff] %vm732_vm3, %v3001_v33  ;;  %v2999_v61 = vpop.permute.xlu0 %2998 }
 0x452   : > { %3767 = vrot.lane.b32.xlu1 %v6908_v1, %s5294_s4  ;;  %3090 = vst.msk [vmem:[#allocation4 + $0x20] sm:$0xff] %vm732_vm3, %v2999_v61 }
 0x453   : > { %3576 = vrot.lane.b32.xlu0 %v7022_v17, %s5293_s22 }
 0x454   : > { %v3005_v22 = vpop.permute.xlu1 %3004 }
 0x455   : > { %3093 = vst.msk [vmem:[#allocation4 + $0x38] sm:$0xff] %vm732_vm3, %v3005_v22  ;;  %v3003_v38 = vpop.permute.xlu0 %3002 }
 0x456   : > { %3959 = vrot.lane.b32.xlu1 %v6839_v50, %s5295_s7  ;;  %3092 = vst.msk [vmem:[#allocation4 + $0x30] sm:$0xff] %vm732_vm3, %v3003_v38 }
 0x457   : > { %3769 = vrot.lane.b32.xlu0 %v6906_v15, %s5294_s4 }
 0x458   : > { %v3009_v0 = vpop.permute.xlu1 %3008 }
 0x459   : > { %3095 = vst.msk [vmem:[#allocation4 + $0x48] sm:$0xff] %vm732_vm3, %v3009_v0  ;;  %v3007_v1 = vpop.permute.xlu0 %3006 }
 0x45a   : > { %3386 = vrot.lane.b32.xlu1 %v6839_v50, %s5292_s21  ;;  %3094 = vst.msk [vmem:[#allocation4 + $0x40] sm:$0xff] %vm732_vm3, %v3007_v1 }
 0x45b   : > { %3196 = vrot.lane.b32.xlu0 %v6906_v15, %s5291_s20 }
 0x45c   : > { %v3013_v17 = vpop.permute.xlu1 %3012 }
 0x45d   : > { %3097 = vst.msk [vmem:[#allocation4 + $0x58] sm:$0xff] %vm732_vm3, %v3013_v17  ;;  %v3011_v14 = vpop.permute.xlu0 %3010  ;;  %v3900_v17 = vld [vmem:[#allocation3 + $0xc9] sm:$0xff] }
 0x45e   : > { %4151 = vrot.lane.b32.xlu1 %v7034_v28, %s5296_s8  ;;  %3096 = vst.msk [vmem:[#allocation4 + $0x50] sm:$0xff] %vm732_vm3, %v3011_v14 }
 0x45f   : > { %3961 = vrot.lane.b32.xlu0 %v6835_v49, %s5295_s7 }
 0x460   : > { %v3017_v6 = vpop.permute.xlu1 %3016 }
 0x461   : > { %3099 = vst.msk [vmem:[#allocation4 + $0x68] sm:$0xff] %vm732_vm3, %v3017_v6  ;;  %v3015_v50 = vpop.permute.xlu0 %3014 }
 0x462   : > { %3578 = vrot.lane.b32.xlu1 %v7034_v28, %s5293_s22  ;;  %3098 = vst.msk [vmem:[#allocation4 + $0x60] sm:$0xff] %vm732_vm3, %v3015_v50 }
 0x463   : > { %3388 = vrot.lane.b32.xlu0 %v6835_v49, %s5292_s21 }
 0x464   : > { %v3021_v15 = vpop.permute.xlu1 %3020 }
 0x465   : > { %3101 = vst.msk [vmem:[#allocation4 + $0x78] sm:$0xff] %vm732_vm3, %v3021_v15  ;;  %v3019_v45 = vpop.permute.xlu0 %3018 }
 0x466   : > { %3580 = vrot.lane.b32.xlu1 %v7030_v27, %s5293_s22  ;;  %3100 = vst.msk [vmem:[#allocation4 + $0x70] sm:$0xff] %vm732_vm3, %v3019_v45 }
 0x467   : > { %4153 = vrot.lane.b32.xlu0 %v7030_v27, %s5296_s8 }
 0x468   : > { %v3025_v29 = vpop.permute.xlu1 %3024 }
 0x469   : > { %3103 = vst.msk [vmem:[#allocation4 + $0x88] sm:$0xff] %vm732_vm3, %v3025_v29  ;;  %v3023_v28 = vpop.permute.xlu0 %3022 }
 0x46a   : > { %3198 = vrot.lane.b32.xlu1 %v6919_v13, %s5291_s20  ;;  %3102 = vst.msk [vmem:[#allocation4 + $0x80] sm:$0xff] %vm732_vm3, %v3023_v28 }
 0x46b   : > { %3771 = vrot.lane.b32.xlu0 %v6919_v13, %s5294_s4 }
 0x46c   : > { %v3029_v49 = vpop.permute.xlu1 %3028 }
 0x46d   : > { %3105 = vst.msk [vmem:[#allocation4 + $0x98] sm:$0xff] %vm732_vm3, %v3029_v49  ;;  %v3027_v34 = vpop.permute.xlu0 %3026  ;;  %v3901_v49 = vld [vmem:[#allocation3 + $0xd9] sm:$0xff] }
 0x46e   : > { %3963 = vrot.lane.b32.xlu1 %v6851_v20, %s5295_s7  ;;  %3104 = vst.msk [vmem:[#allocation4 + $0x90] sm:$0xff] %vm732_vm3, %v3027_v34 }
 0x46f   : > { %3773 = vrot.lane.b32.xlu0 %v6917_v57, %s5294_s4 }
 0x470   : > { %v3033_v27 = vpop.permute.xlu1 %3032 }
 0x471   : > { %3107 = vst.msk [vmem:[#allocation4 + $0xa8] sm:$0xff] %vm732_vm3, %v3033_v27  ;;  %v3031_v16 = vpop.permute.xlu0 %3030 }
 0x472   : > { %3390 = vrot.lane.b32.xlu1 %v6851_v20, %s5292_s21  ;;  %3106 = vst.msk [vmem:[#allocation4 + $0xa0] sm:$0xff] %vm732_vm3, %v3031_v16  ;;  %v4093_v16 = vld [vmem:[#allocation3 + $0xda] sm:$0xff] }
 0x473   : > { %3200 = vrot.lane.b32.xlu0 %v6917_v57, %s5291_s20 }
 0x474   : > { %v3037_v13 = vpop.permute.xlu1 %3036 }
 0x475   : > { %3109 = vst.msk [vmem:[#allocation4 + $0xb8] sm:$0xff] %vm732_vm3, %v3037_v13  ;;  %v3035_v51 = vpop.permute.xlu0 %3034 }
 0x476   : > { %4155 = vrot.lane.b32.xlu1 %v7042_v54, %s5296_s8  ;;  %3108 = vst.msk [vmem:[#allocation4 + $0xb0] sm:$0xff] %vm732_vm3, %v3035_v51  ;;  %v3902_v51 = vld [vmem:[#allocation3 + $0xe1] sm:$0xff] }
 0x477   : > { %3965 = vrot.lane.b32.xlu0 %v6843_v59, %s5295_s7 }
 0x478   : > { %v3041_v60 = vpop.permute.xlu1 %3040 }
 0x479   : > { %3111 = vst.msk [vmem:[#allocation4 + $0xc8] sm:$0xff] %vm732_vm3, %v3041_v60  ;;  %v3039_v20 = vpop.permute.xlu0 %3038 }
 0x47a   : > { %3582 = vrot.lane.b32.xlu1 %v7042_v54, %s5293_s22  ;;  %3110 = vst.msk [vmem:[#allocation4 + $0xc0] sm:$0xff] %vm732_vm3, %v3039_v20 }
 0x47b   : > { %3392 = vrot.lane.b32.xlu0 %v6843_v59, %s5292_s21 }
 0x47c   : > { %v3045_v57 = vpop.permute.xlu1 %3044 }
 0x47d   : > { %3113 = vst.msk [vmem:[#allocation4 + $0xd8] sm:$0xff] %vm732_vm3, %v3045_v57  ;;  %v3043_v35 = vpop.permute.xlu0 %3042 }
 0x47e   : > { %3584 = vrot.lane.b32.xlu1 %v7038_v32, %s5293_s22  ;;  %3112 = vst.msk [vmem:[#allocation4 + $0xd0] sm:$0xff] %vm732_vm3, %v3043_v35  ;;  %v3519_v35 = vld [vmem:[#allocation3 + $0xe2] sm:$0xff] }
 0x47f   : > { %4157 = vrot.lane.b32.xlu0 %v7038_v32, %s5296_s8 }
 0x480   : > { %v3049_v31 = vpop.permute.xlu1 %3048 }
 0x481   : > { %3115 = vst.msk [vmem:[#allocation4 + $0xe8] sm:$0xff] %vm732_vm3, %v3049_v31  ;;  %v3047_v54 = vpop.permute.xlu0 %3046 }
 0x482   : > { %3202 = vrot.lane.b32.xlu1 %v6928_v47, %s5291_s20  ;;  %3114 = vst.msk [vmem:[#allocation4 + $0xe0] sm:$0xff] %vm732_vm3, %v3047_v54 }
 0x483   : > { %3775 = vrot.lane.b32.xlu0 %v6928_v47, %s5294_s4 }
 0x484   : > { %v3053_v59 = vpop.permute.xlu1 %3052 }
 0x485   : > { %3117 = vst.msk [vmem:[#allocation4 + $0xf8] sm:$0xff] %vm732_vm3, %v3053_v59  ;;  %v3051_v41 = vpop.permute.xlu0 %3050 }
 0x486   : > { %3967 = vrot.lane.b32.xlu1 %v6865_v11, %s5295_s7  ;;  %3116 = vst.msk [vmem:[#allocation4 + $0xf0] sm:$0xff] %vm732_vm3, %v3051_v41 }
 0x487   : > { %3777 = vrot.lane.b32.xlu0 %v6926_v48, %s5294_s4 }
 0x488   : > { %v3185_v32 = vpop.permute.xlu1 %3184 }
 0x489   : > { %3279 = vst.msk [vmem:[#allocation4 + $0x8] sm:$0xff] %vm925_vm4, %v3185_v32  ;;  %v3183_v43 = vpop.permute.xlu0 %3182 }
 0x48a   : > { %3394 = vrot.lane.b32.xlu1 %v6865_v11, %s5292_s21  ;;  %3278 = vst.msk [vmem:[#allocation4] sm:$0xff] %vm925_vm4, %v3183_v43  ;;  %v3903_v43 = vld [vmem:[#allocation3 + $0xf1] sm:$0xff] }
 0x48b   : > { %3204 = vrot.lane.b32.xlu0 %v6926_v48, %s5291_s20 }
 0x48c   : > { %v3189_v47 = vpop.permute.xlu1 %3188 }
 0x48d   : > { %3281 = vst.msk [vmem:[#allocation4 + $0x18] sm:$0xff] %vm925_vm4, %v3189_v47  ;;  %v3187_v7 = vpop.permute.xlu0 %3186 }
 0x48e   : > { %4159 = vrot.lane.b32.xlu1 %v7050_v24, %s5296_s8  ;;  %3280 = vst.msk [vmem:[#allocation4 + $0x10] sm:$0xff] %vm925_vm4, %v3187_v7 }
 0x48f   : > { %3969 = vrot.lane.b32.xlu0 %v6856_v58, %s5295_s7 }
 0x490   : > { %v3193_v5 = vpop.permute.xlu1 %3192 }
 0x491   : > { %3283 = vst.msk [vmem:[#allocation4 + $0x28] sm:$0xff] %vm925_vm4, %v3193_v5  ;;  %v3191_v11 = vpop.permute.xlu0 %3190 }
 0x492   : > { %3586 = vrot.lane.b32.xlu1 %v7050_v24, %s5293_s22  ;;  %3282 = vst.msk [vmem:[#allocation4 + $0x20] sm:$0xff] %vm925_vm4, %v3191_v11  ;;  %v4095_v11 = vld [vmem:[#allocation3 + $0xf2] sm:$0xff] }
 0x493   : > { %3396 = vrot.lane.b32.xlu0 %v6856_v58, %s5292_s21 }
 0x494   : > { %v3375_v48 = vpop.permute.xlu1 %3374 }
 0x495   : > { %3470 = vst.msk [vmem:[#allocation4] sm:$0xff] %vm1118_vm6, %v3375_v48  ;;  %v3195_v44 = vpop.permute.xlu0 %3194 }
 0x496   : > { %3588 = vrot.lane.b32.xlu1 %v7046_v46, %s5293_s22  ;;  %3284 = vst.msk [vmem:[#allocation4 + $0x30] sm:$0xff] %vm925_vm4, %v3195_v44  ;;  %v3904_v44 = vld [vmem:[#allocation3 + $0xf9] sm:$0xff] }
 0x497   : > { %4161 = vrot.lane.b32.xlu0 %v7046_v46, %s5296_s8 }
 0x498   : > { %v3567_v19 = vpop.permute.xlu1 %3566 }
 0x499   : > { %3662 = vst.msk [vmem:[#allocation4] sm:$0xff] %vm1311_vm7, %v3567_v19  ;;  %v3377_v24 = vpop.permute.xlu0 %3376 }
 0x49a   : > { %3206 = vrot.lane.b32.xlu1 %v6938_v56, %s5291_s20  ;;  %3471 = vst.msk [vmem:[#allocation4 + $0x8] sm:$0xff] %vm1118_vm6, %v3377_v24 }
 0x49b   : > { %3779 = vrot.lane.b32.xlu0 %v6938_v56, %s5294_s4 }
 0x49c   : > { %v3760_v58 = vpop.permute.xlu1 %3759 }
 0x49d   : > { %3855 = vst.msk [vmem:[#allocation4] sm:$0xff] %vm1505_vm8, %v3760_v58  ;;  %v3569_v63 = vpop.permute.xlu0 %3568 }
 0x49e   : > { %3971 = vrot.lane.b32.xlu1 %v6883_v9, %s5295_s7  ;;  %3663 = vst.msk [vmem:[#allocation4 + $0x8] sm:$0xff] %vm1311_vm7, %v3569_v63  ;;  %v3521_v63 = vld [vmem:[#allocation3 + $0xfa] sm:$0xff] }
 0x49f   : > { %3781 = vrot.lane.b32.xlu0 %v6930_v30, %s5294_s4 }
 0x4a0   : > { %v3952_v46 = vpop.permute.xlu1 %3951 }
 0x4a1   : > { %4047 = vst.msk [vmem:[#allocation4] sm:$0xff] %vm1698_vm9, %v3952_v46  ;;  %v3762_v62 = vpop.permute.xlu0 %3761 }
 0x4a2   : > { %3398 = vrot.lane.b32.xlu1 %v6883_v9, %s5292_s21  ;;  %3856 = vst.msk [vmem:[#allocation4 + $0x8] sm:$0xff] %vm1505_vm8, %v3762_v62 }
 0x4a3   : > { %3208 = vrot.lane.b32.xlu0 %v6930_v30, %s5291_s20 }
 0x4a4   : > { %v3954_v56 = vpop.permute.xlu1 %3953 }
 0x4a5   : > { %4048 = vst.msk [vmem:[#allocation4 + $0x8] sm:$0xff] %vm1698_vm9, %v3954_v56  ;;  %v3379_v53 = vpop.permute.xlu0 %3378 }
 0x4a6   : > { %4163 = vrot.lane.b32.xlu1 %v7058_v55, %s5296_s8  ;;  %3472 = vst.msk [vmem:[#allocation4 + $0x10] sm:$0xff] %vm1118_vm6, %v3379_v53 }
 0x4a7   : > { %3973 = vrot.lane.b32.xlu0 %v6870_v25, %s5295_s7 }
 0x4a8   : > { %v3381_v52 = vpop.permute.xlu1 %3380 }
 0x4a9   : > { %3473 = vst.msk [vmem:[#allocation4 + $0x18] sm:$0xff] %vm1118_vm6, %v3381_v52  ;;  %v4144_v9 = vpop.permute.xlu0 %4143 }
 0x4aa   : > { %3590 = vrot.lane.b32.xlu1 %v7058_v55, %s5293_s22  ;;  %4239 = vst.msk [vmem:[#allocation4] sm:$0xff] %vm1891_vm10, %v4144_v9  ;;  %v3905_v9 = vld [vmem:[#allocation3 + $0x109] sm:$0xff] }
 0x4ab   : > { %3400 = vrot.lane.b32.xlu0 %v6870_v25, %s5292_s21 }
 0x4ac   : > { %v4146_v30 = vpop.permute.xlu1 %4145 }
 0x4ad   : > { %4240 = vst.msk [vmem:[#allocation4 + $0x8] sm:$0xff] %vm1891_vm10, %v4146_v30  ;;  %v3571_v42 = vpop.permute.xlu0 %3570 }
 0x4ae   : > { %3592 = vrot.lane.b32.xlu1 %v7054_v37, %s5293_s22  ;;  %3664 = vst.msk [vmem:[#allocation4 + $0x10] sm:$0xff] %vm1311_vm7, %v3571_v42 }
 0x4af   : > { %4165 = vrot.lane.b32.xlu0 %v7054_v37, %s5296_s8  ;;  %v3899_v37 = vld [vmem:[#allocation3 + $0xc1] sm:$0xff] }
 0x4b0   : > { %v3764_v36 = vpop.permute.xlu1 %3763 }
 0x4b1   : > { %3857 = vst.msk [vmem:[#allocation4 + $0x10] sm:$0xff] %vm1505_vm8, %v3764_v36  ;;  %v3573_v55 = vpop.permute.xlu0 %3572  ;;  %v4271_v33 = vld [vmem:[#allocation4] sm:$0xff] }
 0x4b2   : > { %3210 = vrot.lane.b32.xlu1 %v6946_v26, %s5291_s20  ;;  %3665 = vst.msk [vmem:[#allocation4 + $0x18] sm:$0xff] %vm1311_vm7, %v3573_v55  ;;  %5213 = vmatprep.mubr.msk.f32.mxu1 %vm1961_vm11, %v4271_v33  ;;  %v4097_v55 = vld [vmem:[#allocation3 + $0x10a] sm:$0xff] }
 0x4b3   : > { %3783 = vrot.lane.b32.xlu0 %v6946_v26, %s5294_s4 }
 0x4b4   : > { %v3956_v25 = vpop.permute.xlu1 %3955  ;;  %v4272_v61 = vld [vmem:[#allocation4 + $0x8] sm:$0xff] }
 0x4b5   : > { %4049 = vst.msk [vmem:[#allocation4 + $0x10] sm:$0xff] %vm1698_vm9, %v3956_v25  ;;  %5214 = vmatmul.mubr.msk.f32.vlgmr.msra.gmra.mxu1 %vm1961_vm11, %v4272_v61  ;;  %v3766_v22 = vpop.permute.xlu0 %3765  ;;  %v3906_v25 = vld [vmem:[#allocation3 + $0x111] sm:$0xff] }
 0x4b6   : > { %3975 = vrot.lane.b32.xlu1 %v3899_v37, %s5295_s7  ;;  %3858 = vst.msk [vmem:[#allocation4 + $0x18] sm:$0xff] %vm1505_vm8, %v3766_v22 }
 0x4b7   : > { %3785 = vrot.lane.b32.xlu0 %v6940_v3, %s5294_s4 }
 0x4b8   : > { %v3958_v38 = vpop.permute.xlu1 %3957 }
 0x4b9   : > { %4050 = vst.msk [vmem:[#allocation4 + $0x18] sm:$0xff] %vm1698_vm9, %v3958_v38  ;;  %v3383_v0 = vpop.permute.xlu0 %3382  ;;  %v3523_v38 = vld [vmem:[#allocation3 + $0x112] sm:$0xff] }
 0x4ba   : > { %3402 = vrot.lane.b32.xlu1 %v3899_v37, %s5292_s21  ;;  %3474 = vst.msk [vmem:[#allocation4 + $0x20] sm:$0xff] %vm1118_vm6, %v3383_v0 }
 0x4bb   : > { %3212 = vrot.lane.b32.xlu0 %v6940_v3, %s5291_s20 }
 0x4bc   : > { %v3385_v26 = vpop.permute.xlu1 %3384 }
 0x4bd   : > { %3475 = vst.msk [vmem:[#allocation4 + $0x28] sm:$0xff] %vm1118_vm6, %v3385_v26  ;;  %v4148_v1 = vpop.permute.xlu0 %4147 }
 0x4be   : > { %4167 = vrot.lane.b32.xlu1 %v7066_v18, %s5296_s8  ;;  %4241 = vst.msk [vmem:[#allocation4 + $0x10] sm:$0xff] %vm1891_vm10, %v4148_v1 }
 0x4bf   : > { %3977 = vrot.lane.b32.xlu0 %v3900_v17, %s5295_s7 }
 0x4c0   : > { %v4150_v14 = vpop.permute.xlu1 %4149 }
 0x4c1   : > { %4242 = vst.msk [vmem:[#allocation4 + $0x18] sm:$0xff] %vm1891_vm10, %v4150_v14  ;;  %v3575_v6 = vpop.permute.xlu0 %3574 }
 0x4c2   : > { %3594 = vrot.lane.b32.xlu1 %v7066_v18, %s5293_s22  ;;  %3666 = vst.msk [vmem:[#allocation4 + $0x20] sm:$0xff] %vm1311_vm7, %v3575_v6  ;;  %v3907_v6 = vld [vmem:[#allocation3 + $0x121] sm:$0xff] }
 0x4c3   : > { %3404 = vrot.lane.b32.xlu0 %v3900_v17, %s5292_s21 }
 0x4c4   : > { %v3768_v3 = vpop.permute.xlu1 %3767 }
 0x4c5   : > { %3859 = vst.msk [vmem:[#allocation4 + $0x20] sm:$0xff] %vm1505_vm8, %v3768_v3  ;;  %v3577_v50 = vpop.permute.xlu0 %3576  ;;  %v4273_v15 = vld [vmem:[#allocation4 + $0x10] sm:$0xff] }
 0x4c6   : > { %3596 = vrot.lane.b32.xlu1 %v7062_v23, %s5293_s22  ;;  %3667 = vst.msk [vmem:[#allocation4 + $0x28] sm:$0xff] %vm1311_vm7, %v3577_v50  ;;  %5216 = vmatprep.mubr.msk.f32.mxu1 %vm1961_vm11, %v4273_v15 }
 0x4c7   : > { %4169 = vrot.lane.b32.xlu0 %v7062_v23, %s5296_s8 }
 0x4c8   : > { %v3960_v45 = vpop.permute.xlu1 %3959  ;;  %v4274_v29 = vld [vmem:[#allocation4 + $0x18] sm:$0xff] }
 0x4c9   : > { %4051 = vst.msk [vmem:[#allocation4 + $0x20] sm:$0xff] %vm1698_vm9, %v3960_v45  ;;  %5217 = vmatmul.mubr.msk.f32.gmra.mxu1 %vm1961_vm11, %v4274_v29  ;;  %v3770_v18 = vpop.permute.xlu0 %3769  ;;  %v4099_v45 = vld [vmem:[#allocation3 + $0x122] sm:$0xff] }
 0x4ca   : > { %3214 = vrot.lane.b32.xlu1 %v6950_v40, %s5291_s20  ;;  %3860 = vst.msk [vmem:[#allocation4 + $0x28] sm:$0xff] %vm1505_vm8, %v3770_v18  ;;  %v3908_v18 = vld [vmem:[#allocation3 + $0x129] sm:$0xff] }
 0x4cb   : > { %3787 = vrot.lane.b32.xlu0 %v6950_v40, %s5294_s4 }
 0x4cc   : > { %v3387_v28 = vpop.permute.xlu1 %3386 }
 0x4cd   : > { %3476 = vst.msk [vmem:[#allocation4 + $0x30] sm:$0xff] %vm1118_vm6, %v3387_v28  ;;  %v3197_v23 = vpop.permute.xlu0 %3196 }
 0x4ce   : > { %3979 = vrot.lane.b32.xlu1 %v3901_v49, %s5295_s7  ;;  %3285 = vst.msk [vmem:[#allocation4 + $0x38] sm:$0xff] %vm925_vm4, %v3197_v23 }
 0x4cf   : > { %3789 = vrot.lane.b32.xlu0 %v6948_v21, %s5294_s4 }
 0x4d0   : > { %v4152_v34 = vpop.permute.xlu1 %4151 }
 0x4d1   : > { %4243 = vst.msk [vmem:[#allocation4 + $0x20] sm:$0xff] %vm1891_vm10, %v4152_v34  ;;  %v3962_v27 = vpop.permute.xlu0 %3961  ;;  %v3525_v34 = vld [vmem:[#allocation3 + $0x12a] sm:$0xff] }
 0x4d2   : > { %3406 = vrot.lane.b32.xlu1 %v3901_v49, %s5292_s21  ;;  %4052 = vst.msk [vmem:[#allocation4 + $0x28] sm:$0xff] %vm1698_vm9, %v3962_v27 }
 0x4d3   : > { %3216 = vrot.lane.b32.xlu0 %v6948_v21, %s5291_s20 }
 0x4d4   : > { %v3579_v40 = vpop.permute.xlu1 %3578 }
 0x4d5   : > { %3668 = vst.msk [vmem:[#allocation4 + $0x30] sm:$0xff] %vm1311_vm7, %v3579_v40  ;;  %v3389_v13 = vpop.permute.xlu0 %3388 }
 0x4d6   : > { %4171 = vrot.lane.b32.xlu1 %v4093_v16, %s5296_s8  ;;  %3477 = vst.msk [vmem:[#allocation4 + $0x38] sm:$0xff] %vm1118_vm6, %v3389_v13 }
 0x4d7   : > { %3981 = vrot.lane.b32.xlu0 %v3902_v51, %s5295_s7 }
 0x4d8   : > { %v3581_v60 = vpop.permute.xlu1 %3580  ;;  %v4275_v20 = vld [vmem:[#allocation4 + $0x20] sm:$0xff] }
 0x4d9   : > { %3669 = vst.msk [vmem:[#allocation4 + $0x38] sm:$0xff] %vm1311_vm7, %v3581_v60  ;;  %5219 = vmatprep.mubr.msk.f32.mxu1 %vm1961_vm11, %v4275_v20  ;;  %v4154_v21 = vpop.permute.xlu0 %4153  ;;  %v3909_v20 = vld [vmem:[#allocation3 + $0x139] sm:$0xff] }
 0x4da   : > { %3598 = vrot.lane.b32.xlu1 %v4093_v16, %s5293_s22  ;;  %4244 = vst.msk [vmem:[#allocation4 + $0x28] sm:$0xff] %vm1891_vm10, %v4154_v21  ;;  %v3142_v16 = vld [vmem:[#allocation3 + $0x138] sm:$0xff] }
 0x4db   : > { %3408 = vrot.lane.b32.xlu0 %v3902_v51, %s5292_s21 }
 0x4dc   : > { %v3199_v57 = vpop.permute.xlu1 %3198 }
 0x4dd   : > { %3286 = vst.msk [vmem:[#allocation4 + $0x40] sm:$0xff] %vm925_vm4, %v3199_v57  ;;  %v3772_v31 = vpop.permute.xlu0 %3771  ;;  %v3718_v57 = vld [vmem:[#allocation3 + $0x140] sm:$0xff] }
 0x4de   : > { %3600 = vrot.lane.b32.xlu1 %v3519_v35, %s5293_s22  ;;  %3861 = vst.msk [vmem:[#allocation4 + $0x30] sm:$0xff] %vm1505_vm8, %v3772_v31 }
 0x4df   : > { %4173 = vrot.lane.b32.xlu0 %v3519_v35, %s5296_s8 }
 0x4e0   : > { %v3964_v54 = vpop.permute.xlu1 %3963 }
 0x4e1   : > { %4053 = vst.msk [vmem:[#allocation4 + $0x30] sm:$0xff] %vm1698_vm9, %v3964_v54  ;;  %v3774_v59 = vpop.permute.xlu0 %3773  ;;  %v4276_v41 = vld [vmem:[#allocation4 + $0x28] sm:$0xff] }
 0x4e2   : > { %3218 = vrot.lane.b32.xlu1 %v6961_v4, %s5291_s20  ;;  %3862 = vst.msk [vmem:[#allocation4 + $0x38] sm:$0xff] %vm1505_vm8, %v3774_v59  ;;  %5220 = vmatmul.mubr.msk.f32.gmra.mxu1 %vm1961_vm11, %v4276_v41  ;;  %v4101_v59 = vld [vmem:[#allocation3 + $0x13a] sm:$0xff] }
 0x4e3   : > { %3791 = vrot.lane.b32.xlu0 %v6961_v4, %s5294_s4 }
 0x4e4   : > { %v3391_v32 = vpop.permute.xlu1 %3390 }
 0x4e5   : > { %3478 = vst.msk [vmem:[#allocation4 + $0x40] sm:$0xff] %vm1118_vm6, %v3391_v32  ;;  %v3201_v47 = vpop.permute.xlu0 %3200  ;;  %v3910_v32 = vld [vmem:[#allocation3 + $0x141] sm:$0xff] }
 0x4e6   : > { %3983 = vrot.lane.b32.xlu1 %v3903_v43, %s5295_s7  ;;  %3287 = vst.msk [vmem:[#allocation4 + $0x48] sm:$0xff] %vm925_vm4, %v3201_v47 }
 0x4e7   : > { %3793 = vrot.lane.b32.xlu0 %v6959_v12, %s5294_s4 }
 0x4e8   : > { %v4156_v7 = vpop.permute.xlu1 %4155 }
 0x4e9   : > { %4245 = vst.msk [vmem:[#allocation4 + $0x30] sm:$0xff] %vm1891_vm10, %v4156_v7  ;;  %v3966_v5 = vpop.permute.xlu0 %3965 }
 0x4ea   : > { %3410 = vrot.lane.b32.xlu1 %v3903_v43, %s5292_s21  ;;  %4054 = vst.msk [vmem:[#allocation4 + $0x38] sm:$0xff] %vm1698_vm9, %v3966_v5 }
 0x4eb   : > { %3220 = vrot.lane.b32.xlu0 %v6959_v12, %s5291_s20 }
 0x4ec   : > { %v3583_v4 = vpop.permute.xlu1 %3582 }
 0x4ed   : > { %3670 = vst.msk [vmem:[#allocation4 + $0x40] sm:$0xff] %vm1311_vm7, %v3583_v4  ;;  %v3393_v48 = vpop.permute.xlu0 %3392  ;;  %v3527_v4 = vld [vmem:[#allocation3 + $0x142] sm:$0xff] }
 0x4ee   : > { %4175 = vrot.lane.b32.xlu1 %v4095_v11, %s5296_s8  ;;  %3479 = vst.msk [vmem:[#allocation4 + $0x48] sm:$0xff] %vm1118_vm6, %v3393_v48 }
 0x4ef   : > { %3985 = vrot.lane.b32.xlu0 %v3904_v44, %s5295_s7 }
 0x4f0   : > { %v3585_v19 = vpop.permute.xlu1 %3584  ;;  %v4277_v24 = vld [vmem:[#allocation4 + $0x30] sm:$0xff] }
 0x4f1   : > { %3671 = vst.msk [vmem:[#allocation4 + $0x48] sm:$0xff] %vm1311_vm7, %v3585_v19  ;;  %5222 = vmatprep.mubr.msk.f32.mxu1 %vm1961_vm11, %v4277_v24  ;;  %v4158_v12 = vpop.permute.xlu0 %4157 }
 0x4f2   : > { %3602 = vrot.lane.b32.xlu1 %v4095_v11, %s5293_s22  ;;  %4246 = vst.msk [vmem:[#allocation4 + $0x38] sm:$0xff] %vm1891_vm10, %v4158_v12 }
 0x4f3   : > { %3412 = vrot.lane.b32.xlu0 %v3904_v44, %s5292_s21  ;;  %v3144_v44 = vld [vmem:[#allocation3 + $0x150] sm:$0xff] }
 0x4f4   : > { %v3203_v58 = vpop.permute.xlu1 %3202 }
 0x4f5   : > { %3288 = vst.msk [vmem:[#allocation4 + $0x50] sm:$0xff] %vm925_vm4, %v3203_v58  ;;  %v3776_v46 = vpop.permute.xlu0 %3775  ;;  %v3911_v58 = vld [vmem:[#allocation3 + $0x151] sm:$0xff] }
 0x4f6   : > { %3604 = vrot.lane.b32.xlu1 %v3521_v63, %s5293_s22  ;;  %3863 = vst.msk [vmem:[#allocation4 + $0x40] sm:$0xff] %vm1505_vm8, %v3776_v46  ;;  %v3720_v46 = vld [vmem:[#allocation3 + $0x158] sm:$0xff] }
 0x4f7   : > { %4177 = vrot.lane.b32.xlu0 %v3521_v63, %s5296_s8 }
 0x4f8   : > { %v3968_v62 = vpop.permute.xlu1 %3967 }
 0x4f9   : > { %4055 = vst.msk [vmem:[#allocation4 + $0x40] sm:$0xff] %vm1698_vm9, %v3968_v62  ;;  %v3778_v56 = vpop.permute.xlu0 %3777  ;;  %v4278_v53 = vld [vmem:[#allocation4 + $0x38] sm:$0xff] }
 0x4fa   : > { %3222 = vrot.lane.b32.xlu1 %v6972_v8, %s5291_s20  ;;  %3864 = vst.msk [vmem:[#allocation4 + $0x48] sm:$0xff] %vm1505_vm8, %v3778_v56  ;;  %5223 = vmatmul.mubr.msk.f32.gmra.mxu1 %vm1961_vm11, %v4278_v53 }
 0x4fb   : > { %3795 = vrot.lane.b32.xlu0 %v6972_v8, %s5294_s4 }
 0x4fc   : > { %v3395_v52 = vpop.permute.xlu1 %3394 }
 0x4fd   : > { %3480 = vst.msk [vmem:[#allocation4 + $0x50] sm:$0xff] %vm1118_vm6, %v3395_v52  ;;  %v3205_v30 = vpop.permute.xlu0 %3204  ;;  %v4103_v52 = vld [vmem:[#allocation3 + $0x152] sm:$0xff] }
 0x4fe   : > { %3987 = vrot.lane.b32.xlu1 %v3905_v9, %s5295_s7  ;;  %3289 = vst.msk [vmem:[#allocation4 + $0x58] sm:$0xff] %vm925_vm4, %v3205_v30  ;;  %v3912_v30 = vld [vmem:[#allocation3 + $0x159] sm:$0xff] }
 0x4ff   : > { %3797 = vrot.lane.b32.xlu0 %v6963_v2, %s5294_s4 }
 0x500   : > { %v4160_v42 = vpop.permute.xlu1 %4159 }
 0x501   : > { %4247 = vst.msk [vmem:[#allocation4 + $0x40] sm:$0xff] %vm1891_vm10, %v4160_v42  ;;  %v3970_v36 = vpop.permute.xlu0 %3969 }
 0x502   : > { %3414 = vrot.lane.b32.xlu1 %v3905_v9, %s5292_s21  ;;  %4056 = vst.msk [vmem:[#allocation4 + $0x48] sm:$0xff] %vm1698_vm9, %v3970_v36 }
 0x503   : > { %3224 = vrot.lane.b32.xlu0 %v6963_v2, %s5291_s20 }
 0x504   : > { %v3587_v8 = vpop.permute.xlu1 %3586 }
 0x505   : > { %3672 = vst.msk [vmem:[#allocation4 + $0x50] sm:$0xff] %vm1311_vm7, %v3587_v8  ;;  %v3397_v33 = vpop.permute.xlu0 %3396 }
 0x506   : > { %4179 = vrot.lane.b32.xlu1 %v4097_v55, %s5296_s8  ;;  %3481 = vst.msk [vmem:[#allocation4 + $0x58] sm:$0xff] %vm1118_vm6, %v3397_v33  ;;  %v3529_v33 = vld [vmem:[#allocation3 + $0x15a] sm:$0xff] }
 0x507   : > { %3989 = vrot.lane.b32.xlu0 %v3906_v25, %s5295_s7 }
 0x508   : > { %v3589_v61 = vpop.permute.xlu1 %3588  ;;  %v4279_v37 = vld [vmem:[#allocation4 + $0x40] sm:$0xff] }
 0x509   : > { %3673 = vst.msk [vmem:[#allocation4 + $0x58] sm:$0xff] %vm1311_vm7, %v3589_v61  ;;  %5225 = vmatprep.mubr.msk.f32.mxu1 %vm1961_vm11, %v4279_v37  ;;  %v4162_v2 = vpop.permute.xlu0 %4161  ;;  %v3146_v37 = vld [vmem:[#allocation3 + $0x168] sm:$0xff] }
 0x50a   : > { %3606 = vrot.lane.b32.xlu1 %v4097_v55, %s5293_s22  ;;  %4248 = vst.msk [vmem:[#allocation4 + $0x48] sm:$0xff] %vm1891_vm10, %v4162_v2 }
 0x50b   : > { %3416 = vrot.lane.b32.xlu0 %v3906_v25, %s5292_s21 }
 0x50c   : > { %v3207_v22 = vpop.permute.xlu1 %3206 }
 0x50d   : > { %3290 = vst.msk [vmem:[#allocation4 + $0x60] sm:$0xff] %vm925_vm4, %v3207_v22  ;;  %v3780_v0 = vpop.permute.xlu0 %3779 }
 0x50e   : > { %3608 = vrot.lane.b32.xlu1 %v3523_v38, %s5293_s22  ;;  %3865 = vst.msk [vmem:[#allocation4 + $0x50] sm:$0xff] %vm1505_vm8, %v3780_v0  ;;  %v3913_v0 = vld [vmem:[#allocation3 + $0x169] sm:$0xff] }
 0x50f   : > { %4181 = vrot.lane.b32.xlu0 %v3523_v38, %s5296_s8 }
 0x510   : > { %v3972_v26 = vpop.permute.xlu1 %3971 }
 0x511   : > { %4057 = vst.msk [vmem:[#allocation4 + $0x50] sm:$0xff] %vm1698_vm9, %v3972_v26  ;;  %v3782_v1 = vpop.permute.xlu0 %3781  ;;  %v4280_v17 = vld [vmem:[#allocation4 + $0x48] sm:$0xff] }
 0x512   : > { %3226 = vrot.lane.b32.xlu1 %v6980_v10, %s5291_s20  ;;  %3866 = vst.msk [vmem:[#allocation4 + $0x58] sm:$0xff] %vm1505_vm8, %v3782_v1  ;;  %5226 = vmatmul.mubr.msk.f32.gmra.mxu1 %vm1961_vm11, %v4280_v17  ;;  %v3722_v1 = vld [vmem:[#allocation3 + $0x170] sm:$0xff] }
 0x513   : > { %3799 = vrot.lane.b32.xlu0 %v6980_v10, %s5294_s4 }
 0x514   : > { %v3399_v14 = vpop.permute.xlu1 %3398 }
 0x515   : > { %3482 = vst.msk [vmem:[#allocation4 + $0x60] sm:$0xff] %vm1118_vm6, %v3399_v14  ;;  %v3209_v3 = vpop.permute.xlu0 %3208 }
 0x516   : > { %3991 = vrot.lane.b32.xlu1 %v3907_v6, %s5295_s7  ;;  %3291 = vst.msk [vmem:[#allocation4 + $0x68] sm:$0xff] %vm925_vm4, %v3209_v3  ;;  %v4105_v3 = vld [vmem:[#allocation3 + $0x16a] sm:$0xff] }
 0x517   : > { %3801 = vrot.lane.b32.xlu0 %v6974_v39, %s5294_s4 }
 0x518   : > { %v4164_v50 = vpop.permute.xlu1 %4163 }
 0x519   : > { %4249 = vst.msk [vmem:[#allocation4 + $0x50] sm:$0xff] %vm1891_vm10, %v4164_v50  ;;  %v3974_v15 = vpop.permute.xlu0 %3973 }
 0x51a   : > { %3418 = vrot.lane.b32.xlu1 %v3907_v6, %s5292_s21  ;;  %4058 = vst.msk [vmem:[#allocation4 + $0x58] sm:$0xff] %vm1698_vm9, %v3974_v15  ;;  %v3914_v15 = vld [vmem:[#allocation3 + $0x171] sm:$0xff] }
 0x51b   : > { %3228 = vrot.lane.b32.xlu0 %v6974_v39, %s5291_s20 }
 0x51c   : > { %v3591_v10 = vpop.permute.xlu1 %3590 }
 0x51d   : > { %3674 = vst.msk [vmem:[#allocation4 + $0x60] sm:$0xff] %vm1311_vm7, %v3591_v10  ;;  %v3401_v29 = vpop.permute.xlu0 %3400 }
 0x51e   : > { %4183 = vrot.lane.b32.xlu1 %v4099_v45, %s5296_s8  ;;  %3483 = vst.msk [vmem:[#allocation4 + $0x68] sm:$0xff] %vm1118_vm6, %v3401_v29 }
 0x51f   : > { %3993 = vrot.lane.b32.xlu0 %v3908_v18, %s5295_s7 }
 0x520   : > { %v3593_v28 = vpop.permute.xlu1 %3592  ;;  %v4281_v49 = vld [vmem:[#allocation4 + $0x50] sm:$0xff] }
 0x521   : > { %3675 = vst.msk [vmem:[#allocation4 + $0x68] sm:$0xff] %vm1311_vm7, %v3593_v28  ;;  %5228 = vmatprep.mubr.msk.f32.mxu1 %vm1961_vm11, %v4281_v49  ;;  %v4166_v39 = vpop.permute.xlu0 %4165  ;;  %v3531_v28 = vld [vmem:[#allocation3 + $0x172] sm:$0xff] }
 0x522   : > { %3610 = vrot.lane.b32.xlu1 %v4099_v45, %s5293_s22  ;;  %4250 = vst.msk [vmem:[#allocation4 + $0x58] sm:$0xff] %vm1891_vm10, %v4166_v39 }
 0x523   : > { %3420 = vrot.lane.b32.xlu0 %v3908_v18, %s5292_s21 }
 0x524   : > { %v3211_v23 = vpop.permute.xlu1 %3210 }
 0x525   : > { %3292 = vst.msk [vmem:[#allocation4 + $0x70] sm:$0xff] %vm925_vm4, %v3211_v23  ;;  %v3784_v27 = vpop.permute.xlu0 %3783  ;;  %v3148_v23 = vld [vmem:[#allocation3 + $0x180] sm:$0xff] }
 0x526   : > { %3612 = vrot.lane.b32.xlu1 %v3525_v34, %s5293_s22  ;;  %3867 = vst.msk [vmem:[#allocation4 + $0x60] sm:$0xff] %vm1505_vm8, %v3784_v27 }
 0x527   : > { %4185 = vrot.lane.b32.xlu0 %v3525_v34, %s5296_s8 }
 0x528   : > { %v3976_v40 = vpop.permute.xlu1 %3975 }
 0x529   : > { %4059 = vst.msk [vmem:[#allocation4 + $0x60] sm:$0xff] %vm1698_vm9, %v3976_v40  ;;  %v3786_v13 = vpop.permute.xlu0 %3785  ;;  %v4282_v51 = vld [vmem:[#allocation4 + $0x58] sm:$0xff] }
 0x52a   : > { %3230 = vrot.lane.b32.xlu1 %v3142_v16, %s5291_s20  ;;  %3868 = vst.msk [vmem:[#allocation4 + $0x68] sm:$0xff] %vm1505_vm8, %v3786_v13  ;;  %5229 = vmatmul.mubr.msk.f32.gmra.mxu1 %vm1961_vm11, %v4282_v51  ;;  %v3724_v51 = vld [vmem:[#allocation3 + $0x188] sm:$0xff] }
 0x52b   : > { %3803 = vrot.lane.b32.xlu0 %v3142_v16, %s5294_s4  ;;  %v3915_v16 = vld [vmem:[#allocation3 + $0x181] sm:$0xff] }
 0x52c   : > { %v3403_v60 = vpop.permute.xlu1 %3402 }
 0x52d   : > { %3484 = vst.msk [vmem:[#allocation4 + $0x70] sm:$0xff] %vm1118_vm6, %v3403_v60  ;;  %v3213_v21 = vpop.permute.xlu0 %3212 }
 0x52e   : > { %3995 = vrot.lane.b32.xlu1 %v3909_v20, %s5295_s7  ;;  %3293 = vst.msk [vmem:[#allocation4 + $0x78] sm:$0xff] %vm925_vm4, %v3213_v21 }
 0x52f   : > { %3805 = vrot.lane.b32.xlu0 %v3718_v57, %s5294_s4 }
 0x530   : > { %v4168_v35 = vpop.permute.xlu1 %4167 }
 0x531   : > { %4251 = vst.msk [vmem:[#allocation4 + $0x60] sm:$0xff] %vm1891_vm10, %v4168_v35  ;;  %v3978_v31 = vpop.permute.xlu0 %3977 }
 0x532   : > { %3422 = vrot.lane.b32.xlu1 %v3909_v20, %s5292_s21  ;;  %4060 = vst.msk [vmem:[#allocation4 + $0x68] sm:$0xff] %vm1698_vm9, %v3978_v31  ;;  %v3916_v31 = vld [vmem:[#allocation3 + $0x189] sm:$0xff] }
 0x533   : > { %3232 = vrot.lane.b32.xlu0 %v3718_v57, %s5291_s20  ;;  %v4107_v57 = vld [vmem:[#allocation3 + $0x182] sm:$0xff] }
 0x534   : > { %v3595_v54 = vpop.permute.xlu1 %3594 }
 0x535   : > { %3676 = vst.msk [vmem:[#allocation4 + $0x70] sm:$0xff] %vm1311_vm7, %v3595_v54  ;;  %v3405_v41 = vpop.permute.xlu0 %3404 }
 0x536   : > { %4187 = vrot.lane.b32.xlu1 %v4101_v59, %s5296_s8  ;;  %3485 = vst.msk [vmem:[#allocation4 + $0x78] sm:$0xff] %vm1118_vm6, %v3405_v41 }
 0x537   : > { %3997 = vrot.lane.b32.xlu0 %v3910_v32, %s5295_s7 }
 0x538   : > { %v3597_v43 = vpop.permute.xlu1 %3596  ;;  %v4283_v47 = vld [vmem:[#allocation4 + $0x60] sm:$0xff] }
 0x539   : > { %3677 = vst.msk [vmem:[#allocation4 + $0x78] sm:$0xff] %vm1311_vm7, %v3597_v43  ;;  %5231 = vmatprep.mubr.msk.f32.mxu1 %vm1961_vm11, %v4283_v47  ;;  %v4170_v7 = vpop.permute.xlu0 %4169  ;;  %v3533_v43 = vld [vmem:[#allocation3 + $0x18a] sm:$0xff] }
 0x53a   : > { %3614 = vrot.lane.b32.xlu1 %v4101_v59, %s5293_s22  ;;  %4252 = vst.msk [vmem:[#allocation4 + $0x68] sm:$0xff] %vm1891_vm10, %v4170_v7 }
 0x53b   : > { %3424 = vrot.lane.b32.xlu0 %v3910_v32, %s5292_s21 }
 0x53c   : > { %v3215_v5 = vpop.permute.xlu1 %3214 }
 0x53d   : > { %3294 = vst.msk [vmem:[#allocation4 + $0x80] sm:$0xff] %vm925_vm4, %v3215_v5  ;;  %v3788_v11 = vpop.permute.xlu0 %3787  ;;  %v3726_v5 = vld [vmem:[#allocation3 + $0x1a0] sm:$0xff] }
 0x53e   : > { %3616 = vrot.lane.b32.xlu1 %v3527_v4, %s5293_s22  ;;  %3869 = vst.msk [vmem:[#allocation4 + $0x70] sm:$0xff] %vm1505_vm8, %v3788_v11 }
 0x53f   : > { %4189 = vrot.lane.b32.xlu0 %v3527_v4, %s5296_s8 }
 0x540   : > { %v3980_v48 = vpop.permute.xlu1 %3979 }
 0x541   : > { %4061 = vst.msk [vmem:[#allocation4 + $0x70] sm:$0xff] %vm1698_vm9, %v3980_v48  ;;  %v3790_v19 = vpop.permute.xlu0 %3789  ;;  %v4284_v24 = vld [vmem:[#allocation4 + $0x68] sm:$0xff] }
 0x542   : > { %3234 = vrot.lane.b32.xlu1 %v3144_v44, %s5291_s20  ;;  %3870 = vst.msk [vmem:[#allocation4 + $0x78] sm:$0xff] %vm1505_vm8, %v3790_v19  ;;  %5232 = vmatmul.mubr.msk.f32.gmra.mxu1 %vm1961_vm11, %v4284_v24  ;;  %v3725_v48 = vld [vmem:[#allocation3 + $0x198] sm:$0xff]  ;;  %v3918_v19 = vld [vmem:[#allocation3 + $0x1a1] sm:$0xff] }
 0x543   : > { %3807 = vrot.lane.b32.xlu0 %v3144_v44, %s5294_s4 }
 0x544   : > { %v3407_v12 = vpop.permute.xlu1 %3406 }
 0x545   : > { %3486 = vst.msk [vmem:[#allocation4 + $0x80] sm:$0xff] %vm1118_vm6, %v3407_v12  ;;  %v3217_v63 = vpop.permute.xlu0 %3216  ;;  %v3917_v12 = vld [vmem:[#allocation3 + $0x199] sm:$0xff] }
 0x546   : > { %3999 = vrot.lane.b32.xlu1 %v3911_v58, %s5295_s7  ;;  %3295 = vst.msk [vmem:[#allocation4 + $0x88] sm:$0xff] %vm925_vm4, %v3217_v63  ;;  %v4110_v63 = vld [vmem:[#allocation3 + $0x1a2] sm:$0xff] }
 0x547   : > { %3809 = vrot.lane.b32.xlu0 %v3720_v46, %s5294_s4 }
 0x548   : > { %v4172_v62 = vpop.permute.xlu1 %4171 }
 0x549   : > { %4253 = vst.msk [vmem:[#allocation4 + $0x70] sm:$0xff] %vm1891_vm10, %v4172_v62  ;;  %v3982_v56 = vpop.permute.xlu0 %3981  ;;  %v4109_v62 = vld [vmem:[#allocation3 + $0x19a] sm:$0xff] }
 0x54a   : > { %3426 = vrot.lane.b32.xlu1 %v3911_v58, %s5292_s21  ;;  %4062 = vst.msk [vmem:[#allocation4 + $0x78] sm:$0xff] %vm1698_vm9, %v3982_v56 }
 0x54b   : > { %3236 = vrot.lane.b32.xlu0 %v3720_v46, %s5291_s20 }
 0x54c   : > { %v3599_v53 = vpop.permute.xlu1 %3598 }
 0x54d   : > { %3678 = vst.msk [vmem:[#allocation4 + $0x80] sm:$0xff] %vm1311_vm7, %v3599_v53  ;;  %v3409_v9 = vpop.permute.xlu0 %3408 }
 0x54e   : > { %4191 = vrot.lane.b32.xlu1 %v4103_v52, %s5296_s8  ;;  %3487 = vst.msk [vmem:[#allocation4 + $0x88] sm:$0xff] %vm1118_vm6, %v3409_v9 }
 0x54f   : > { %4001 = vrot.lane.b32.xlu0 %v3912_v30, %s5295_s7 }
 0x550   : > { %v3601_v42 = vpop.permute.xlu1 %3600  ;;  %v4285_v36 = vld [vmem:[#allocation4 + $0x70] sm:$0xff] }
 0x551   : > { %3679 = vst.msk [vmem:[#allocation4 + $0x88] sm:$0xff] %vm1311_vm7, %v3601_v42  ;;  %5234 = vmatprep.mubr.msk.f32.mxu1 %vm1961_vm11, %v4285_v36  ;;  %v4174_v8 = vpop.permute.xlu0 %4173 }
 0x552   : > { %3618 = vrot.lane.b32.xlu1 %v4103_v52, %s5293_s22  ;;  %4254 = vst.msk [vmem:[#allocation4 + $0x78] sm:$0xff] %vm1891_vm10, %v4174_v8 }
 0x553   : > { %3428 = vrot.lane.b32.xlu0 %v3912_v30, %s5292_s21 }
 0x554   : > { %v3219_v55 = vpop.permute.xlu1 %3218 }
 0x555   : > { %3296 = vst.msk [vmem:[#allocation4 + $0x90] sm:$0xff] %vm925_vm4, %v3219_v55  ;;  %v3792_v25 = vpop.permute.xlu0 %3791 }
 0x556   : > { %3620 = vrot.lane.b32.xlu1 %v3529_v33, %s5293_s22  ;;  %3871 = vst.msk [vmem:[#allocation4 + $0x80] sm:$0xff] %vm1505_vm8, %v3792_v25 }
 0x557   : > { %4193 = vrot.lane.b32.xlu0 %v3529_v33, %s5296_s8 }
 0x558   : > { %v3984_v61 = vpop.permute.xlu1 %3983 }
 0x559   : > { %4063 = vst.msk [vmem:[#allocation4 + $0x80] sm:$0xff] %vm1698_vm9, %v3984_v61  ;;  %v3794_v2 = vpop.permute.xlu0 %3793  ;;  %v4286_v22 = vld [vmem:[#allocation4 + $0x78] sm:$0xff] }
 0x55a   : > { %3238 = vrot.lane.b32.xlu1 %v3146_v37, %s5291_s20  ;;  %3872 = vst.msk [vmem:[#allocation4 + $0x88] sm:$0xff] %vm1505_vm8, %v3794_v2  ;;  %5235 = vmatmul.mubr.msk.f32.gmra.mxu1 %vm1961_vm11, %v4286_v22 }
 0x55b   : > { %3811 = vrot.lane.b32.xlu0 %v3146_v37, %s5294_s4 }
 0x55c   : > { %v3411_v38 = vpop.permute.xlu1 %3410 }
 0x55d   : > { %3488 = vst.msk [vmem:[#allocation4 + $0x90] sm:$0xff] %vm1118_vm6, %v3411_v38  ;;  %v3221_v26 = vpop.permute.xlu0 %3220 }
 0x55e   : > { %4003 = vrot.lane.b32.xlu1 %v3913_v0, %s5295_s7  ;;  %3297 = vst.msk [vmem:[#allocation4 + $0x98] sm:$0xff] %vm925_vm4, %v3221_v26 }
 0x55f   : > { %3813 = vrot.lane.b32.xlu0 %v3722_v1, %s5294_s4 }
 0x560   : > { %v4176_v17 = vpop.permute.xlu1 %4175 }
 0x561   : > { %4255 = vst.msk [vmem:[#allocation4 + $0x80] sm:$0xff] %vm1891_vm10, %v4176_v17  ;;  %v3986_v14 = vpop.permute.xlu0 %3985 }
 0x562   : > { %3430 = vrot.lane.b32.xlu1 %v3913_v0, %s5292_s21  ;;  %4064 = vst.msk [vmem:[#allocation4 + $0x88] sm:$0xff] %vm1698_vm9, %v3986_v14 }
 0x563   : > { %3240 = vrot.lane.b32.xlu0 %v3722_v1, %s5291_s20 }
 0x564   : > { %v3603_v6 = vpop.permute.xlu1 %3602 }
 0x565   : > { %3680 = vst.msk [vmem:[#allocation4 + $0x90] sm:$0xff] %vm1311_vm7, %v3603_v6  ;;  %v3413_v50 = vpop.permute.xlu0 %3412 }
 0x566   : > { %4195 = vrot.lane.b32.xlu1 %v4105_v3, %s5296_s8  ;;  %3489 = vst.msk [vmem:[#allocation4 + $0x98] sm:$0xff] %vm1118_vm6, %v3413_v50 }
 0x567   : > { %4005 = vrot.lane.b32.xlu0 %v3914_v15, %s5295_s7 }
 0x568   : > { %v3605_v10 = vpop.permute.xlu1 %3604  ;;  %v4287_v45 = vld [vmem:[#allocation4 + $0x80] sm:$0xff] }
 0x569   : > { %3681 = vst.msk [vmem:[#allocation4 + $0x98] sm:$0xff] %vm1311_vm7, %v3605_v10  ;;  %5237 = vmatprep.mubr.msk.f32.mxu1 %vm1961_vm11, %v4287_v45  ;;  %v4178_v29 = vpop.permute.xlu0 %4177 }
 0x56a   : > { %3622 = vrot.lane.b32.xlu1 %v4105_v3, %s5293_s22  ;;  %4256 = vst.msk [vmem:[#allocation4 + $0x88] sm:$0xff] %vm1891_vm10, %v4178_v29 }
 0x56b   : > { %3432 = vrot.lane.b32.xlu0 %v3914_v15, %s5292_s21 }
 0x56c   : > { %v3223_v18 = vpop.permute.xlu1 %3222 }
 0x56d   : > { %3298 = vst.msk [vmem:[#allocation4 + $0xa0] sm:$0xff] %vm925_vm4, %v3223_v18  ;;  %v3796_v49 = vpop.permute.xlu0 %3795 }
 0x56e   : > { %3624 = vrot.lane.b32.xlu1 %v3531_v28, %s5293_s22  ;;  %3873 = vst.msk [vmem:[#allocation4 + $0x90] sm:$0xff] %vm1505_vm8, %v3796_v49 }
 0x56f   : > { %4197 = vrot.lane.b32.xlu0 %v3531_v28, %s5296_s8 }
 0x570   : > { %v3988_v39 = vpop.permute.xlu1 %3987 }
 0x571   : > { %4065 = vst.msk [vmem:[#allocation4 + $0x90] sm:$0xff] %vm1698_vm9, %v3988_v39  ;;  %v3798_v34 = vpop.permute.xlu0 %3797  ;;  %v4288_v27 = vld [vmem:[#allocation4 + $0x88] sm:$0xff] }
 0x572   : > { %3242 = vrot.lane.b32.xlu1 %v3148_v23, %s5291_s20  ;;  %3874 = vst.msk [vmem:[#allocation4 + $0x98] sm:$0xff] %vm1505_vm8, %v3798_v34  ;;  %5238 = vmatmul.mubr.msk.f32.gmra.mxu1 %vm1961_vm11, %v4288_v27 }
 0x573   : > { %3815 = vrot.lane.b32.xlu0 %v3148_v23, %s5294_s4 }
 0x574   : > { %v3415_v40 = vpop.permute.xlu1 %3414 }
 0x575   : > { %3490 = vst.msk [vmem:[#allocation4 + $0xa0] sm:$0xff] %vm1118_vm6, %v3415_v40  ;;  %v3225_v13 = vpop.permute.xlu0 %3224 }
 0x576   : > { %4007 = vrot.lane.b32.xlu1 %v3915_v16, %s5295_s7  ;;  %3299 = vst.msk [vmem:[#allocation4 + $0xa8] sm:$0xff] %vm925_vm4, %v3225_v13 }
 0x577   : > { %3817 = vrot.lane.b32.xlu0 %v3724_v51, %s5294_s4 }
 0x578   : > { %v4180_v60 = vpop.permute.xlu1 %4179 }
 0x579   : > { %4257 = vst.msk [vmem:[#allocation4 + $0x90] sm:$0xff] %vm1891_vm10, %v4180_v60  ;;  %v3990_v20 = vpop.permute.xlu0 %3989 }
 0x57a   : > { %3434 = vrot.lane.b32.xlu1 %v3915_v16, %s5292_s21  ;;  %4066 = vst.msk [vmem:[#allocation4 + $0x98] sm:$0xff] %vm1698_vm9, %v3990_v20 }
 0x57b   : > { %3244 = vrot.lane.b32.xlu0 %v3724_v51, %s5291_s20 }
 0x57c   : > { %v3607_v21 = vpop.permute.xlu1 %3606 }
 0x57d   : > { %3682 = vst.msk [vmem:[#allocation4 + $0xa0] sm:$0xff] %vm1311_vm7, %v3607_v21  ;;  %v3417_v35 = vpop.permute.xlu0 %3416 }
 0x57e   : > { %4199 = vrot.lane.b32.xlu1 %v4107_v57, %s5296_s8  ;;  %3491 = vst.msk [vmem:[#allocation4 + $0xa8] sm:$0xff] %vm1118_vm6, %v3417_v35 }
 0x57f   : > { %4009 = vrot.lane.b32.xlu0 %v3916_v31, %s5295_s7 }
 0x580   : > { %v3609_v54 = vpop.permute.xlu1 %3608  ;;  %v4289_v59 = vld [vmem:[#allocation4 + $0x90] sm:$0xff] }
 0x581   : > { %3683 = vst.msk [vmem:[#allocation4 + $0xa8] sm:$0xff] %vm1311_vm7, %v3609_v54  ;;  %5240 = vmatprep.mubr.msk.f32.mxu1 %vm1961_vm11, %v4289_v59  ;;  %v4182_v41 = vpop.permute.xlu0 %4181 }
 0x582   : > { %3626 = vrot.lane.b32.xlu1 %v4107_v57, %s5293_s22  ;;  %4258 = vst.msk [vmem:[#allocation4 + $0x98] sm:$0xff] %vm1891_vm10, %v4182_v41 }
 0x583   : > { %3436 = vrot.lane.b32.xlu0 %v3916_v31, %s5292_s21 }
 0x584   : > { %v3227_v32 = vpop.permute.xlu1 %3226 }
 0x585   : > { %3300 = vst.msk [vmem:[#allocation4 + $0xb0] sm:$0xff] %vm925_vm4, %v3227_v32  ;;  %v3800_v47 = vpop.permute.xlu0 %3799 }
 0x586   : > { %3628 = vrot.lane.b32.xlu1 %v3533_v43, %s5293_s22  ;;  %3875 = vst.msk [vmem:[#allocation4 + $0xa0] sm:$0xff] %vm1505_vm8, %v3800_v47  ;;  %s7980_s22 = scalar_lea.vmem %s8084_s3, %s5069_s14 }
 0x587   : > { %4201 = vrot.lane.b32.xlu0 %v3533_v43, %s5296_s8 }
 0x588   : > { %v3992_v7 = vpop.permute.xlu1 %3991 }
 0x589   : > { %4067 = vst.msk [vmem:[#allocation4 + $0xa0] sm:$0xff] %vm1698_vm9, %v3992_v7  ;;  %v3802_v4 = vpop.permute.xlu0 %3801  ;;  %v4290_v11 = vld [vmem:[#allocation4 + $0x98] sm:$0xff] }
 0x58a   : > { %3821 = vrot.lane.b32.xlu1 %v3726_v5, %s5294_s4  ;;  %3876 = vst.msk [vmem:[#allocation4 + $0xa8] sm:$0xff] %vm1505_vm8, %v3802_v4  ;;  %5241 = vmatmul.mubr.msk.f32.gmra.mxu1 %vm1961_vm11, %v4290_v11 }
 0x58b   : > { %3819 = vrot.lane.b32.xlu0 %v3725_v48, %s5294_s4 }
 0x58c   : > { %v3419_v44 = vpop.permute.xlu1 %3418 }
 0x58d   : > { %3492 = vst.msk [vmem:[#allocation4 + $0xb0] sm:$0xff] %vm1118_vm6, %v3419_v44  ;;  %v3229_v24 = vpop.permute.xlu0 %3228 }
 0x58e   : > { %4013 = vrot.lane.b32.xlu1 %v3918_v19, %s5295_s7  ;;  %3301 = vst.msk [vmem:[#allocation4 + $0xb8] sm:$0xff] %vm925_vm4, %v3229_v24 }
 0x58f   : > { %4011 = vrot.lane.b32.xlu0 %v3917_v12, %s5295_s7 }
 0x590   : > { %v4184_v58 = vpop.permute.xlu1 %4183 }
 0x591   : > { %4259 = vst.msk [vmem:[#allocation4 + $0xa0] sm:$0xff] %vm1891_vm10, %v4184_v58  ;;  %v3994_v46 = vpop.permute.xlu0 %3993 }
 0x592   : > { %4205 = vrot.lane.b32.xlu1 %v4110_v63, %s5296_s8  ;;  %4068 = vst.msk [vmem:[#allocation4 + $0xa8] sm:$0xff] %vm1698_vm9, %v3994_v46 }
 0x593   : > { %4203 = vrot.lane.b32.xlu0 %v4109_v62, %s5296_s8 }
 0x594   : > { %v3611_v56 = vpop.permute.xlu1 %3610 }
 0x595   : > { %3684 = vst.msk [vmem:[#allocation4 + $0xb0] sm:$0xff] %vm1311_vm7, %v3611_v56  ;;  %v3421_v53 = vpop.permute.xlu0 %3420 }
 0x596   : > { %3493 = vst.msk [vmem:[#allocation4 + $0xb8] sm:$0xff] %vm1118_vm6, %v3421_v53 }
 0x598   : > { %v3613_v52 = vpop.permute.xlu1 %3612  ;;  %v4291_v9 = vld [vmem:[#allocation4 + $0xa0] sm:$0xff] }
 0x599   : > { %3685 = vst.msk [vmem:[#allocation4 + $0xb8] sm:$0xff] %vm1311_vm7, %v3613_v52  ;;  %5243 = vmatprep.mubr.msk.f32.mxu1 %vm1961_vm11, %v4291_v9  ;;  %v4186_v30 = vpop.permute.xlu0 %4185 }
 0x59a   : > { %4260 = vst.msk [vmem:[#allocation4 + $0xa8] sm:$0xff] %vm1891_vm10, %v4186_v30 }
 0x59c   : > { %v3231_v42 = vpop.permute.xlu1 %3230 }
 0x59d   : > { %3302 = vst.msk [vmem:[#allocation4 + $0xc0] sm:$0xff] %vm925_vm4, %v3231_v42  ;;  %v3804_v36 = vpop.permute.xlu0 %3803 }
 0x59e   : > { %3877 = vst.msk [vmem:[#allocation4 + $0xb0] sm:$0xff] %vm1505_vm8, %v3804_v36  ;;  %v7683_v36 = vpop.f32.mrf.mxu1 }
 0x5a0   : > { %v3996_v8 = vpop.permute.xlu1 %3995 }
 0x5a1   : > { %4069 = vst.msk [vmem:[#allocation4 + $0xb0] sm:$0xff] %vm1698_vm9, %v3996_v8  ;;  %v3806_v55 = vpop.permute.xlu0 %3805  ;;  %v4292_v33 = vld [vmem:[#allocation4 + $0xa8] sm:$0xff]  ;;  %v7685_v8 = vpop.f32.mrf.mxu1 }
 0x5a2   : > { %3878 = vst.msk [vmem:[#allocation4 + $0xb8] sm:$0xff] %vm1505_vm8, %v3806_v55  ;;  %5244 = vmatmul.mubr.msk.f32.gmra.mxu1 %vm1961_vm11, %v4292_v33 }
 0x5a3   : > { %v7687_v55 = vpop.f32.mrf.mxu1 }
 0x5a4   : > { %v3423_v25 = vpop.permute.xlu1 %3422 }
 0x5a5   : > { %3494 = vst.msk [vmem:[#allocation4 + $0xc0] sm:$0xff] %vm1118_vm6, %v3423_v25  ;;  %v3233_v61 = vpop.permute.xlu0 %3232  ;;  %v7689_v33 = vpop.f32.mrf.mxu1  ;;  %v4701_v25 = vmul.f32 %v7685_v8, %v7685_v8 }
 0x5a6   : > { %3303 = vst.msk [vmem:[#allocation4 + $0xc8] sm:$0xff] %vm925_vm4, %v3233_v61 }
 0x5a7   : > { %v7693_v61 = vpop.f32.mrf.mxu1 }
 0x5a8   : > { %v4188_v37 = vpop.permute.xlu1 %4187 }
 0x5a9   : > { %4261 = vst.msk [vmem:[#allocation4 + $0xb0] sm:$0xff] %vm1891_vm10, %v4188_v37  ;;  %v3998_v2 = vpop.permute.xlu0 %3997  ;;  %v4702_v37 = vmul.f32 %v7683_v36, %v7683_v36 }
 0x5aa   : > { %4070 = vst.msk [vmem:[#allocation4 + $0xb8] sm:$0xff] %vm1698_vm9, %v3998_v2  ;;  %v4632_v2 = vsel %vm204_vm0, %v7685_v8, 0.0 }
 0x5ac   : > { %v3615_v22 = vpop.permute.xlu1 %3614 }
 0x5ad   : > { %3686 = vst.msk [vmem:[#allocation4 + $0xc0] sm:$0xff] %vm1311_vm7, %v3615_v22  ;;  %v3425_v38 = vpop.permute.xlu0 %3424  ;;  %v4703_v22 = vmul.f32 %v7689_v33, %v7689_v33 }
 0x5ae   : > { %3495 = vst.msk [vmem:[#allocation4 + $0xc8] sm:$0xff] %vm1118_vm6, %v3425_v38  ;;  %v4633_v38 = vsel %vm204_vm0, %v7683_v36, 0.0 }
 0x5b0   : > { %v3617_v0 = vpop.permute.xlu1 %3616  ;;  %v4293_v26 = vld [vmem:[#allocation4 + $0xb0] sm:$0xff] }
 0x5b1   : > { %3687 = vst.msk [vmem:[#allocation4 + $0xc8] sm:$0xff] %vm1311_vm7, %v3617_v0  ;;  %5246 = vmatprep.mubr.msk.f32.mxu1 %vm1961_vm11, %v4293_v26  ;;  %v4190_v1 = vpop.permute.xlu0 %4189  ;;  %v4733_v0 = vsel %vm204_vm0, %v4701_v25, 0.0  ;;  %v4635_v26 = vsel %vm204_vm0, %v7689_v33, 0.0 }
 0x5b2   : > { %4262 = vst.msk [vmem:[#allocation4 + $0xb8] sm:$0xff] %vm1891_vm10, %v4190_v1  ;;  %v4634_v1 = vadd.f32 %v4633_v38, %v4632_v2 }
 0x5b4   : > { %v3235_v17 = vpop.permute.xlu1 %3234 }
 0x5b5   : > { %3304 = vst.msk [vmem:[#allocation4 + $0xd0] sm:$0xff] %vm925_vm4, %v3235_v17  ;;  %v3808_v14 = vpop.permute.xlu0 %3807  ;;  %v7706_v17 = vpop.f32.mrf.mxu1 }
 0x5b6   : > { %3879 = vst.msk [vmem:[#allocation4 + $0xc0] sm:$0xff] %vm1505_vm8, %v3808_v14  ;;  %v4734_v14 = vsel %vm204_vm0, %v4702_v37, 0.0 }
 0x5b8   : > { %v4000_v6 = vpop.permute.xlu1 %3999 }
 0x5b9   : > { %4071 = vst.msk [vmem:[#allocation4 + $0xc0] sm:$0xff] %vm1698_vm9, %v4000_v6  ;;  %v3810_v3 = vpop.permute.xlu0 %3809  ;;  %v4294_v50 = vld [vmem:[#allocation4 + $0xb8] sm:$0xff]  ;;  %v4736_v6 = vsel %vm204_vm0, %v4703_v22, 0.0 }
 0x5ba   : > { %3880 = vst.msk [vmem:[#allocation4 + $0xc8] sm:$0xff] %vm1505_vm8, %v3810_v3  ;;  %5247 = vmatmul.mubr.msk.f32.gmra.mxu1 %vm1961_vm11, %v4294_v50  ;;  %v4735_v3 = vadd.f32 %v4734_v14, %v4733_v0  ;;  %v4636_v50 = vadd.f32 %v4635_v26, %v4634_v1 }
 0x5bc   : > { %v3427_v15 = vpop.permute.xlu1 %3426 }
 0x5bd   : > { %3496 = vst.msk [vmem:[#allocation4 + $0xd0] sm:$0xff] %vm1118_vm6, %v3427_v15  ;;  %v3237_v10 = vpop.permute.xlu0 %3236  ;;  %v7710_v15 = vpop.f32.mrf.mxu1 }
 0x5be   : > { %3305 = vst.msk [vmem:[#allocation4 + $0xd8] sm:$0xff] %vm925_vm4, %v3237_v10  ;;  %v4704_v10 = vmul.f32 %v7687_v55, %v7687_v55 }
 0x5c0   : > { %v4192_v45 = vpop.permute.xlu1 %4191 }
 0x5c1   : > { %4263 = vst.msk [vmem:[#allocation4 + $0xc0] sm:$0xff] %vm1891_vm10, %v4192_v45  ;;  %v4002_v29 = vpop.permute.xlu0 %4001  ;;  %v4705_v45 = vmul.f32 %v7706_v17, %v7706_v17 }
 0x5c2   : > { %4072 = vst.msk [vmem:[#allocation4 + $0xc8] sm:$0xff] %vm1698_vm9, %v4002_v29  ;;  %v4737_v29 = vadd.f32 %v4736_v6, %v4735_v3 }
 0x5c4   : > { %v3619_v18 = vpop.permute.xlu1 %3618 }
 0x5c5   : > { %3688 = vst.msk [vmem:[#allocation4 + $0xd0] sm:$0xff] %vm1311_vm7, %v3619_v18  ;;  %v3429_v28 = vpop.permute.xlu0 %3428  ;;  %v4637_v18 = vsel %vm204_vm0, %v7687_v55, 0.0 }
 0x5c6   : > { %3497 = vst.msk [vmem:[#allocation4 + $0xd8] sm:$0xff] %vm1118_vm6, %v3429_v28  ;;  %v4639_v28 = vsel %vm204_vm0, %v7706_v17, 0.0 }
 0x5c8   : > { %v3621_v49 = vpop.permute.xlu1 %3620  ;;  %v4295_v39 = vld [vmem:[#allocation4 + $0xc0] sm:$0xff] }
 0x5c9   : > { %3689 = vst.msk [vmem:[#allocation4 + $0xd8] sm:$0xff] %vm1311_vm7, %v3621_v49  ;;  %5249 = vmatprep.mubr.msk.f32.mxu1 %vm1961_vm11, %v4295_v39  ;;  %v4194_v23 = vpop.permute.xlu0 %4193  ;;  %v4638_v49 = vadd.f32 %v4637_v18, %v4636_v50  ;;  %v7720_v39 = vpop.f32.mrf.mxu1 }
 0x5ca   : > { %4264 = vst.msk [vmem:[#allocation4 + $0xc8] sm:$0xff] %vm1891_vm10, %v4194_v23  ;;  %v4738_v23 = vsel %vm204_vm0, %v4704_v10, 0.0 }
 0x5cc   : > { %v3239_v34 = vpop.permute.xlu1 %3238 }
 0x5cd   : > { %3306 = vst.msk [vmem:[#allocation4 + $0xe0] sm:$0xff] %vm925_vm4, %v3239_v34  ;;  %v3812_v27 = vpop.permute.xlu0 %3811  ;;  %v4740_v34 = vsel %vm204_vm0, %v4705_v45, 0.0 }
 0x5ce   : > { %3881 = vst.msk [vmem:[#allocation4 + $0xd0] sm:$0xff] %vm1505_vm8, %v3812_v27  ;;  %v4640_v27 = vadd.f32 %v4639_v28, %v4638_v49 }
 0x5d0   : > { %v4004_v40 = vpop.permute.xlu1 %4003 }
 0x5d1   : > { %4073 = vst.msk [vmem:[#allocation4 + $0xd0] sm:$0xff] %vm1698_vm9, %v4004_v40  ;;  %v3814_v16 = vpop.permute.xlu0 %3813  ;;  %v4296_v13 = vld [vmem:[#allocation4 + $0xc8] sm:$0xff]  ;;  %v4739_v40 = vadd.f32 %v4738_v23, %v4737_v29 }
 0x5d2   : > { %3882 = vst.msk [vmem:[#allocation4 + $0xd8] sm:$0xff] %vm1505_vm8, %v3814_v16  ;;  %5250 = vmatmul.mubr.msk.f32.gmra.mxu1 %vm1961_vm11, %v4296_v13  ;;  %v7724_v16 = vpop.f32.mrf.mxu1  ;;  %v4706_v13 = vmul.f32 %v7693_v61, %v7693_v61 }
 0x5d4   : > { %v3431_v51 = vpop.permute.xlu1 %3430 }
 0x5d5   : > { %3498 = vst.msk [vmem:[#allocation4 + $0xe0] sm:$0xff] %vm1118_vm6, %v3431_v51  ;;  %v3241_v60 = vpop.permute.xlu0 %3240  ;;  %v4707_v51 = vmul.f32 %v7720_v39, %v7720_v39 }
 0x5d6   : > { %3307 = vst.msk [vmem:[#allocation4 + $0xe8] sm:$0xff] %vm925_vm4, %v3241_v60  ;;  %v4741_v60 = vadd.f32 %v4740_v34, %v4739_v40 }
 0x5d8   : > { %v4196_v20 = vpop.permute.xlu1 %4195 }
 0x5d9   : > { %4265 = vst.msk [vmem:[#allocation4 + $0xd0] sm:$0xff] %vm1891_vm10, %v4196_v20  ;;  %v4006_v21 = vpop.permute.xlu0 %4005  ;;  %v4641_v20 = vsel %vm204_vm0, %v7693_v61, 0.0 }
 0x5da   : > { %4074 = vst.msk [vmem:[#allocation4 + $0xd8] sm:$0xff] %vm1698_vm9, %v4006_v21  ;;  %v4643_v21 = vsel %vm204_vm0, %v7720_v39, 0.0 }
 0x5dc   : > { %v3623_v57 = vpop.permute.xlu1 %3622 }
 0x5dd   : > { %3690 = vst.msk [vmem:[#allocation4 + $0xe0] sm:$0xff] %vm1311_vm7, %v3623_v57  ;;  %v3433_v35 = vpop.permute.xlu0 %3432  ;;  %v4642_v57 = vadd.f32 %v4641_v20, %v4640_v27 }
 0x5de   : > { %3499 = vst.msk [vmem:[#allocation4 + $0xe8] sm:$0xff] %vm1118_vm6, %v3433_v35  ;;  %v7734_v35 = vpop.f32.mrf.mxu1 }
 0x5e0   : > { %v3625_v31 = vpop.permute.xlu1 %3624  ;;  %v4297_v54 = vld [vmem:[#allocation4 + $0xd0] sm:$0xff] }
 0x5e1   : > { %3691 = vst.msk [vmem:[#allocation4 + $0xe8] sm:$0xff] %vm1311_vm7, %v3625_v31  ;;  %5252 = vmatprep.mubr.msk.f32.mxu1 %vm1961_vm11, %v4297_v54  ;;  %v4198_v59 = vpop.permute.xlu0 %4197  ;;  %v4742_v31 = vsel %vm204_vm0, %v4706_v13, 0.0  ;;  %v4744_v54 = vsel %vm204_vm0, %v4707_v51, 0.0 }
 0x5e2   : > { %4266 = vst.msk [vmem:[#allocation4 + $0xd8] sm:$0xff] %vm1891_vm10, %v4198_v59  ;;  %v4644_v59 = vadd.f32 %v4643_v21, %v4642_v57 }
 0x5e4   : > { %v3243_v41 = vpop.permute.xlu1 %3242 }
 0x5e5   : > { %3308 = vst.msk [vmem:[#allocation4 + $0xf0] sm:$0xff] %vm925_vm4, %v3243_v41  ;;  %v3816_v32 = vpop.permute.xlu0 %3815  ;;  %v4743_v41 = vadd.f32 %v4742_v31, %v4741_v60 }
 0x5e6   : > { %3883 = vst.msk [vmem:[#allocation4 + $0xe0] sm:$0xff] %vm1505_vm8, %v3816_v32 }
 0x5e8   : > { %v4008_v43 = vpop.permute.xlu1 %4007 }
 0x5e9   : > { %4075 = vst.msk [vmem:[#allocation4 + $0xe0] sm:$0xff] %vm1698_vm9, %v4008_v43  ;;  %v3818_v47 = vpop.permute.xlu0 %3817  ;;  %v4298_v7 = vld [vmem:[#allocation4 + $0xd8] sm:$0xff]  ;;  %v4708_v43 = vmul.f32 %v7710_v15, %v7710_v15 }
 0x5ea   : > { %3884 = vst.msk [vmem:[#allocation4 + $0xe8] sm:$0xff] %vm1505_vm8, %v3818_v47  ;;  %5253 = vmatmul.mubr.msk.f32.gmra.mxu1 %vm1961_vm11, %v4298_v7  ;;  %v7738_v32 = vpop.f32.mrf.mxu1  ;;  %v4709_v47 = vmul.f32 %v7734_v35, %v7734_v35  ;;  %v4745_v7 = vadd.f32 %v4744_v54, %v4743_v41 }
 0x5eb   : > { %v4712_v22 = vmul.f32 %v7738_v32, %v7738_v32  ;;  %v4653_v26 = vsel %vm204_vm0, %v7738_v32, 0.0 }
 0x5ec   : > { %v3435_v5 = vpop.permute.xlu1 %3434 }
 0x5ed   : > { %3500 = vst.msk [vmem:[#allocation4 + $0xf0] sm:$0xff] %vm1118_vm6, %v3435_v5  ;;  %v3245_v4 = vpop.permute.xlu0 %3244  ;;  %v4645_v5 = vsel %vm204_vm0, %v7710_v15, 0.0  ;;  %v4754_v3 = vsel %vm204_vm0, %v4712_v22, 0.0 }
 0x5ee   : > { %3309 = vst.msk [vmem:[#allocation4 + $0xf8] sm:$0xff] %vm925_vm4, %v3245_v4  ;;  %v4647_v4 = vsel %vm204_vm0, %v7734_v35, 0.0 }
 0x5f0   : > { %v4200_v11 = vpop.permute.xlu1 %4199 }
 0x5f1   : > { %4267 = vst.msk [vmem:[#allocation4 + $0xe0] sm:$0xff] %vm1891_vm10, %v4200_v11  ;;  %v4010_v48 = vpop.permute.xlu0 %4009  ;;  %v4646_v11 = vadd.f32 %v4645_v5, %v4644_v59 }
 0x5f2   : > { %4076 = vst.msk [vmem:[#allocation4 + $0xe8] sm:$0xff] %vm1698_vm9, %v4010_v48  ;;  %v7748_v48 = vpop.f32.mrf.mxu1 }
 0x5f4   : > { %v3627_v44 = vpop.permute.xlu1 %3626 }
 0x5f5   : > { %3692 = vst.msk [vmem:[#allocation4 + $0xf0] sm:$0xff] %vm1311_vm7, %v3627_v44  ;;  %v3437_v19 = vpop.permute.xlu0 %3436  ;;  %v4746_v44 = vsel %vm204_vm0, %v4708_v43, 0.0 }
 0x5f6   : > { %3501 = vst.msk [vmem:[#allocation4 + $0xf8] sm:$0xff] %vm1118_vm6, %v3437_v19  ;;  %v4748_v19 = vsel %vm204_vm0, %v4709_v47, 0.0 }
 0x5f8   : > { %v3629_v24 = vpop.permute.xlu1 %3628  ;;  %v4299_v12 = vld [vmem:[#allocation4 + $0xe0] sm:$0xff] }
 0x5f9   : > { %3693 = vst.msk [vmem:[#allocation4 + $0xf8] sm:$0xff] %vm1311_vm7, %v3629_v24  ;;  %5255 = vmatprep.mubr.msk.f32.mxu1 %vm1961_vm11, %v4299_v12  ;;  %v4202_v58 = vpop.permute.xlu0 %4201  ;;  %v4648_v24 = vadd.f32 %v4647_v4, %v4646_v11  ;;  %v4747_v12 = vadd.f32 %v4746_v44, %v4745_v7 }
 0x5fa   : > { %4268 = vst.msk [vmem:[#allocation4 + $0xe8] sm:$0xff] %vm1891_vm10, %v4202_v58 }
 0x5fc   : > { %v3822_v63 = vpop.permute.xlu1 %3821 }
 0x5fd   : > { %3886 = vst.msk [vmem:[#allocation4 + $0xf8] sm:$0xff] %vm1505_vm8, %v3822_v63  ;;  %v3820_v46 = vpop.permute.xlu0 %3819  ;;  %v4710_v63 = vmul.f32 %v7724_v16, %v7724_v16 }
 0x5fe   : > { %3885 = vst.msk [vmem:[#allocation4 + $0xf0] sm:$0xff] %vm1505_vm8, %v3820_v46  ;;  %v4711_v46 = vmul.f32 %v7748_v48, %v7748_v48 }
 0x600   : > { %v4014_v62 = vpop.permute.xlu1 %4013 }
 0x601   : > { %4078 = vst.msk [vmem:[#allocation4 + $0xf8] sm:$0xff] %vm1698_vm9, %v4014_v62  ;;  %v4012_v56 = vpop.permute.xlu0 %4011  ;;  %v4300_v53 = vld [vmem:[#allocation4 + $0xe8] sm:$0xff]  ;;  %v4749_v62 = vadd.f32 %v4748_v19, %v4747_v12 }
 0x602   : > { %4077 = vst.msk [vmem:[#allocation4 + $0xf0] sm:$0xff] %vm1698_vm9, %v4012_v56  ;;  %5256 = vmatmul.mubr.msk.f32.gmra.mxu1 %vm1961_vm11, %v4300_v53  ;;  %v7752_v58 = vpop.f32.mrf.mxu1  ;;  %v4649_v56 = vsel %vm204_vm0, %v7724_v16, 0.0  ;;  %v4651_v53 = vsel %vm204_vm0, %v7748_v48, 0.0 }
 0x603   : > { %v4714_v18 = vmul.f32 %v7752_v58, %v7752_v58  ;;  %v4657_v23 = vsel %vm204_vm0, %v7752_v58, 0.0 }
 0x604   : > { %v4206_v52 = vpop.permute.xlu1 %4205 }
 0x605   : > { %4270 = vst.msk [vmem:[#allocation4 + $0xf8] sm:$0xff] %vm1891_vm10, %v4206_v52  ;;  %v4204_v9 = vpop.permute.xlu0 %4203  ;;  %v4650_v52 = vadd.f32 %v4649_v56, %v4648_v24  ;;  %v4758_v13 = vsel %vm204_vm0, %v4714_v18, 0.0 }
 0x606   : > { %4269 = vst.msk [vmem:[#allocation4 + $0xf0] sm:$0xff] %vm1891_vm10, %v4204_v9  ;;  %v7762_v9 = vpop.f32.mrf.mxu1 }
 0x607   : > { %v4652_v25 = vadd.f32 %v4651_v53, %v4650_v52  ;;  %v4713_v38 = vmul.f32 %v7762_v9, %v7762_v9  ;;  %v4655_v1 = vsel %vm204_vm0, %v7762_v9, 0.0 }
 0x609   : > { %v4654_v14 = vadd.f32 %v4653_v26, %v4652_v25  ;;  %v4756_v50 = vsel %vm204_vm0, %v4713_v38, 0.0 }
 0x60b   : > { %v4656_v10 = vadd.f32 %v4655_v1, %v4654_v14 }
 0x60c   : > { %v4302_v30 = vld [vmem:[#allocation4 + $0xf8] sm:$0xff] }
 0x60d   : > { %v4301_v42 = vld [vmem:[#allocation4 + $0xf0] sm:$0xff]  ;;  %v4658_v27 = vadd.f32 %v4657_v23, %v4656_v10 }
 0x60e   : > { %5258 = vmatprep.mubr.msk.f32.mxu1 %vm1961_vm11, %v4301_v42  ;;  %v4752_v42 = vsel %vm204_vm0, %v4711_v46, 0.0 }
 0x60f   : > { %5259 = vmatmul.mubr.msk.f32.gmra.mxu1 %vm1961_vm11, %v4302_v30  ;;  %v4750_v30 = vsel %vm204_vm0, %v4710_v63, 0.0 }
 0x610   : > { %v4751_v37 = vadd.f32 %v4750_v30, %v4749_v62 }
 0x612   : > { %v4753_v0 = vadd.f32 %v4752_v42, %v4751_v37 }
 0x614   : > { %v4755_v45 = vadd.f32 %v4754_v3, %v4753_v0 }
 0x616   : > { %v4757_v49 = vadd.f32 %v4756_v50, %v4755_v45 }
 0x618   : > { %v4759_v20 = vadd.f32 %v4758_v13, %v4757_v49 }
 0x61a   : > { %v7766_v2 = vpop.f32.mrf.mxu1 }
 0x61b   : > { %v4716_v57 = vmul.f32 %v7766_v2, %v7766_v2  ;;  %v4661_v59 = vsel %vm204_vm0, %v7766_v2, 0.0 }
 0x61c   : > { %v7776_v6 = vpop.f32.mrf.mxu1 }
 0x61d   : > { %v4715_v28 = vmul.f32 %v7776_v6, %v7776_v6  ;;  %v4659_v34 = vsel %vm204_vm0, %v7776_v6, 0.0  ;;  %v4762_v7 = vsel %vm204_vm0, %v4716_v57, 0.0 }
 0x61e   : > { %v4660_v60 = vadd.f32 %v4659_v34, %v4658_v27 }
 0x61f   : > { %v4760_v51 = vsel %vm204_vm0, %v4715_v28, 0.0 }
 0x620   : > { %v4761_v54 = vadd.f32 %v4760_v51, %v4759_v20  ;;  %v4662_v43 = vadd.f32 %v4661_v59, %v4660_v60 }
 0x622   : > { %v4763_v11 = vadd.f32 %v4762_v7, %v4761_v54 }
 0x632   : > { %v7780_v29 = vpop.f32.mrf.mxu1 }
 0x633   : > { %v4718_v19 = vmul.f32 %v7780_v29, %v7780_v29  ;;  %v4665_v63 = vsel %vm204_vm0, %v7780_v29, 0.0 }
 0x634   : > { %v7790_v40 = vpop.f32.mrf.mxu1 }
 0x635   : > { %v4717_v31 = vmul.f32 %v7790_v40, %v7790_v40  ;;  %v4663_v41 = vsel %vm204_vm0, %v7790_v40, 0.0  ;;  %v4766_v53 = vsel %vm204_vm0, %v4718_v19, 0.0 }
 0x636   : > { %v4664_v4 = vadd.f32 %v4663_v41, %v4662_v43 }
 0x637   : > { %v4764_v5 = vsel %vm204_vm0, %v4717_v31, 0.0 }
 0x638   : > { %v4765_v12 = vadd.f32 %v4764_v5, %v4763_v11  ;;  %v4666_v62 = vadd.f32 %v4665_v63, %v4664_v4 }
 0x63a   : > { %v4767_v42 = vadd.f32 %v4766_v53, %v4765_v12 }
 0x64a   : > { %v7794_v21 = vpop.f32.mrf.mxu1 }
 0x64b   : > { %v4720_v37 = vmul.f32 %v7794_v21, %v7794_v21  ;;  %v4669_v0 = vsel %vm204_vm0, %v7794_v21, 0.0 }
 0x64c   : > { %v7804_v47 = vpop.f32.mrf.mxu1 }
 0x64d   : > { %v4719_v24 = vmul.f32 %v7804_v47, %v7804_v47  ;;  %v4667_v46 = vsel %vm204_vm0, %v7804_v47, 0.0  ;;  %v4770_v3 = vsel %vm204_vm0, %v4720_v37, 0.0 }
 0x64e   : > { %v4668_v30 = vadd.f32 %v4667_v46, %v4666_v62 }
 0x64f   : > { %v4768_v52 = vsel %vm204_vm0, %v4719_v24, 0.0 }
 0x650   : > { %v4769_v38 = vadd.f32 %v4768_v52, %v4767_v42  ;;  %v4670_v1 = vadd.f32 %v4669_v0, %v4668_v30 }
 0x652   : > { %v4771_v45 = vadd.f32 %v4770_v3, %v4769_v38 }
 0x662   : > { %v7808_v44 = vpop.f32.mrf.mxu1 }
 0x663   : > { %v4722_v28 = vmul.f32 %v7808_v44, %v7808_v44  ;;  %v4673_v34 = vsel %vm204_vm0, %v7808_v44, 0.0 }
 0x664   : > { %v7818_v56 = vpop.f32.mrf.mxu1 }
 0x665   : > { %v4721_v22 = vmul.f32 %v7818_v56, %v7818_v56  ;;  %v4671_v26 = vsel %vm204_vm0, %v7818_v56, 0.0  ;;  %v4774_v60 = vsel %vm204_vm0, %v4722_v28, 0.0 }
 0x666   : > { %v4672_v10 = vadd.f32 %v4671_v26, %v4670_v1 }
 0x667   : > { %v4772_v50 = vsel %vm204_vm0, %v4721_v22, 0.0 }
 0x668   : > { %v4773_v23 = vadd.f32 %v4772_v50, %v4771_v45  ;;  %v4674_v13 = vadd.f32 %v4673_v34, %v4672_v10 }
 0x66a   : > { %v4775_v31 = vadd.f32 %v4774_v60, %v4773_v23 }
 0x67a   : > { %v7822_v25 = vpop.f32.mrf.mxu1 }
 0x67b   : > { %v4724_v59 = vmul.f32 %v7822_v25, %v7822_v25  ;;  %v4677_v7 = vsel %vm204_vm0, %v7822_v25, 0.0 }
 0x67c   : > { %v7832_v14 = vpop.f32.mrf.mxu1 }
 0x67d   : > { %v4723_v49 = vmul.f32 %v7832_v14, %v7832_v14  ;;  %v4675_v27 = vsel %vm204_vm0, %v7832_v14, 0.0  ;;  %v4778_v19 = vsel %vm204_vm0, %v4724_v59, 0.0 }
 0x67e   : > { %v4676_v57 = vadd.f32 %v4675_v27, %v4674_v13 }
 0x67f   : > { %v4776_v20 = vsel %vm204_vm0, %v4723_v49, 0.0 }
 0x680   : > { %v4777_v43 = vadd.f32 %v4776_v20, %v4775_v31  ;;  %v4678_v4 = vadd.f32 %v4677_v7, %v4676_v57 }
 0x682   : > { %v4779_v63 = vadd.f32 %v4778_v19, %v4777_v43 }
 0x692   : > { %v7836_v18 = vpop.f32.mrf.mxu1 }
 0x693   : > { %v4726_v46 = vmul.f32 %v7836_v18, %v7836_v18  ;;  %v4681_v30 = vsel %vm204_vm0, %v7836_v18, 0.0 }
 0x694   : > { %v7846_v51 = vpop.f32.mrf.mxu1 }
 0x695   : > { %v4725_v41 = vmul.f32 %v7846_v51, %v7846_v51  ;;  %v4679_v5 = vsel %vm204_vm0, %v7846_v51, 0.0  ;;  %v4782_v38 = vsel %vm204_vm0, %v4726_v46, 0.0 }
 0x696   : > { %v4680_v12 = vadd.f32 %v4679_v5, %v4678_v4 }
 0x697   : > { %v4780_v24 = vsel %vm204_vm0, %v4725_v41, 0.0 }
 0x698   : > { %v4781_v52 = vadd.f32 %v4780_v24, %v4779_v63  ;;  %v4682_v37 = vadd.f32 %v4681_v30, %v4680_v12 }
 0x69a   : > { %v4783_v1 = vadd.f32 %v4782_v38, %v4781_v52 }
 0x6aa   : > { %v7850_v54 = vpop.f32.mrf.mxu1 }
 0x6ab   : > { %v4728_v3 = vmul.f32 %v7850_v54, %v7850_v54  ;;  %v4685_v45 = vsel %vm204_vm0, %v7850_v54, 0.0 }
 0x6ac   : > { %v7860_v11 = vpop.f32.mrf.mxu1 }
 0x6ad   : > { %v4727_v62 = vmul.f32 %v7860_v11, %v7860_v11  ;;  %v4683_v42 = vsel %vm204_vm0, %v7860_v11, 0.0  ;;  %v4786_v23 = vsel %vm204_vm0, %v4728_v3, 0.0 }
 0x6ae   : > { %v4684_v26 = vadd.f32 %v4683_v42, %v4682_v37 }
 0x6af   : > { %v4784_v0 = vsel %vm204_vm0, %v4727_v62, 0.0 }
 0x6b0   : > { %v4785_v10 = vadd.f32 %v4784_v0, %v4783_v1  ;;  %v4686_v49 = vadd.f32 %v4685_v45, %v4684_v26 }
 0x6b2   : > { %v4787_v13 = vadd.f32 %v4786_v23, %v4785_v10 }
 0x6c2   : > { %v7868_v53 = vpop.f32.mrf.mxu1 }
 0x6c3   : > { %v4730_v60 = vmul.f32 %v7868_v53, %v7868_v53  ;;  %v4689_v31 = vsel %vm204_vm0, %v7868_v53, 0.0 }
 0x6c4   : > { %v7874_v22 = vpop.f32.mrf.mxu1 }
 0x6c5   : > { %v4729_v50 = vmul.f32 %v7874_v22, %v7874_v22  ;;  %v4687_v28 = vsel %vm204_vm0, %v7874_v22, 0.0  ;;  %v4790_v43 = vsel %vm204_vm0, %v4730_v60, 0.0 }
 0x6c6   : > { %v4688_v27 = vadd.f32 %v4687_v28, %v4686_v49 }
 0x6c7   : > { %v4788_v34 = vsel %vm204_vm0, %v4729_v50, 0.0 }
 0x6c8   : > { %v4789_v20 = vadd.f32 %v4788_v34, %v4787_v13  ;;  %v4690_v41 = vadd.f32 %v4689_v31, %v4688_v27 }
 0x6ca   : > { %v4791_v24 = vadd.f32 %v4790_v43, %v4789_v20 }
 0x6cf   : > { %v7890_v57 = vpop.f32.mrf.mxu1 }
 0x6d0   : > { %v4732_v7 = vmul.f32 %v7890_v57, %v7890_v57  ;;  %v4693_v12 = vsel %vm204_vm0, %v7890_v57, 0.0 }
 0x6d1   : > { %v7894_v59 = vpop.f32.mrf.mxu1 }
 0x6d2   : > { %v4691_v5 = vsel %vm204_vm0, %v7894_v59, 0.0  ;;  %v4731_v4 = vmul.f32 %v7894_v59, %v7894_v59  ;;  %v4794_v52 = vsel %vm204_vm0, %v4732_v7, 0.0 }
 0x6d3   : > { %v4692_v19 = vadd.f32 %v4691_v5, %v4690_v41 }
 0x6d4   : > { %v4792_v63 = vsel %vm204_vm0, %v4731_v4, 0.0 }
 0x6d5   : > { %v4694_v46 = vadd.f32 %v4693_v12, %v4692_v19  ;;  %v4793_v62 = vadd.f32 %v4792_v63, %v4791_v24 }
 0x6d7   : > { %v4695_v30 = vrot.slane %v4694_v46, 4  ;;  %v4795_v42 = vadd.f32 %v4794_v52, %v4793_v62 }
 0x6d9   : > { %v4696_v37 = vadd.f32 %v4695_v30, %v4694_v46  ;;  %v4796_v38 = vrot.slane %v4795_v42, 4 }
 0x6db   : > { %v4697_v0 = vrot.slane %v4696_v37, 2  ;;  %v4797_v26 = vadd.f32 %v4796_v38, %v4795_v42 }
 0x6dd   : > { %v4698_v1 = vadd.f32 %v4697_v0, %v4696_v37  ;;  %v4798_v3 = vrot.slane %v4797_v26, 2 }
 0x6df   : > { %v4699_v50 = vrot.slane %v4698_v1, 1  ;;  %v4799_v10 = vadd.f32 %v4798_v3, %v4797_v26 }
 0x6e1   : > { %v4700_v45 = vadd.f32 %v4699_v50, %v4698_v1  ;;  %v4800_v28 = vrot.slane %v4799_v10, 1 }
 0x6e3   : > { %v4801_v49 = vadd.f32 %v4800_v28, %v4799_v10  ;;  %v7907_v23 = vmul.f32 0.00390625, %v4700_v45 }
 0x6e5   : > { %v4803_v34 = vmul.f32 0.00390625, %v4801_v49  ;;  %v4804_v27 = vmul.f32 %v7907_v23, %v7907_v23  ;;  %v4807_v31 = vsub.f32 %v7685_v8, %v7907_v23  ;;  %v4808_v41 = vsub.f32 %v7683_v36, %v7907_v23 }
 0x6e6   : > { %v4809_v43 = vsub.f32 %v7689_v33, %v7907_v23  ;;  %v4810_v7 = vsub.f32 %v7687_v55, %v7907_v23  ;;  %v4811_v5 = vsub.f32 %v7706_v17, %v7907_v23  ;;  %v4812_v4 = vsub.f32 %v7693_v61, %v7907_v23 }
 0x6e7   : > { %v4805_v13 = vsub.f32 %v4803_v34, %v4804_v27  ;;  %v4813_v19 = vsub.f32 %v7720_v39, %v7907_v23  ;;  %v4814_v8 = vsub.f32 %v7710_v15, %v7907_v23  ;;  %v4815_v36 = vsub.f32 %v7734_v35, %v7907_v23 }
 0x6e8   : > { %v4816_v33 = vsub.f32 %v7724_v16, %v7907_v23  ;;  %v4817_v55 = vsub.f32 %v7748_v48, %v7907_v23  ;;  %v4818_v17 = vsub.f32 %v7738_v32, %v7907_v23  ;;  %v4819_v61 = vsub.f32 %v7762_v9, %v7907_v23 }
 0x6e9   : > { %v4806_v60 = vmax.f32 %v4805_v13, 0.0  ;;  %v4820_v39 = vsub.f32 %v7752_v58, %v7907_v23  ;;  %v4821_v15 = vsub.f32 %v7776_v6, %v7907_v23  ;;  %v4822_v35 = vsub.f32 %v7766_v2, %v7907_v23 }
 0x6ea   : > { %v4823_v16 = vsub.f32 %v7790_v40, %v7907_v23  ;;  %v4824_v48 = vsub.f32 %v7780_v29, %v7907_v23  ;;  %v4825_v32 = vsub.f32 %v7804_v47, %v7907_v23  ;;  %v4826_v9 = vsub.f32 %v7794_v21, %v7907_v23 }
 0x6eb   : > { %v4839_v20 = vadd.f32 1e-05, %v4806_v60  ;;  %v4827_v58 = vsub.f32 %v7818_v56, %v7907_v23  ;;  %v4828_v6 = vsub.f32 %v7808_v44, %v7907_v23  ;;  %v4829_v2 = vsub.f32 %v7832_v14, %v7907_v23 }
 0x6ec   : > { %v4830_v40 = vsub.f32 %v7822_v25, %v7907_v23  ;;  %v4831_v29 = vsub.f32 %v7846_v51, %v7907_v23  ;;  %v4832_v47 = vsub.f32 %v7836_v18, %v7907_v23  ;;  %v4833_v21 = vsub.f32 %v7860_v11, %v7907_v23 }
 0x6ed   : > { %5279 = vrsqrt.f32 %v4839_v20  ;;  %v4834_v56 = vsub.f32 %v7850_v54, %v7907_v23  ;;  %v4835_v44 = vsub.f32 %v7874_v22, %v7907_v23  ;;  %v4836_v14 = vsub.f32 %v7868_v53, %v7907_v23 }
 0x6ee   : > { %v4837_v25 = vsub.f32 %v7894_v59, %v7907_v23  ;;  %v4838_v51 = vsub.f32 %v7890_v57, %v7907_v23 }
 0x6fa   : > { %v5280_v24 = vpop.eup %5279 }
 0x6fb   : > { %v4841_v18 = vmul.f32 %v5280_v24, %v4807_v31  ;;  %v4842_v12 = vmul.f32 %v5280_v24, %v4808_v41  ;;  %v4843_v63 = vmul.f32 %v5280_v24, %v4809_v43  ;;  %v4844_v11 = vmul.f32 %v5280_v24, %v4810_v7  ;;  %v8187_v41 = vld [vmem:[#allocation6_spill] sm:$0xff]  ;;  %v8188_v7 = vld [vmem:[#allocation8_spill] sm:$0xff] }
 0x6fc   : > { %v4845_v46 = vmul.f32 %v5280_v24, %v4811_v5  ;;  %v4846_v62 = vmul.f32 %v5280_v24, %v4812_v4  ;;  %v4847_v54 = vmul.f32 %v5280_v24, %v4813_v19  ;;  %v4848_v52 = vmul.f32 %v5280_v24, %v4814_v8  ;;  %v8189_v4 = vld [vmem:[#allocation5_spill] sm:$0xff]  ;;  %v8190_v8 = vld [vmem:[#allocation7_spill] sm:$0xff] }
 0x6fd   : > { %v4849_v30 = vmul.f32 %v5280_v24, %v4815_v36  ;;  %v4850_v42 = vmul.f32 %v5280_v24, %v4816_v33  ;;  %v4851_v22 = vmul.f32 %v5280_v24, %v4817_v55  ;;  %v4852_v37 = vmul.f32 %v5280_v24, %v4818_v17  ;;  %v8191_v33 = vld [vmem:[#allocation9_spill] sm:$0xff]  ;;  %v8192_v17 = vld [vmem:[#allocation10_spill] sm:$0xff] }
 0x6fe   : > { %v4853_v38 = vmul.f32 %v5280_v24, %v4819_v61  ;;  %v4854_v53 = vmul.f32 %v5280_v24, %v4820_v39  ;;  %v4855_v0 = vmul.f32 %v5280_v24, %v4821_v15  ;;  %v4856_v59 = vmul.f32 %v5280_v24, %v4822_v35  ;;  %v8193_v39 = vld [vmem:[#allocation11_spill] sm:$0xff]  ;;  %v8194_v35 = vld [vmem:[#allocation12_spill] sm:$0xff] }
 0x6ff   : > { %v4857_v26 = vmul.f32 %v5280_v24, %v4823_v16  ;;  %v4858_v1 = vmul.f32 %v5280_v24, %v4824_v48  ;;  %v4859_v57 = vmul.f32 %v5280_v24, %v4825_v32  ;;  %v4860_v3 = vmul.f32 %v5280_v24, %v4826_v9  ;;  %v8195_v48 = vld [vmem:[#allocation13_spill] sm:$0xff]  ;;  %v8196_v9 = vld [vmem:[#allocation14_spill] sm:$0xff] }
 0x700   : > { %v4861_v50 = vmul.f32 %v5280_v24, %v4827_v58  ;;  %v4862_v10 = vmul.f32 %v5280_v24, %v4828_v6  ;;  %v4863_v45 = vmul.f32 %v5280_v24, %v4829_v2  ;;  %v4864_v28 = vmul.f32 %v5280_v24, %v4830_v40  ;;  %v8197_v6 = vld [vmem:[#allocation15_spill] sm:$0xff]  ;;  %v8198_v40 = vld [vmem:[#allocation16_spill] sm:$0xff] }
 0x701   : > { %v4865_v49 = vmul.f32 %v5280_v24, %v4831_v29  ;;  %v4866_v23 = vmul.f32 %v5280_v24, %v4832_v47  ;;  %v4867_v34 = vmul.f32 %v5280_v24, %v4833_v21  ;;  %v4868_v27 = vmul.f32 %v5280_v24, %v4834_v56  ;;  %v8199_v47 = vld [vmem:[#allocation17_spill] sm:$0xff]  ;;  %v8200_v56 = vld [vmem:[#allocation18_spill] sm:$0xff] }
 0x702   : > { %v4869_v13 = vmul.f32 %v5280_v24, %v4835_v44  ;;  %v4870_v60 = vmul.f32 %v5280_v24, %v4836_v14  ;;  %v4871_v20 = vmul.f32 %v5280_v24, %v4837_v25  ;;  %v4872_v31 = vmul.f32 %v5280_v24, %v4838_v51  ;;  %v8201_v44 = vld [vmem:[#allocation19_spill] sm:$0xff]  ;;  %v8202_v25 = vld [vmem:[#allocation20_spill] sm:$0xff] }
 0x703   : > { %v4873_v43 = vadd.f32 %v4841_v18, %v8187_v41  ;;  %v4874_v5 = vadd.f32 %v4842_v12, %v8188_v7  ;;  %v4875_v19 = vadd.f32 %v4843_v63, %v8189_v4  ;;  %v4876_v36 = vadd.f32 %v4844_v11, %v8190_v8  ;;  %v8203_v18 = vld [vmem:[#allocation21_spill] sm:$0xff]  ;;  %v8204_v63 = vld [vmem:[#allocation22_spill] sm:$0xff] }
 0x704   : > { %v4877_v55 = vadd.f32 %v4845_v46, %v8191_v33  ;;  %v4878_v61 = vadd.f32 %v4846_v62, %v8192_v17  ;;  %v4879_v15 = vadd.f32 %v4847_v54, %v8193_v39  ;;  %v4880_v16 = vadd.f32 %v4848_v52, %v8194_v35  ;;  %v8205_v46 = vld [vmem:[#allocation23_spill] sm:$0xff]  ;;  %v8206_v54 = vld [vmem:[#allocation24_spill] sm:$0xff]  ;;  %v8216_v41 = vld [vmem:[#allocation34_spill] sm:$0xff] }
 0x705   : > { %v4881_v32 = vadd.f32 %v4849_v30, %v8195_v48  ;;  %v4882_v58 = vadd.f32 %v4850_v42, %v8196_v9  ;;  %v4883_v2 = vadd.f32 %v4851_v22, %v8197_v6  ;;  %v4884_v29 = vadd.f32 %v4852_v37, %v8198_v40  ;;  %4905 = vst.msk [vmem:[%s7980_s22] sm:$0xff] %vm204_vm0, %v4873_v43  ;;  %v8207_v30 = vld [vmem:[#allocation25_spill] sm:$0xff]  ;;  %v8208_v22 = vld [vmem:[#allocation26_spill] sm:$0xff]  ;;  %v8217_v43 = vld [vmem:[#allocation35_spill] sm:$0xff] }
 0x706   : > { %4906 = vst.msk [vmem:[%s7980_s22 + $0x8] sm:$0xff] %vm204_vm0, %v4874_v5  ;;  %4907 = vst.msk [vmem:[%s7980_s22 + $0x10] sm:$0xff] %vm204_vm0, %v4875_v19  ;;  %v4885_v21 = vadd.f32 %v4853_v38, %v8199_v47  ;;  %v4886_v24 = vadd.f32 %v4854_v53, %v8200_v56  ;;  %v4887_v14 = vadd.f32 %v4855_v0, %v8201_v44  ;;  %v8209_v38 = vld [vmem:[#allocation27_spill] sm:$0xff]  ;;  %v8210_v0 = vld [vmem:[#allocation28_spill] sm:$0xff] }
 0x707   : > { %4908 = vst.msk [vmem:[%s7980_s22 + $0x18] sm:$0xff] %vm204_vm0, %v4876_v36  ;;  %v4888_v51 = vadd.f32 %v4856_v59, %v8202_v25  ;;  %4909 = vst.msk [vmem:[%s7980_s22 + $0x20] sm:$0xff] %vm204_vm0, %v4877_v55  ;;  %v4889_v12 = vadd.f32 %v4857_v26, %v8203_v18  ;;  %v4890_v11 = vadd.f32 %v4858_v1, %v8204_v63  ;;  %v8211_v26 = vld [vmem:[#allocation29_spill] sm:$0xff] }
 0x708   : > { %4910 = vst.msk [vmem:[%s7980_s22 + $0x28] sm:$0xff] %vm204_vm0, %v4878_v61  ;;  %4911 = vst.msk [vmem:[%s7980_s22 + $0x30] sm:$0xff] %vm204_vm0, %v4879_v15  ;;  %v4891_v62 = vadd.f32 %v4859_v57, %v8205_v46  ;;  %v4892_v52 = vadd.f32 %v4860_v3, %v8206_v54  ;;  %v4893_v42 = vadd.f32 %v4861_v50, %v8207_v30  ;;  %v8212_v57 = vld [vmem:[#allocation30_spill] sm:$0xff]  ;;  %v8213_v50 = vld [vmem:[#allocation31_spill] sm:$0xff] }
 0x709   : > { %4912 = vst.msk [vmem:[%s7980_s22 + $0x38] sm:$0xff] %vm204_vm0, %v4880_v16  ;;  %4913 = vst.msk [vmem:[%s7980_s22 + $0x40] sm:$0xff] %vm204_vm0, %v4881_v32  ;;  %v4894_v37 = vadd.f32 %v4862_v10, %v8208_v22  ;;  %v4895_v53 = vadd.f32 %v4863_v45, %v8209_v38  ;;  %v4896_v59 = vadd.f32 %v4864_v28, %v8210_v0  ;;  %v8214_v45 = vld [vmem:[#allocation32_spill] sm:$0xff] }
 0x70a   : > { %4914 = vst.msk [vmem:[%s7980_s22 + $0x48] sm:$0xff] %vm204_vm0, %v4882_v58  ;;  %4915 = vst.msk [vmem:[%s7980_s22 + $0x50] sm:$0xff] %vm204_vm0, %v4883_v2  ;;  %v4897_v1 = vadd.f32 %v4865_v49, %v8211_v26  ;;  %v4898_v3 = vadd.f32 %v4866_v23, %v8212_v57  ;;  %v4899_v10 = vadd.f32 %v4867_v34, %v8213_v50  ;;  %v8215_v49 = vld [vmem:[#allocation33_spill] sm:$0xff] }
 0x70b   : > { %4916 = vst.msk [vmem:[%s7980_s22 + $0x58] sm:$0xff] %vm204_vm0, %v4884_v29  ;;  %4917 = vst.msk [vmem:[%s7980_s22 + $0x60] sm:$0xff] %vm204_vm0, %v4885_v21  ;;  %v4900_v28 = vadd.f32 %v4868_v27, %v8214_v45  ;;  %v4901_v23 = vadd.f32 %v4869_v13, %v8215_v49  ;;  %v4902_v34 = vadd.f32 %v4870_v60, %v8216_v41  ;;  %v8218_v27 = vld [vmem:[#allocation38_spill] sm:$0xff] }
 0x70c   : > { %4918 = vst.msk [vmem:[%s7980_s22 + $0x68] sm:$0xff] %vm204_vm0, %v4886_v24  ;;  %4919 = vst.msk [vmem:[%s7980_s22 + $0x70] sm:$0xff] %vm204_vm0, %v4887_v14  ;;  %v4903_v7 = vadd.f32 %v4871_v20, %v8217_v43  ;;  %v4904_v5 = vadd.f32 %v4872_v31, %v8218_v27 }
 0x70d   : > { %4920 = vst.msk [vmem:[%s7980_s22 + $0x78] sm:$0xff] %vm204_vm0, %v4888_v51  ;;  %4921 = vst.msk [vmem:[%s7980_s22 + $0x80] sm:$0xff] %vm204_vm0, %v4889_v12 }
 0x70e   : > { %4922 = vst.msk [vmem:[%s7980_s22 + $0x88] sm:$0xff] %vm204_vm0, %v4890_v11  ;;  %4923 = vst.msk [vmem:[%s7980_s22 + $0x90] sm:$0xff] %vm204_vm0, %v4891_v62 }
 0x70f   : > { %4924 = vst.msk [vmem:[%s7980_s22 + $0x98] sm:$0xff] %vm204_vm0, %v4892_v52  ;;  %4925 = vst.msk [vmem:[%s7980_s22 + $0xa0] sm:$0xff] %vm204_vm0, %v4893_v42 }
 0x710   : > { %4926 = vst.msk [vmem:[%s7980_s22 + $0xa8] sm:$0xff] %vm204_vm0, %v4894_v37  ;;  %4927 = vst.msk [vmem:[%s7980_s22 + $0xb0] sm:$0xff] %vm204_vm0, %v4895_v53 }
 0x711   : > { %4928 = vst.msk [vmem:[%s7980_s22 + $0xb8] sm:$0xff] %vm204_vm0, %v4896_v59  ;;  %4929 = vst.msk [vmem:[%s7980_s22 + $0xc0] sm:$0xff] %vm204_vm0, %v4897_v1 }
 0x712   : > { %4930 = vst.msk [vmem:[%s7980_s22 + $0xc8] sm:$0xff] %vm204_vm0, %v4898_v3  ;;  %4931 = vst.msk [vmem:[%s7980_s22 + $0xd0] sm:$0xff] %vm204_vm0, %v4899_v10 }
 0x713   : > { %4932 = vst.msk [vmem:[%s7980_s22 + $0xd8] sm:$0xff] %vm204_vm0, %v4900_v28  ;;  %4933 = vst.msk [vmem:[%s7980_s22 + $0xe0] sm:$0xff] %vm204_vm0, %v4901_v23 }
 0x714   : > { %4934 = vst.msk [vmem:[%s7980_s22 + $0xe8] sm:$0xff] %vm204_vm0, %v4902_v34  ;;  %4935 = vst.msk [vmem:[%s7980_s22 + $0xf0] sm:$0xff] %vm204_vm0, %v4903_v7 }
 0x715   : > { %4936 = vst.msk [vmem:[%s7980_s22 + $0xf8] sm:$0xff] %vm204_vm0, %v4904_v5 }
 0x716 PF: > { %s13_s12 = sadd.s32 1, %s5287_s12  }
 0x717   : > { %p10_p4 = scmp.ge.s32.totalorder %s13_s12, 4  }
 0x719   :  { %12 = sbr.rel (!%p10_p4) target bundleno = 1 (0x1), region = 68 }

</bundles_post_ra>
